<compile_context>
chip_gen: v5e
topology: v5e:2x2
jax: 0.10.0
libtpu: 0.0.40
codegen_flags: <defaults>
</compile_context>

<pallas_src>
import functools
import math

import jax
import jax.numpy as jnp
from jax.experimental import pallas as pl
from jax.experimental.pallas import tpu as pltpu

LN_EPS = 1e-12


def _gelu(x):
    c = math.sqrt(2.0 / math.pi)
    return 0.5 * x * (1.0 + jnp.tanh(c * (x + 0.044715 * x * x * x)))


def _pick_tile(dim, target, align):
    """Largest tile <= target dividing dim, preferring 256/128-aligned sizes
    (v6e/v7x MXU panels).  Falls back to the full dim (always legal)."""
    if dim <= target:
        return dim
    for a in (256, 128, align):
        if a < align or a > target:
            continue
        t = (target // a) * a
        while t >= a:
            if dim % t == 0:
                return t
            t -= a
    return dim


# ---------------------------------------------------------------------------
# Dense (tiled matmul) kernels
# ---------------------------------------------------------------------------
def _dense_kernel(x_ref, w_ref, b_ref, o_ref, acc_ref, *, activation):
    @pl.when(pl.program_id(2) == 0)
    def _():
        acc_ref[...] = jnp.zeros_like(acc_ref)

    acc_ref[...] += jnp.dot(x_ref[...], w_ref[...],
                            preferred_element_type=jnp.float32)

    @pl.when(pl.program_id(2) == pl.num_programs(2) - 1)
    def _():
        y = acc_ref[...] + b_ref[...]
        if activation == "tanh":
            y = jnp.tanh(y)
        elif activation == "gelu":
            y = _gelu(y)
        o_ref[...] = y.astype(o_ref.dtype)


def dense(x, w, b, activation="none", out_dtype=None):
    """Tiled x:[M,K] @ w:[K,N] + b:[N]; bf16 MXU inputs, f32 accumulation.
    `w` is expected to already be in x.dtype (pre-cast at param-prep time)."""
    M, K = x.shape
    N = w.shape[1]
    out_dtype = out_dtype or x.dtype
    tm = _pick_tile(M, 256, 16)
    tn = _pick_tile(N, 1024, 128)
    tk = _pick_tile(K, 1024, 128)
    # NOTE(v5e): if the weight-panel DMA is exposed, deepen buffering on the
    # (tk, tn) weight stream with pipeline_mode=pl.Buffered(3); not needed on
    # v6e/v7x and not applied here.
    return pl.pallas_call(
        functools.partial(_dense_kernel, activation=activation),
        out_shape=jax.ShapeDtypeStruct((M, N), out_dtype),
        grid=(M // tm, N // tn, K // tk),
        in_specs=[
            pl.BlockSpec((tm, tk), lambda i, j, k: (i, k)),
            pl.BlockSpec((tk, tn), lambda i, j, k: (k, j)),
            pl.BlockSpec((1, tn), lambda i, j, k: (0, j)),
        ],
        out_specs=pl.BlockSpec((tm, tn), lambda i, j, k: (i, j)),
        scratch_shapes=[pltpu.VMEM((tm, tn), jnp.float32)],
        compiler_params=pltpu.CompilerParams(
            dimension_semantics=("parallel", "parallel", "arbitrary")),
    )(x, w, b.reshape(1, N).astype(jnp.float32))


def _dense_ln_kernel(x_ref, w_ref, b_ref, r_ref, g_ref, bb_ref, o_ref, acc_ref):
    @pl.when(pl.program_id(1) == 0)
    def _():
        acc_ref[...] = jnp.zeros_like(acc_ref)

    acc_ref[...] += jnp.dot(x_ref[...], w_ref[...],
                            preferred_element_type=jnp.float32)

    @pl.when(pl.program_id(1) == pl.num_programs(1) - 1)
    def _():
        y = acc_ref[...] + b_ref[...] + r_ref[...].astype(jnp.float32)
        mu = jnp.mean(y, axis=-1, keepdims=True)
        var = jnp.mean((y - mu) ** 2, axis=-1, keepdims=True)
        yn = (y - mu) * jax.lax.rsqrt(var + LN_EPS)
        o_ref[...] = (yn * g_ref[...] + bb_ref[...]).astype(o_ref.dtype)


def dense_ln(x, w, b, residual, gamma, beta):
    """LayerNorm(x @ w + b + residual): matmul with fused bias/residual/LN
    epilogue.  Output columns are the full hidden dim (needed by LN)."""
    M, K = x.shape
    N = w.shape[1]
    tm = _pick_tile(M, 256, 16)
    tk = _pick_tile(K, 1024, 128)
    return pl.pallas_call(
        _dense_ln_kernel,
        out_shape=jax.ShapeDtypeStruct((M, N), residual.dtype),
        grid=(M // tm, K // tk),
        in_specs=[
            pl.BlockSpec((tm, tk), lambda i, k: (i, k)),
            pl.BlockSpec((tk, N), lambda i, k: (k, 0)),
            pl.BlockSpec((1, N), lambda i, k: (0, 0)),
            pl.BlockSpec((tm, N), lambda i, k: (i, 0)),
            pl.BlockSpec((1, N), lambda i, k: (0, 0)),
            pl.BlockSpec((1, N), lambda i, k: (0, 0)),
        ],
        out_specs=pl.BlockSpec((tm, N), lambda i, k: (i, 0)),
        scratch_shapes=[pltpu.VMEM((tm, N), jnp.float32)],
        compiler_params=pltpu.CompilerParams(
            dimension_semantics=("parallel", "arbitrary")),
    )(x, w, b.reshape(1, N).astype(jnp.float32), residual,
      gamma.reshape(1, N).astype(jnp.float32),
      beta.reshape(1, N).astype(jnp.float32))


def _ln_kernel(x_ref, g_ref, b_ref, o_ref):
    x = x_ref[...].astype(jnp.float32)
    mu = jnp.mean(x, axis=-1, keepdims=True)
    var = jnp.mean((x - mu) ** 2, axis=-1, keepdims=True)
    y = (x - mu) * jax.lax.rsqrt(var + LN_EPS)
    o_ref[...] = (y * g_ref[...] + b_ref[...]).astype(o_ref.dtype)


def layernorm(x, gamma, beta, out_dtype=None):
    """Row-tiled LayerNorm over the last dim (BertLayerNorm, eps=1e-12)."""
    M, H = x.shape
    tm = _pick_tile(M, 1024, 16)
    return pl.pallas_call(
        _ln_kernel,
        out_shape=jax.ShapeDtypeStruct((M, H), out_dtype or x.dtype),
        grid=(M // tm,),
        in_specs=[
            pl.BlockSpec((tm, H), lambda i: (i, 0)),
            pl.BlockSpec((1, H), lambda i: (0, 0)),
            pl.BlockSpec((1, H), lambda i: (0, 0)),
        ],
        out_specs=pl.BlockSpec((tm, H), lambda i: (i, 0)),
        compiler_params=pltpu.CompilerParams(
            dimension_semantics=("parallel",)),
    )(x, gamma.reshape(1, H).astype(jnp.float32),
      beta.reshape(1, H).astype(jnp.float32))


# ---------------------------------------------------------------------------
# Attention
# ---------------------------------------------------------------------------
def _attend(q, k, v, mask_1s, scale, out_dtype):
    """q,k,v: [S, G, Dh] bf16; mask_1s: [1, S] f32 additive key mask."""
    S, G, Dh = q.shape
    s = jnp.einsum("qgd,kgd->gqk", q, k,
                   preferred_element_type=jnp.float32)
    s = s * scale + mask_1s[None]                 # broadcast over (g, q)
    s = s - jnp.max(s, axis=-1, keepdims=True)
    p = jnp.exp(s)
    p = p * pl.reciprocal(jnp.sum(p, axis=-1, keepdims=True), approx=True)
    ctx = jnp.einsum("gqk,kgd->qgd", p.astype(q.dtype), v,
                     preferred_element_type=jnp.float32)
    return ctx.reshape(S, G * Dh).astype(out_dtype)


def _attn_group_kernel(q_ref, k_ref, v_ref, m_ref, o_ref, *, scale, heads,
                       head_dim):
    # Lane-dense path: q/k/v blocks are [S, heads*head_dim] with width a
    # multiple of 128, read straight from the fused QKV output columns.
    S = q_ref.shape[0]
    q = q_ref[...].reshape(S, heads, head_dim)
    k = k_ref[...].reshape(S, heads, head_dim)
    v = v_ref[...].reshape(S, heads, head_dim)
    o_ref[...] = _attend(q, k, v, m_ref[0], scale, o_ref.dtype)


def _attn_full_kernel(qkv_ref, m_ref, o_ref, *, scale, num_heads, head_dim):
    # Small-model fallback: whole [S, 3H] block per batch element (only used
    # when a head-group column block cannot be made 128-lane dense).
    S = qkv_ref.shape[0]
    H = num_heads * head_dim
    x = qkv_ref[...]
    q = x[:, :H].reshape(S, num_heads, head_dim)
    k = x[:, H:2 * H].reshape(S, num_heads, head_dim)
    v = x[:, 2 * H:].reshape(S, num_heads, head_dim)
    o_ref[...] = _attend(q, k, v, m_ref[0], scale, o_ref.dtype)


def attention(qkv, addmask, B, S, num_heads):
    """qkv: [B*S, 3H] fused QKV projection output (columns [q|k|v], heads
    contiguous); addmask: [B, S] additive mask.  Output: [B*S, H] in the
    natural layout for the following wo matmul (no HBM transposes)."""
    M, threeH = qkv.shape
    H = threeH // 3
    Dh = H // num_heads
    scale = 1.0 / math.sqrt(Dh)
    mask3 = addmask[:, None, :]                               # [B, 1, S]

    # Heads per grid step: make the column block width a multiple of 128.
    G = max(1, min(num_heads, 128 // Dh)) if Dh <= 128 else 1
    while num_heads % G:
        G -= 1
    W = G * Dh

    if W % 128 == 0:
        n_groups = H // W
        return pl.pallas_call(
            functools.partial(_attn_group_kernel, scale=scale, heads=G,
                              head_dim=Dh),
            out_shape=jax.ShapeDtypeStruct((M, H), qkv.dtype),
            grid=(B, n_groups),
            in_specs=[
                pl.BlockSpec((S, W), lambda b, g: (b, g)),                 # q
                pl.BlockSpec((S, W), lambda b, g: (b, n_groups + g)),      # k
                pl.BlockSpec((S, W), lambda b, g: (b, 2 * n_groups + g)),  # v
                pl.BlockSpec((1, 1, S), lambda b, g: (b, 0, 0)),
            ],
            out_specs=pl.BlockSpec((S, W), lambda b, g: (b, g)),
            compiler_params=pltpu.CompilerParams(
                dimension_semantics=("parallel", "parallel")),
        )(qkv, qkv, qkv, mask3)

    # Fallback for tiny hidden sizes (keeps block minor dims == full array dim).
    return pl.pallas_call(
        functools.partial(_attn_full_kernel, scale=scale,
                          num_heads=num_heads, head_dim=Dh),
        out_shape=jax.ShapeDtypeStruct((M, H), qkv.dtype),
        grid=(B,),
        in_specs=[
            pl.BlockSpec((S, 3 * H), lambda b: (b, 0)),
            pl.BlockSpec((1, 1, S), lambda b: (b, 0, 0)),
        ],
        out_specs=pl.BlockSpec((S, H), lambda b: (b, 0)),
        compiler_params=pltpu.CompilerParams(
            dimension_semantics=("parallel",)),
    )(qkv, mask3)


# ---------------------------------------------------------------------------
# Model glue (parameter setup, head dispatch)
# ---------------------------------------------------------------------------
def init_params(key, cfg):
    std = 0.02 * cfg["init_ratio"]
    keys = iter(jax.random.split(key, 256))

    def nrm(shape, dtype=jnp.float32):
        return (std * jax.random.normal(next(keys), shape, jnp.float32)
                ).astype(dtype)

    H, I = cfg["hidden_size"], cfg["intermediate_size"]
    bf = jnp.bfloat16
    params = {
        "word_emb": nrm((cfg["vocab_size"], H)),
        "pos_emb": nrm((cfg["max_position"], H)),
        "type_emb": nrm((cfg["type_vocab_size"], H)),
        "emb_ln_g": jnp.ones((H,), jnp.float32),
        "emb_ln_b": jnp.zeros((H,), jnp.float32),
        "layers": [],
        # LinearPooler (weight pre-cast to bf16 once).
        "pool_w": nrm((H, H), bf),
        "pool_b": jnp.zeros((H,), jnp.float32),
        # scoring_list heads (Linear heads only; SANClassifier not implemented)
        "cls_w": nrm((H, cfg["num_labels"])),
        "cls_b": jnp.zeros((cfg["num_labels"],), jnp.float32),
        "span_w": nrm((H, 2)),
        "span_b": jnp.zeros((2,), jnp.float32),
        "seq_w": nrm((H, cfg["num_seq_labels"])),
        "seq_b": jnp.zeros((cfg["num_seq_labels"],), jnp.float32),
    }
    for _ in range(cfg["num_layers"]):
        params["layers"].append({
            # fused QKV projection: columns ordered [q | k | v], heads
            # contiguous within each third (matches attention() BlockSpecs).
            "w_qkv": nrm((H, 3 * H), bf),
            "b_qkv": jnp.zeros((3 * H,), jnp.float32),
            "wo": nrm((H, H), bf), "bo": jnp.zeros((H,), jnp.float32),
            "ln1_g": jnp.ones((H,), jnp.float32),
            "ln1_b": jnp.zeros((H,), jnp.float32),
            "w1": nrm((H, I), bf), "b1": jnp.zeros((I,), jnp.float32),
            "w2": nrm((I, H), bf), "b2": jnp.zeros((H,), jnp.float32),
            "ln2_g": jnp.ones((H,), jnp.float32),
            "ln2_b": jnp.zeros((H,), jnp.float32),
        })
    return params


def encoder_layer(x2, p, addmask, B, S, num_heads):
    # x2: [B*S, H] bf16 activations.
    qkv = dense(x2, p["w_qkv"], p["b_qkv"])                  # fused QKV
    ctx = attention(qkv, addmask, B, S, num_heads)           # [B*S, H]
    # attn output proj + bias + residual + LayerNorm fused:
    x2 = dense_ln(ctx, p["wo"], p["bo"], x2, p["ln1_g"], p["ln1_b"])
    h = dense(x2, p["w1"], p["b1"], activation="gelu")       # FFN up + GELU
    # FFN down + bias + residual + LayerNorm fused:
    x2 = dense_ln(h, p["w2"], p["b2"], x2, p["ln2_g"], p["ln2_b"])
    return x2


def san_bert_forward(params, input_ids, token_type_ids, attention_mask, *,
                     cfg, task_type="classification"):
    B, S = input_ids.shape
    H = cfg["hidden_size"]

    # Embedding lookups (gather) kept in plain JAX glue; LayerNorm in Pallas.
    pos_ids = jnp.arange(S)
    emb = (params["word_emb"][input_ids]
           + params["pos_emb"][pos_ids][None, :, :]
           + params["type_emb"][token_type_ids])
    x2 = layernorm(emb.reshape(B * S, H), params["emb_ln_g"],
                   params["emb_ln_b"], out_dtype=jnp.bfloat16)

    # BERT extended attention mask, precomputed additively once.
    addmask = (attention_mask.astype(jnp.float32) - 1.0) * 10000.0

    for lp in params["layers"]:
        x2 = encoder_layer(x2, lp, addmask, B, S, cfg["num_heads"])

    sequence_output = x2.reshape(B, S, H)            # all_encoder_layers[-1]
    pooled_output = dense(sequence_output[:, 0, :],  # LinearPooler
                          params["pool_w"], params["pool_b"],
                          activation="tanh")
    pooled32 = pooled_output.astype(jnp.float32)

    # DropoutWrapper -> identity (inference).
    # Tiny-N task heads in plain JAX (output lanes < 128; negligible FLOPs).
    if task_type == "span":
        logits = pooled32 @ params["span_w"] + params["span_b"]
        return logits[:, 0], logits[:, 1]
    elif task_type == "sequence_labeling":
        flat = sequence_output.reshape(-1, H).astype(jnp.float32)
        return flat @ params["seq_w"] + params["seq_b"]
    else:  # classification, decoder_opt != 1
        return pooled32 @ params["cls_w"] + params["cls_b"]


if __name__ == "__main__":
    cfg = dict(
        vocab_size=64, hidden_size=128, num_heads=2, intermediate_size=256,
        num_layers=2, max_position=16, type_vocab_size=2,
        num_labels=3, num_seq_labels=5, init_ratio=1.0,
    )

    key = jax.random.PRNGKey(0)
    pkey, ikey, tkey = jax.random.split(key, 3)
    params = init_params(pkey, cfg)

    B, S = 2, 8
    input_ids = jax.random.randint(ikey, (B, S), 0, cfg["vocab_size"])
    token_type_ids = jax.random.randint(tkey, (B, S), 0, cfg["type_vocab_size"])
    attention_mask = jnp.ones((B, S), jnp.int32).at[1, 6:].set(0)

    fwd = {t: jax.jit(functools.partial(san_bert_forward, cfg=cfg, task_type=t))
           for t in ("classification", "span", "sequence_labeling")}

    cls_logits = fwd["classification"](params, input_ids, token_type_ids,
                                       attention_mask)
    start_scores, end_scores = fwd["span"](params, input_ids, token_type_ids,
                                           attention_mask)
    seq_logits = fwd["sequence_labeling"](params, input_ids, token_type_ids,
                                          attention_mask)

    jax.block_until_ready((cls_logits, start_scores, end_scores, seq_logits))
    assert cls_logits.shape == (B, cfg["num_labels"])
    assert start_scores.shape == (B,) and end_scores.shape == (B,)
    assert seq_logits.shape == (B * S, cfg["num_seq_labels"])
    print("KERNEL_OK")
</pallas_src>

<mosaic_0001>
module attributes {stable_mosaic.version = 11 : i64} {
  func.func @_ln_kernel(%arg0: i32, %arg1: memref<16x128xf32, #tpu.memory_space<vmem>>, %arg2: memref<1x128xf32, #tpu.memory_space<vmem>>, %arg3: memref<1x128xf32, #tpu.memory_space<vmem>>, %arg4: memref<16x128xbf16, #tpu.memory_space<vmem>>) attributes {dimension_semantics = [#tpu.dimension_semantics<parallel>], iteration_bounds = array<i64: 1>, scalar_prefetch = 0 : i64, scratch_operands = 0 : i64, tpu.core_type = #tpu.core_type<tc>, window_params = [{transform_indices = @transform_0, window_bounds = array<i64: 16, 128>}, {pipeline_mode = #tpu.pipeline_mode<synchronous>, transform_indices = @transform_1, window_bounds = array<i64: 1, 128>}, {pipeline_mode = #tpu.pipeline_mode<synchronous>, transform_indices = @transform_2, window_bounds = array<i64: 1, 128>}, {transform_indices = @transform_3, window_bounds = array<i64: 16, 128>}]} {
    %c0 = arith.constant 0 : index
    %c0_0 = arith.constant 0 : index
    %0 = vector.load %arg1[%c0, %c0_0] : memref<16x128xf32, #tpu.memory_space<vmem>>, vector<16x128xf32>
    %cst = arith.constant dense<0.000000e+00> : vector<16xf32>
    %1 = vector.multi_reduction <add>, %0, %cst [1] : vector<16x128xf32> to vector<16xf32>
    %2 = vector.shape_cast %1 : vector<16xf32> to vector<16x1xf32>
    %cst_1 = arith.constant 1.280000e+02 : f32
    %3 = vector.broadcast %cst_1 : f32 to vector<16x1xf32>
    %4 = arith.divf %2, %3 : vector<16x1xf32>
    %5 = vector.broadcast %4 : vector<16x1xf32> to vector<16x128xf32>
    %6 = arith.subf %0, %5 : vector<16x128xf32>
    %7 = arith.mulf %6, %6 : vector<16x128xf32>
    %cst_2 = arith.constant dense<0.000000e+00> : vector<16xf32>
    %8 = vector.multi_reduction <add>, %7, %cst_2 [1] : vector<16x128xf32> to vector<16xf32>
    %9 = vector.shape_cast %8 : vector<16xf32> to vector<16x1xf32>
    %cst_3 = arith.constant 1.280000e+02 : f32
    %10 = vector.broadcast %cst_3 : f32 to vector<16x1xf32>
    %11 = arith.divf %9, %10 : vector<16x1xf32>
    %12 = vector.broadcast %4 : vector<16x1xf32> to vector<16x128xf32>
    %13 = arith.subf %0, %12 : vector<16x128xf32>
    %cst_4 = arith.constant 9.99999996E-13 : f32
    %14 = vector.broadcast %cst_4 : f32 to vector<16x1xf32>
    %15 = arith.addf %11, %14 : vector<16x1xf32>
    %16 = math.rsqrt %15 : vector<16x1xf32>
    %17 = vector.broadcast %16 : vector<16x1xf32> to vector<16x128xf32>
    %18 = arith.mulf %13, %17 : vector<16x128xf32>
    %c0_5 = arith.constant 0 : index
    %c0_6 = arith.constant 0 : index
    %19 = vector.load %arg2[%c0_5, %c0_6] : memref<1x128xf32, #tpu.memory_space<vmem>>, vector<1x128xf32>
    %20 = vector.broadcast %19 : vector<1x128xf32> to vector<16x128xf32>
    %21 = arith.mulf %18, %20 : vector<16x128xf32>
    %c0_7 = arith.constant 0 : index
    %c0_8 = arith.constant 0 : index
    %22 = vector.load %arg3[%c0_7, %c0_8] : memref<1x128xf32, #tpu.memory_space<vmem>>, vector<1x128xf32>
    %23 = vector.broadcast %22 : vector<1x128xf32> to vector<16x128xf32>
    %24 = arith.addf %21, %23 : vector<16x128xf32>
    %25 = arith.truncf %24 : vector<16x128xf32> to vector<16x128xbf16>
    %c0_9 = arith.constant 0 : index
    %c0_10 = arith.constant 0 : index
    %26 = vector.load %arg4[%c0_9, %c0_10] : memref<16x128xbf16, #tpu.memory_space<vmem>>, vector<16x128xbf16>
    tpu.vector_store %arg4[%c0_9, %c0_10], %25 {strides = array<i32>} : memref<16x128xbf16, #tpu.memory_space<vmem>>, vector<16x128xbf16>,
    return
  }
  func.func @transform_0(%arg0: i32) -> (i32, i32) {
    %c0_i32 = arith.constant 0 : i32
    %c0_i32_0 = arith.constant 0 : i32
    return %arg0, %c0_i32 : i32, i32
  }
  func.func @transform_1(%arg0: i32) -> (i32, i32) {
    %c0_i32 = arith.constant 0 : i32
    %c0_i32_0 = arith.constant 0 : i32
    %c0_i32_1 = arith.constant 0 : i32
    return %c0_i32, %c0_i32_0 : i32, i32
  }
  func.func @transform_2(%arg0: i32) -> (i32, i32) {
    %c0_i32 = arith.constant 0 : i32
    %c0_i32_0 = arith.constant 0 : i32
    %c0_i32_1 = arith.constant 0 : i32
    return %c0_i32, %c0_i32_0 : i32, i32
  }
  func.func @transform_3(%arg0: i32) -> (i32, i32) {
    %c0_i32 = arith.constant 0 : i32
    %c0_i32_0 = arith.constant 0 : i32
    return %arg0, %c0_i32 : i32, i32
  }
}

module attributes {stable_mosaic.version = 11 : i64} {
  func.func @_dense_kernel(%arg0: i32, %arg1: i32, %arg2: i32, %arg3: memref<16x128xbf16, #tpu.memory_space<vmem>>, %arg4: memref<128x384xbf16, #tpu.memory_space<vmem>>, %arg5: memref<1x384xf32, #tpu.memory_space<vmem>>, %arg6: memref<16x384xbf16, #tpu.memory_space<vmem>>, %arg7: memref<16x384xf32, #tpu.memory_space<vmem>>) attributes {dimension_semantics = [#tpu.dimension_semantics<parallel>, #tpu.dimension_semantics<parallel>, #tpu.dimension_semantics<arbitrary>], iteration_bounds = array<i64: 1, 1, 1>, scalar_prefetch = 0 : i64, scratch_operands = 1 : i64, tpu.core_type = #tpu.core_type<tc>, window_params = [{transform_indices = @transform_0, window_bounds = array<i64: 16, 128>}, {transform_indices = @transform_1, window_bounds = array<i64: 128, 384>}, {transform_indices = @transform_2, window_bounds = array<i64: 1, 384>}, {transform_indices = @transform_3, window_bounds = array<i64: 16, 384>}]} {
    %c0_i32 = arith.constant 0 : i32
    %0 = arith.cmpi eq, %arg2, %c0_i32 : i32
    %1 = arith.extui %0 : i1 to i32
    %c0_i32_0 = arith.constant 0 : i32
    %2 = arith.cmpi ne, %1, %c0_i32_0 : i32
    scf.if %2 {
      %cst_10 = arith.constant 0.000000e+00 : f32
      %12 = vector.broadcast %cst_10 : f32 to vector<16x384xf32>
      %c0_11 = arith.constant 0 : index
      %c0_12 = arith.constant 0 : index
      %13 = vector.load %arg7[%c0_11, %c0_12] : memref<16x384xf32, #tpu.memory_space<vmem>>, vector<16x384xf32>
      tpu.vector_store %arg7[%c0_11, %c0_12], %12 {strides = array<i32>} : memref<16x384xf32, #tpu.memory_space<vmem>>, vector<16x384xf32>,
    } else {
    }
    %c0 = arith.constant 0 : index
    %c0_1 = arith.constant 0 : index
    %3 = vector.load %arg7[%c0, %c0_1] : memref<16x384xf32, #tpu.memory_space<vmem>>, vector<16x384xf32>
    %c0_2 = arith.constant 0 : index
    %c0_3 = arith.constant 0 : index
    %4 = vector.load %arg3[%c0_2, %c0_3] : memref<16x128xbf16, #tpu.memory_space<vmem>>, vector<16x128xbf16>
    %c0_4 = arith.constant 0 : index
    %c0_5 = arith.constant 0 : index
    %5 = vector.load %arg4[%c0_4, %c0_5] : memref<128x384xbf16, #tpu.memory_space<vmem>>, vector<128x384xbf16>
    %cst = arith.constant dense<0.000000e+00> : vector<16x384xf32>
    %6 = tpu.matmul %4, %5, %cst {dimension_numbers = #tpu.dot_dimension_numbers<[1], [0], [0], [1], [0, 0, 1, 1], [], []>} : vector<16x128xbf16>, vector<128x384xbf16>, vector<16x384xf32> -> vector<16x384xf32>
    %7 = arith.addf %3, %6 : vector<16x384xf32>
    %c0_6 = arith.constant 0 : index
    %c0_7 = arith.constant 0 : index
    %8 = vector.load %arg7[%c0_6, %c0_7] : memref<16x384xf32, #tpu.memory_space<vmem>>, vector<16x384xf32>
    tpu.vector_store %arg7[%c0_6, %c0_7], %7 {strides = array<i32>} : memref<16x384xf32, #tpu.memory_space<vmem>>, vector<16x384xf32>,
    %c0_i32_8 = arith.constant 0 : i32
    %9 = arith.cmpi eq, %arg2, %c0_i32_8 : i32
    %10 = arith.extui %9 : i1 to i32
    %c0_i32_9 = arith.constant 0 : i32
    %11 = arith.cmpi ne, %10, %c0_i32_9 : i32
    scf.if %11 {
      %c0_10 = arith.constant 0 : index
      %c0_11 = arith.constant 0 : index
      %12 = vector.load %arg7[%c0_10, %c0_11] : memref<16x384xf32, #tpu.memory_space<vmem>>, vector<16x384xf32>
      %c0_12 = arith.constant 0 : index
      %c0_13 = arith.constant 0 : index
      %13 = vector.load %arg5[%c0_12, %c0_13] : memref<1x384xf32, #tpu.memory_space<vmem>>, vector<1x384xf32>
      %14 = vector.broadcast %13 : vector<1x384xf32> to vector<16x384xf32>
      %15 = arith.addf %12, %14 : vector<16x384xf32>
      %16 = arith.truncf %15 : vector<16x384xf32> to vector<16x384xbf16>
      %c0_14 = arith.constant 0 : index
      %c0_15 = arith.constant 0 : index
      %17 = vector.load %arg6[%c0_14, %c0_15] : memref<16x384xbf16, #tpu.memory_space<vmem>>, vector<16x384xbf16>
      tpu.vector_store %arg6[%c0_14, %c0_15], %16 {strides = array<i32>} : memref<16x384xbf16, #tpu.memory_space<vmem>>, vector<16x384xbf16>,
    } else {
    }
    return
  }
  func.func @transform_0(%arg0: i32, %arg1: i32, %arg2: i32) -> (i32, i32) {
    %c0_i32 = arith.constant 0 : i32
    return %arg0, %arg2 : i32, i32
  }
  func.func @transform_1(%arg0: i32, %arg1: i32, %arg2: i32) -> (i32, i32) {
    %c0_i32 = arith.constant 0 : i32
    return %arg2, %arg1 : i32, i32
  }
  func.func @transform_2(%arg0: i32, %arg1: i32, %arg2: i32) -> (i32, i32) {
    %c0_i32 = arith.constant 0 : i32
    %c0_i32_0 = arith.constant 0 : i32
    return %c0_i32, %arg1 : i32, i32
  }
  func.func @transform_3(%arg0: i32, %arg1: i32, %arg2: i32) -> (i32, i32) {
    %c0_i32 = arith.constant 0 : i32
    return %arg0, %arg1 : i32, i32
  }
}

module attributes {stable_mosaic.version = 11 : i64} {
  func.func @_attn_group_kernel(%arg0: i32, %arg1: i32, %arg2: memref<8x128xbf16, #tpu.memory_space<vmem>>, %arg3: memref<8x128xbf16, #tpu.memory_space<vmem>>, %arg4: memref<8x128xbf16, #tpu.memory_space<vmem>>, %arg5: memref<1x1x8xf32, #tpu.memory_space<vmem>>, %arg6: memref<8x128xbf16, #tpu.memory_space<vmem>>) attributes {dimension_semantics = [#tpu.dimension_semantics<parallel>, #tpu.dimension_semantics<parallel>], iteration_bounds = array<i64: 2, 1>, scalar_prefetch = 0 : i64, scratch_operands = 0 : i64, tpu.core_type = #tpu.core_type<tc>, window_params = [{transform_indices = @transform_0, window_bounds = array<i64: 8, 128>}, {transform_indices = @transform_1, window_bounds = array<i64: 8, 128>}, {transform_indices = @transform_2, window_bounds = array<i64: 8, 128>}, {transform_indices = @transform_3, window_bounds = array<i64: 1, 1, 8>}, {transform_indices = @transform_4, window_bounds = array<i64: 8, 128>}]} {
    %c0 = arith.constant 0 : index
    %c0_0 = arith.constant 0 : index
    %0 = vector.load %arg2[%c0, %c0_0] : memref<8x128xbf16, #tpu.memory_space<vmem>>, vector<8x128xbf16>
    %1 = vector.shape_cast %0 : vector<8x128xbf16> to vector<8x2x64xbf16>
    %c0_1 = arith.constant 0 : index
    %c0_2 = arith.constant 0 : index
    %2 = vector.load %arg3[%c0_1, %c0_2] : memref<8x128xbf16, #tpu.memory_space<vmem>>, vector<8x128xbf16>
    %3 = vector.shape_cast %2 : vector<8x128xbf16> to vector<8x2x64xbf16>
    %c0_3 = arith.constant 0 : index
    %c0_4 = arith.constant 0 : index
    %4 = vector.load %arg4[%c0_3, %c0_4] : memref<8x128xbf16, #tpu.memory_space<vmem>>, vector<8x128xbf16>
    %5 = vector.shape_cast %4 : vector<8x128xbf16> to vector<8x2x64xbf16>
    %c0_5 = arith.constant 0 : index
    %c0_6 = arith.constant 0 : index
    %c0_7 = arith.constant 0 : index
    %6 = vector.load %arg5[%c0_5, %c0_6, %c0_7] : memref<1x1x8xf32, #tpu.memory_space<vmem>>, vector<1x1x8xf32>
    %7 = vector.shape_cast %6 : vector<1x1x8xf32> to vector<1x8xf32>
    "tpu.trace_start"() <{level = 10 : i32, message = "qgd,kgd->gqk"}> : () -> ()
    %cst = arith.constant dense<0.000000e+00> : vector<2x8x8xf32>
    %8 = tpu.matmul %1, %3, %cst {dimension_numbers = #tpu.dot_dimension_numbers<[2], [2], [0], [0], [0, 1, 0, 0, 1, 0], [1], [1]>} : vector<8x2x64xbf16>, vector<8x2x64xbf16>, vector<2x8x8xf32> -> vector<2x8x8xf32>
    "tpu.trace_stop"() : () -> ()
    %cst_8 = arith.constant 1.250000e-01 : f32
    %9 = vector.broadcast %cst_8 : f32 to vector<2x8x8xf32>
    %10 = arith.mulf %8, %9 : vector<2x8x8xf32>
    %11 = vector.shape_cast %7 : vector<1x8xf32> to vector<1x1x8xf32>
    %12 = vector.broadcast %11 : vector<1x1x8xf32> to vector<2x8x8xf32>
    %13 = arith.addf %10, %12 : vector<2x8x8xf32>
    %cst_9 = arith.constant dense<0xFF800000> : vector<2x8xf32>
    %14 = vector.multi_reduction <maximumf>, %13, %cst_9 [2] : vector<2x8x8xf32> to vector<2x8xf32>
    %15 = vector.shape_cast %14 : vector<2x8xf32> to vector<2x8x1xf32>
    %16 = vector.broadcast %15 : vector<2x8x1xf32> to vector<2x8x8xf32>
    %17 = arith.subf %13, %16 : vector<2x8x8xf32>
    %18 = math.exp %17 : vector<2x8x8xf32>
    %cst_10 = arith.constant dense<0.000000e+00> : vector<2x8xf32>
    %19 = vector.multi_reduction <add>, %18, %cst_10 [2] : vector<2x8x8xf32> to vector<2x8xf32>
    %20 = vector.shape_cast %19 : vector<2x8xf32> to vector<2x8x1xf32>
    %21 = tpu.reciprocal %20 {approx = true} : vector<2x8x1xf32> -> vector<2x8x1xf32>
    %22 = vector.broadcast %21 : vector<2x8x1xf32> to vector<2x8x8xf32>
    %23 = arith.mulf %18, %22 : vector<2x8x8xf32>
    %24 = arith.truncf %23 : vector<2x8x8xf32> to vector<2x8x8xbf16>
    "tpu.trace_start"() <{level = 10 : i32, message = "gqk,kgd->qgd"}> : () -> ()
    %cst_11 = arith.constant dense<0.000000e+00> : vector<2x64x8xf32>
    %25 = tpu.matmul %5, %24, %cst_11 {dimension_numbers = #tpu.dot_dimension_numbers<[0], [2], [2], [1], [0, 1, 0, 2, 1, 1], [1], [0]>} : vector<8x2x64xbf16>, vector<2x8x8xbf16>, vector<2x64x8xf32> -> vector<2x64x8xf32>
    %26 = tpu.transpose %25, [2, 0, 1] : vector<2x64x8xf32> -> vector<8x2x64xf32>
    "tpu.trace_stop"() : () -> ()
    %27 = vector.shape_cast %26 : vector<8x2x64xf32> to vector<8x128xf32>
    %28 = arith.truncf %27 : vector<8x128xf32> to vector<8x128xbf16>
    %c0_12 = arith.constant 0 : index
    %c0_13 = arith.constant 0 : index
    %29 = vector.load %arg6[%c0_12, %c0_13] : memref<8x128xbf16, #tpu.memory_space<vmem>>, vector<8x128xbf16>
    tpu.vector_store %arg6[%c0_12, %c0_13], %28 {strides = array<i32>} : memref<8x128xbf16, #tpu.memory_space<vmem>>, vector<8x128xbf16>,
    return
  }
  func.func @transform_0(%arg0: i32, %arg1: i32) -> (i32, i32) {
    %c0_i32 = arith.constant 0 : i32
    return %arg0, %arg1 : i32, i32
  }
  func.func @transform_1(%arg0: i32, %arg1: i32) -> (i32, i32) {
    %c1_i32 = arith.constant 1 : i32
    %0 = arith.addi %c1_i32, %arg1 : i32
    %c0_i32 = arith.constant 0 : i32
    return %arg0, %0 : i32, i32
  }
  func.func @transform_2(%arg0: i32, %arg1: i32) -> (i32, i32) {
    %c2_i32 = arith.constant 2 : i32
    %0 = arith.addi %c2_i32, %arg1 : i32
    %c0_i32 = arith.constant 0 : i32
    return %arg0, %0 : i32, i32
  }
  func.func @transform_3(%arg0: i32, %arg1: i32) -> (i32, i32, i32) {
    %c0_i32 = arith.constant 0 : i32
    %c0_i32_0 = arith.constant 0 : i32
    %c0_i32_1 = arith.constant 0 : i32
    return %arg0, %c0_i32, %c0_i32_0 : i32, i32, i32
  }
  func.func @transform_4(%arg0: i32, %arg1: i32) -> (i32, i32) {
    %c0_i32 = arith.constant 0 : i32
    return %arg0, %arg1 : i32, i32
  }
}

module attributes {stable_mosaic.version = 11 : i64} {
  func.func @_dense_ln_kernel(%arg0: i32, %arg1: i32, %arg2: memref<16x128xbf16, #tpu.memory_space<vmem>>, %arg3: memref<128x128xbf16, #tpu.memory_space<vmem>>, %arg4: memref<1x128xf32, #tpu.memory_space<vmem>>, %arg5: memref<16x128xbf16, #tpu.memory_space<vmem>>, %arg6: memref<1x128xf32, #tpu.memory_space<vmem>>, %arg7: memref<1x128xf32, #tpu.memory_space<vmem>>, %arg8: memref<16x128xbf16, #tpu.memory_space<vmem>>, %arg9: memref<16x128xf32, #tpu.memory_space<vmem>>) attributes {dimension_semantics = [#tpu.dimension_semantics<parallel>, #tpu.dimension_semantics<arbitrary>], iteration_bounds = array<i64: 1, 1>, scalar_prefetch = 0 : i64, scratch_operands = 1 : i64, tpu.core_type = #tpu.core_type<tc>, window_params = [{transform_indices = @transform_0, window_bounds = array<i64: 16, 128>}, {transform_indices = @transform_1, window_bounds = array<i64: 128, 128>}, {pipeline_mode = #tpu.pipeline_mode<synchronous>, transform_indices = @transform_2, window_bounds = array<i64: 1, 128>}, {transform_indices = @transform_3, window_bounds = array<i64: 16, 128>}, {pipeline_mode = #tpu.pipeline_mode<synchronous>, transform_indices = @transform_4, window_bounds = array<i64: 1, 128>}, {pipeline_mode = #tpu.pipeline_mode<synchronous>, transform_indices = @transform_5, window_bounds = array<i64: 1, 128>}, {transform_indices = @transform_6, window_bounds = array<i64: 16, 128>}]} {
    %c0_i32 = arith.constant 0 : i32
    %0 = arith.cmpi eq, %arg1, %c0_i32 : i32
    %1 = arith.extui %0 : i1 to i32
    %c0_i32_0 = arith.constant 0 : i32
    %2 = arith.cmpi ne, %1, %c0_i32_0 : i32
    scf.if %2 {
      %cst_10 = arith.constant 0.000000e+00 : f32
      %12 = vector.broadcast %cst_10 : f32 to vector<16x128xf32>
      %c0_11 = arith.constant 0 : index
      %c0_12 = arith.constant 0 : index
      %13 = vector.load %arg9[%c0_11, %c0_12] : memref<16x128xf32, #tpu.memory_space<vmem>>, vector<16x128xf32>
      tpu.vector_store %arg9[%c0_11, %c0_12], %12 {strides = array<i32>} : memref<16x128xf32, #tpu.memory_space<vmem>>, vector<16x128xf32>,
    } else {
    }
    %c0 = arith.constant 0 : index
    %c0_1 = arith.constant 0 : index
    %3 = vector.load %arg9[%c0, %c0_1] : memref<16x128xf32, #tpu.memory_space<vmem>>, vector<16x128xf32>
    %c0_2 = arith.constant 0 : index
    %c0_3 = arith.constant 0 : index
    %4 = vector.load %arg2[%c0_2, %c0_3] : memref<16x128xbf16, #tpu.memory_space<vmem>>, vector<16x128xbf16>
    %c0_4 = arith.constant 0 : index
    %c0_5 = arith.constant 0 : index
    %5 = vector.load %arg3[%c0_4, %c0_5] : memref<128x128xbf16, #tpu.memory_space<vmem>>, vector<128x128xbf16>
    %cst = arith.constant dense<0.000000e+00> : vector<16x128xf32>
    %6 = tpu.matmul %4, %5, %cst {dimension_numbers = #tpu.dot_dimension_numbers<[1], [0], [0], [1], [0, 0, 1, 1], [], []>} : vector<16x128xbf16>, vector<128x128xbf16>, vector<16x128xf32> -> vector<16x128xf32>
    %7 = arith.addf %3, %6 : vector<16x128xf32>
    %c0_6 = arith.constant 0 : index
    %c0_7 = arith.constant 0 : index
    %8 = vector.load %arg9[%c0_6, %c0_7] : memref<16x128xf32, #tpu.memory_space<vmem>>, vector<16x128xf32>
    tpu.vector_store %arg9[%c0_6, %c0_7], %7 {strides = array<i32>} : memref<16x128xf32, #tpu.memory_space<vmem>>, vector<16x128xf32>,
    %c0_i32_8 = arith.constant 0 : i32
    %9 = arith.cmpi eq, %arg1, %c0_i32_8 : i32
    %10 = arith.extui %9 : i1 to i32
    %c0_i32_9 = arith.constant 0 : i32
    %11 = arith.cmpi ne, %10, %c0_i32_9 : i32
    scf.if %11 {
      %c0_10 = arith.constant 0 : index
      %c0_11 = arith.constant 0 : index
      %12 = vector.load %arg9[%c0_10, %c0_11] : memref<16x128xf32, #tpu.memory_space<vmem>>, vector<16x128xf32>
      %c0_12 = arith.constant 0 : index
      %c0_13 = arith.constant 0 : index
      %13 = vector.load %arg4[%c0_12, %c0_13] : memref<1x128xf32, #tpu.memory_space<vmem>>, vector<1x128xf32>
      %14 = vector.broadcast %13 : vector<1x128xf32> to vector<16x128xf32>
      %15 = arith.addf %12, %14 : vector<16x128xf32>
      %c0_14 = arith.constant 0 : index
      %c0_15 = arith.constant 0 : index
      %16 = vector.load %arg5[%c0_14, %c0_15] : memref<16x128xbf16, #tpu.memory_space<vmem>>, vector<16x128xbf16>
      %17 = arith.extf %16 : vector<16x128xbf16> to vector<16x128xf32>
      %18 = arith.addf %15, %17 : vector<16x128xf32>
      %cst_16 = arith.constant dense<0.000000e+00> : vector<16xf32>
      %19 = vector.multi_reduction <add>, %18, %cst_16 [1] : vector<16x128xf32> to vector<16xf32>
      %20 = vector.shape_cast %19 : vector<16xf32> to vector<16x1xf32>
      %cst_17 = arith.constant 1.280000e+02 : f32
      %21 = vector.broadcast %cst_17 : f32 to vector<16x1xf32>
      %22 = arith.divf %20, %21 : vector<16x1xf32>
      %23 = vector.broadcast %22 : vector<16x1xf32> to vector<16x128xf32>
      %24 = arith.subf %18, %23 : vector<16x128xf32>
      %25 = arith.mulf %24, %24 : vector<16x128xf32>
      %cst_18 = arith.constant dense<0.000000e+00> : vector<16xf32>
      %26 = vector.multi_reduction <add>, %25, %cst_18 [1] : vector<16x128xf32> to vector<16xf32>
      %27 = vector.shape_cast %26 : vector<16xf32> to vector<16x1xf32>
      %cst_19 = arith.constant 1.280000e+02 : f32
      %28 = vector.broadcast %cst_19 : f32 to vector<16x1xf32>
      %29 = arith.divf %27, %28 : vector<16x1xf32>
      %30 = vector.broadcast %22 : vector<16x1xf32> to vector<16x128xf32>
      %31 = arith.subf %18, %30 : vector<16x128xf32>
      %cst_20 = arith.constant 9.99999996E-13 : f32
      %32 = vector.broadcast %cst_20 : f32 to vector<16x1xf32>
      %33 = arith.addf %29, %32 : vector<16x1xf32>
      %34 = math.rsqrt %33 : vector<16x1xf32>
      %35 = vector.broadcast %34 : vector<16x1xf32> to vector<16x128xf32>
      %36 = arith.mulf %31, %35 : vector<16x128xf32>
      %c0_21 = arith.constant 0 : index
      %c0_22 = arith.constant 0 : index
      %37 = vector.load %arg6[%c0_21, %c0_22] : memref<1x128xf32, #tpu.memory_space<vmem>>, vector<1x128xf32>
      %38 = vector.broadcast %37 : vector<1x128xf32> to vector<16x128xf32>
      %39 = arith.mulf %36, %38 : vector<16x128xf32>
      %c0_23 = arith.constant 0 : index
      %c0_24 = arith.constant 0 : index
      %40 = vector.load %arg7[%c0_23, %c0_24] : memref<1x128xf32, #tpu.memory_space<vmem>>, vector<1x128xf32>
      %41 = vector.broadcast %40 : vector<1x128xf32> to vector<16x128xf32>
      %42 = arith.addf %39, %41 : vector<16x128xf32>
      %43 = arith.truncf %42 : vector<16x128xf32> to vector<16x128xbf16>
      %c0_25 = arith.constant 0 : index
      %c0_26 = arith.constant 0 : index
      %44 = vector.load %arg8[%c0_25, %c0_26] : memref<16x128xbf16, #tpu.memory_space<vmem>>, vector<16x128xbf16>
      tpu.vector_store %arg8[%c0_25, %c0_26], %43 {strides = array<i32>} : memref<16x128xbf16, #tpu.memory_space<vmem>>, vector<16x128xbf16>,
    } else {
    }
    return
  }
  func.func @transform_0(%arg0: i32, %arg1: i32) -> (i32, i32) {
    %c0_i32 = arith.constant 0 : i32
    return %arg0, %arg1 : i32, i32
  }
  func.func @transform_1(%arg0: i32, %arg1: i32) -> (i32, i32) {
    %c0_i32 = arith.constant 0 : i32
    %c0_i32_0 = arith.constant 0 : i32
    return %arg1, %c0_i32 : i32, i32
  }
  func.func @transform_2(%arg0: i32, %arg1: i32) -> (i32, i32) {
    %c0_i32 = arith.constant 0 : i32
    %c0_i32_0 = arith.constant 0 : i32
    %c0_i32_1 = arith.constant 0 : i32
    return %c0_i32, %c0_i32_0 : i32, i32
  }
  func.func @transform_3(%arg0: i32, %arg1: i32) -> (i32, i32) {
    %c0_i32 = arith.constant 0 : i32
    %c0_i32_0 = arith.constant 0 : i32
    return %arg0, %c0_i32 : i32, i32
  }
  func.func @transform_4(%arg0: i32, %arg1: i32) -> (i32, i32) {
    %c0_i32 = arith.constant 0 : i32
    %c0_i32_0 = arith.constant 0 : i32
    %c0_i32_1 = arith.constant 0 : i32
    return %c0_i32, %c0_i32_0 : i32, i32
  }
  func.func @transform_5(%arg0: i32, %arg1: i32) -> (i32, i32) {
    %c0_i32 = arith.constant 0 : i32
    %c0_i32_0 = arith.constant 0 : i32
    %c0_i32_1 = arith.constant 0 : i32
    return %c0_i32, %c0_i32_0 : i32, i32
  }
  func.func @transform_6(%arg0: i32, %arg1: i32) -> (i32, i32) {
    %c0_i32 = arith.constant 0 : i32
    %c0_i32_0 = arith.constant 0 : i32
    return %arg0, %c0_i32 : i32, i32
  }
}

module attributes {stable_mosaic.version = 11 : i64} {
  func.func @_dense_kernel(%arg0: i32, %arg1: i32, %arg2: i32, %arg3: memref<16x128xbf16, #tpu.memory_space<vmem>>, %arg4: memref<128x256xbf16, #tpu.memory_space<vmem>>, %arg5: memref<1x256xf32, #tpu.memory_space<vmem>>, %arg6: memref<16x256xbf16, #tpu.memory_space<vmem>>, %arg7: memref<16x256xf32, #tpu.memory_space<vmem>>) attributes {dimension_semantics = [#tpu.dimension_semantics<parallel>, #tpu.dimension_semantics<parallel>, #tpu.dimension_semantics<arbitrary>], iteration_bounds = array<i64: 1, 1, 1>, scalar_prefetch = 0 : i64, scratch_operands = 1 : i64, tpu.core_type = #tpu.core_type<tc>, window_params = [{transform_indices = @transform_0, window_bounds = array<i64: 16, 128>}, {transform_indices = @transform_1, window_bounds = array<i64: 128, 256>}, {transform_indices = @transform_2, window_bounds = array<i64: 1, 256>}, {transform_indices = @transform_3, window_bounds = array<i64: 16, 256>}]} {
    %c0_i32 = arith.constant 0 : i32
    %0 = arith.cmpi eq, %arg2, %c0_i32 : i32
    %1 = arith.extui %0 : i1 to i32
    %c0_i32_0 = arith.constant 0 : i32
    %2 = arith.cmpi ne, %1, %c0_i32_0 : i32
    scf.if %2 {
      %cst_10 = arith.constant 0.000000e+00 : f32
      %12 = vector.broadcast %cst_10 : f32 to vector<16x256xf32>
      %c0_11 = arith.constant 0 : index
      %c0_12 = arith.constant 0 : index
      %13 = vector.load %arg7[%c0_11, %c0_12] : memref<16x256xf32, #tpu.memory_space<vmem>>, vector<16x256xf32>
      tpu.vector_store %arg7[%c0_11, %c0_12], %12 {strides = array<i32>} : memref<16x256xf32, #tpu.memory_space<vmem>>, vector<16x256xf32>,
    } else {
    }
    %c0 = arith.constant 0 : index
    %c0_1 = arith.constant 0 : index
    %3 = vector.load %arg7[%c0, %c0_1] : memref<16x256xf32, #tpu.memory_space<vmem>>, vector<16x256xf32>
    %c0_2 = arith.constant 0 : index
    %c0_3 = arith.constant 0 : index
    %4 = vector.load %arg3[%c0_2, %c0_3] : memref<16x128xbf16, #tpu.memory_space<vmem>>, vector<16x128xbf16>
    %c0_4 = arith.constant 0 : index
    %c0_5 = arith.constant 0 : index
    %5 = vector.load %arg4[%c0_4, %c0_5] : memref<128x256xbf16, #tpu.memory_space<vmem>>, vector<128x256xbf16>
    %cst = arith.constant dense<0.000000e+00> : vector<16x256xf32>
    %6 = tpu.matmul %4, %5, %cst {dimension_numbers = #tpu.dot_dimension_numbers<[1], [0], [0], [1], [0, 0, 1, 1], [], []>} : vector<16x128xbf16>, vector<128x256xbf16>, vector<16x256xf32> -> vector<16x256xf32>
    %7 = arith.addf %3, %6 : vector<16x256xf32>
    %c0_6 = arith.constant 0 : index
    %c0_7 = arith.constant 0 : index
    %8 = vector.load %arg7[%c0_6, %c0_7] : memref<16x256xf32, #tpu.memory_space<vmem>>, vector<16x256xf32>
    tpu.vector_store %arg7[%c0_6, %c0_7], %7 {strides = array<i32>} : memref<16x256xf32, #tpu.memory_space<vmem>>, vector<16x256xf32>,
    %c0_i32_8 = arith.constant 0 : i32
    %9 = arith.cmpi eq, %arg2, %c0_i32_8 : i32
    %10 = arith.extui %9 : i1 to i32
    %c0_i32_9 = arith.constant 0 : i32
    %11 = arith.cmpi ne, %10, %c0_i32_9 : i32
    scf.if %11 {
      %c0_10 = arith.constant 0 : index
      %c0_11 = arith.constant 0 : index
      %12 = vector.load %arg7[%c0_10, %c0_11] : memref<16x256xf32, #tpu.memory_space<vmem>>, vector<16x256xf32>
      %c0_12 = arith.constant 0 : index
      %c0_13 = arith.constant 0 : index
      %13 = vector.load %arg5[%c0_12, %c0_13] : memref<1x256xf32, #tpu.memory_space<vmem>>, vector<1x256xf32>
      %14 = vector.broadcast %13 : vector<1x256xf32> to vector<16x256xf32>
      %15 = arith.addf %12, %14 : vector<16x256xf32>
      %cst_14 = arith.constant 5.000000e-01 : f32
      %16 = vector.broadcast %cst_14 : f32 to vector<16x256xf32>
      %17 = arith.mulf %16, %15 : vector<16x256xf32>
      %cst_15 = arith.constant 4.471500e-02 : f32
      %18 = vector.broadcast %cst_15 : f32 to vector<16x256xf32>
      %19 = arith.mulf %18, %15 : vector<16x256xf32>
      %20 = arith.mulf %19, %15 : vector<16x256xf32>
      %21 = arith.mulf %20, %15 : vector<16x256xf32>
      %22 = arith.addf %15, %21 : vector<16x256xf32>
      %cst_16 = arith.constant 0.797884583 : f32
      %23 = vector.broadcast %cst_16 : f32 to vector<16x256xf32>
      %24 = arith.mulf %23, %22 : vector<16x256xf32>
      %25 = math.tanh %24 : vector<16x256xf32>
      %cst_17 = arith.constant 1.000000e+00 : f32
      %26 = vector.broadcast %cst_17 : f32 to vector<16x256xf32>
      %27 = arith.addf %26, %25 : vector<16x256xf32>
      %28 = arith.mulf %17, %27 : vector<16x256xf32>
      %29 = arith.truncf %28 : vector<16x256xf32> to vector<16x256xbf16>
      %c0_18 = arith.constant 0 : index
      %c0_19 = arith.constant 0 : index
      %30 = vector.load %arg6[%c0_18, %c0_19] : memref<16x256xbf16, #tpu.memory_space<vmem>>, vector<16x256xbf16>
      tpu.vector_store %arg6[%c0_18, %c0_19], %29 {strides = array<i32>} : memref<16x256xbf16, #tpu.memory_space<vmem>>, vector<16x256xbf16>,
    } else {
    }
    return
  }
  func.func @transform_0(%arg0: i32, %arg1: i32, %arg2: i32) -> (i32, i32) {
    %c0_i32 = arith.constant 0 : i32
    return %arg0, %arg2 : i32, i32
  }
  func.func @transform_1(%arg0: i32, %arg1: i32, %arg2: i32) -> (i32, i32) {
    %c0_i32 = arith.constant 0 : i32
    return %arg2, %arg1 : i32, i32
  }
  func.func @transform_2(%arg0: i32, %arg1: i32, %arg2: i32) -> (i32, i32) {
    %c0_i32 = arith.constant 0 : i32
    %c0_i32_0 = arith.constant 0 : i32
    return %c0_i32, %arg1 : i32, i32
  }
  func.func @transform_3(%arg0: i32, %arg1: i32, %arg2: i32) -> (i32, i32) {
    %c0_i32 = arith.constant 0 : i32
    return %arg0, %arg1 : i32, i32
  }
}

module attributes {stable_mosaic.version = 11 : i64} {
  func.func @_dense_ln_kernel(%arg0: i32, %arg1: i32, %arg2: memref<16x256xbf16, #tpu.memory_space<vmem>>, %arg3: memref<256x128xbf16, #tpu.memory_space<vmem>>, %arg4: memref<1x128xf32, #tpu.memory_space<vmem>>, %arg5: memref<16x128xbf16, #tpu.memory_space<vmem>>, %arg6: memref<1x128xf32, #tpu.memory_space<vmem>>, %arg7: memref<1x128xf32, #tpu.memory_space<vmem>>, %arg8: memref<16x128xbf16, #tpu.memory_space<vmem>>, %arg9: memref<16x128xf32, #tpu.memory_space<vmem>>) attributes {dimension_semantics = [#tpu.dimension_semantics<parallel>, #tpu.dimension_semantics<arbitrary>], iteration_bounds = array<i64: 1, 1>, scalar_prefetch = 0 : i64, scratch_operands = 1 : i64, tpu.core_type = #tpu.core_type<tc>, window_params = [{transform_indices = @transform_0, window_bounds = array<i64: 16, 256>}, {transform_indices = @transform_1, window_bounds = array<i64: 256, 128>}, {pipeline_mode = #tpu.pipeline_mode<synchronous>, transform_indices = @transform_2, window_bounds = array<i64: 1, 128>}, {transform_indices = @transform_3, window_bounds = array<i64: 16, 128>}, {pipeline_mode = #tpu.pipeline_mode<synchronous>, transform_indices = @transform_4, window_bounds = array<i64: 1, 128>}, {pipeline_mode = #tpu.pipeline_mode<synchronous>, transform_indices = @transform_5, window_bounds = array<i64: 1, 128>}, {transform_indices = @transform_6, window_bounds = array<i64: 16, 128>}]} {
    %c0_i32 = arith.constant 0 : i32
    %0 = arith.cmpi eq, %arg1, %c0_i32 : i32
    %1 = arith.extui %0 : i1 to i32
    %c0_i32_0 = arith.constant 0 : i32
    %2 = arith.cmpi ne, %1, %c0_i32_0 : i32
    scf.if %2 {
      %cst_10 = arith.constant 0.000000e+00 : f32
      %12 = vector.broadcast %cst_10 : f32 to vector<16x128xf32>
      %c0_11 = arith.constant 0 : index
      %c0_12 = arith.constant 0 : index
      %13 = vector.load %arg9[%c0_11, %c0_12] : memref<16x128xf32, #tpu.memory_space<vmem>>, vector<16x128xf32>
      tpu.vector_store %arg9[%c0_11, %c0_12], %12 {strides = array<i32>} : memref<16x128xf32, #tpu.memory_space<vmem>>, vector<16x128xf32>,
    } else {
    }
    %c0 = arith.constant 0 : index
    %c0_1 = arith.constant 0 : index
    %3 = vector.load %arg9[%c0, %c0_1] : memref<16x128xf32, #tpu.memory_space<vmem>>, vector<16x128xf32>
    %c0_2 = arith.constant 0 : index
    %c0_3 = arith.constant 0 : index
    %4 = vector.load %arg2[%c0_2, %c0_3] : memref<16x256xbf16, #tpu.memory_space<vmem>>, vector<16x256xbf16>
    %c0_4 = arith.constant 0 : index
    %c0_5 = arith.constant 0 : index
    %5 = vector.load %arg3[%c0_4, %c0_5] : memref<256x128xbf16, #tpu.memory_space<vmem>>, vector<256x128xbf16>
    %cst = arith.constant dense<0.000000e+00> : vector<16x128xf32>
    %6 = tpu.matmul %4, %5, %cst {dimension_numbers = #tpu.dot_dimension_numbers<[1], [0], [0], [1], [0, 0, 1, 1], [], []>} : vector<16x256xbf16>, vector<256x128xbf16>, vector<16x128xf32> -> vector<16x128xf32>
    %7 = arith.addf %3, %6 : vector<16x128xf32>
    %c0_6 = arith.constant 0 : index
    %c0_7 = arith.constant 0 : index
    %8 = vector.load %arg9[%c0_6, %c0_7] : memref<16x128xf32, #tpu.memory_space<vmem>>, vector<16x128xf32>
    tpu.vector_store %arg9[%c0_6, %c0_7], %7 {strides = array<i32>} : memref<16x128xf32, #tpu.memory_space<vmem>>, vector<16x128xf32>,
    %c0_i32_8 = arith.constant 0 : i32
    %9 = arith.cmpi eq, %arg1, %c0_i32_8 : i32
    %10 = arith.extui %9 : i1 to i32
    %c0_i32_9 = arith.constant 0 : i32
    %11 = arith.cmpi ne, %10, %c0_i32_9 : i32
    scf.if %11 {
      %c0_10 = arith.constant 0 : index
      %c0_11 = arith.constant 0 : index
      %12 = vector.load %arg9[%c0_10, %c0_11] : memref<16x128xf32, #tpu.memory_space<vmem>>, vector<16x128xf32>
      %c0_12 = arith.constant 0 : index
      %c0_13 = arith.constant 0 : index
      %13 = vector.load %arg4[%c0_12, %c0_13] : memref<1x128xf32, #tpu.memory_space<vmem>>, vector<1x128xf32>
      %14 = vector.broadcast %13 : vector<1x128xf32> to vector<16x128xf32>
      %15 = arith.addf %12, %14 : vector<16x128xf32>
      %c0_14 = arith.constant 0 : index
      %c0_15 = arith.constant 0 : index
      %16 = vector.load %arg5[%c0_14, %c0_15] : memref<16x128xbf16, #tpu.memory_space<vmem>>, vector<16x128xbf16>
      %17 = arith.extf %16 : vector<16x128xbf16> to vector<16x128xf32>
      %18 = arith.addf %15, %17 : vector<16x128xf32>
      %cst_16 = arith.constant dense<0.000000e+00> : vector<16xf32>
      %19 = vector.multi_reduction <add>, %18, %cst_16 [1] : vector<16x128xf32> to vector<16xf32>
      %20 = vector.shape_cast %19 : vector<16xf32> to vector<16x1xf32>
      %cst_17 = arith.constant 1.280000e+02 : f32
      %21 = vector.broadcast %cst_17 : f32 to vector<16x1xf32>
      %22 = arith.divf %20, %21 : vector<16x1xf32>
      %23 = vector.broadcast %22 : vector<16x1xf32> to vector<16x128xf32>
      %24 = arith.subf %18, %23 : vector<16x128xf32>
      %25 = arith.mulf %24, %24 : vector<16x128xf32>
      %cst_18 = arith.constant dense<0.000000e+00> : vector<16xf32>
      %26 = vector.multi_reduction <add>, %25, %cst_18 [1] : vector<16x128xf32> to vector<16xf32>
      %27 = vector.shape_cast %26 : vector<16xf32> to vector<16x1xf32>
      %cst_19 = arith.constant 1.280000e+02 : f32
      %28 = vector.broadcast %cst_19 : f32 to vector<16x1xf32>
      %29 = arith.divf %27, %28 : vector<16x1xf32>
      %30 = vector.broadcast %22 : vector<16x1xf32> to vector<16x128xf32>
      %31 = arith.subf %18, %30 : vector<16x128xf32>
      %cst_20 = arith.constant 9.99999996E-13 : f32
      %32 = vector.broadcast %cst_20 : f32 to vector<16x1xf32>
      %33 = arith.addf %29, %32 : vector<16x1xf32>
      %34 = math.rsqrt %33 : vector<16x1xf32>
      %35 = vector.broadcast %34 : vector<16x1xf32> to vector<16x128xf32>
      %36 = arith.mulf %31, %35 : vector<16x128xf32>
      %c0_21 = arith.constant 0 : index
      %c0_22 = arith.constant 0 : index
      %37 = vector.load %arg6[%c0_21, %c0_22] : memref<1x128xf32, #tpu.memory_space<vmem>>, vector<1x128xf32>
      %38 = vector.broadcast %37 : vector<1x128xf32> to vector<16x128xf32>
      %39 = arith.mulf %36, %38 : vector<16x128xf32>
      %c0_23 = arith.constant 0 : index
      %c0_24 = arith.constant 0 : index
      %40 = vector.load %arg7[%c0_23, %c0_24] : memref<1x128xf32, #tpu.memory_space<vmem>>, vector<1x128xf32>
      %41 = vector.broadcast %40 : vector<1x128xf32> to vector<16x128xf32>
      %42 = arith.addf %39, %41 : vector<16x128xf32>
      %43 = arith.truncf %42 : vector<16x128xf32> to vector<16x128xbf16>
      %c0_25 = arith.constant 0 : index
      %c0_26 = arith.constant 0 : index
      %44 = vector.load %arg8[%c0_25, %c0_26] : memref<16x128xbf16, #tpu.memory_space<vmem>>, vector<16x128xbf16>
      tpu.vector_store %arg8[%c0_25, %c0_26], %43 {strides = array<i32>} : memref<16x128xbf16, #tpu.memory_space<vmem>>, vector<16x128xbf16>,
    } else {
    }
    return
  }
  func.func @transform_0(%arg0: i32, %arg1: i32) -> (i32, i32) {
    %c0_i32 = arith.constant 0 : i32
    return %arg0, %arg1 : i32, i32
  }
  func.func @transform_1(%arg0: i32, %arg1: i32) -> (i32, i32) {
    %c0_i32 = arith.constant 0 : i32
    %c0_i32_0 = arith.constant 0 : i32
    return %arg1, %c0_i32 : i32, i32
  }
  func.func @transform_2(%arg0: i32, %arg1: i32) -> (i32, i32) {
    %c0_i32 = arith.constant 0 : i32
    %c0_i32_0 = arith.constant 0 : i32
    %c0_i32_1 = arith.constant 0 : i32
    return %c0_i32, %c0_i32_0 : i32, i32
  }
  func.func @transform_3(%arg0: i32, %arg1: i32) -> (i32, i32) {
    %c0_i32 = arith.constant 0 : i32
    %c0_i32_0 = arith.constant 0 : i32
    return %arg0, %c0_i32 : i32, i32
  }
  func.func @transform_4(%arg0: i32, %arg1: i32) -> (i32, i32) {
    %c0_i32 = arith.constant 0 : i32
    %c0_i32_0 = arith.constant 0 : i32
    %c0_i32_1 = arith.constant 0 : i32
    return %c0_i32, %c0_i32_0 : i32, i32
  }
  func.func @transform_5(%arg0: i32, %arg1: i32) -> (i32, i32) {
    %c0_i32 = arith.constant 0 : i32
    %c0_i32_0 = arith.constant 0 : i32
    %c0_i32_1 = arith.constant 0 : i32
    return %c0_i32, %c0_i32_0 : i32, i32
  }
  func.func @transform_6(%arg0: i32, %arg1: i32) -> (i32, i32) {
    %c0_i32 = arith.constant 0 : i32
    %c0_i32_0 = arith.constant 0 : i32
    return %arg0, %c0_i32 : i32, i32
  }
}

module attributes {stable_mosaic.version = 11 : i64} {
  func.func @_dense_kernel(%arg0: i32, %arg1: i32, %arg2: i32, %arg3: memref<16x128xbf16, #tpu.memory_space<vmem>>, %arg4: memref<128x384xbf16, #tpu.memory_space<vmem>>, %arg5: memref<1x384xf32, #tpu.memory_space<vmem>>, %arg6: memref<16x384xbf16, #tpu.memory_space<vmem>>, %arg7: memref<16x384xf32, #tpu.memory_space<vmem>>) attributes {dimension_semantics = [#tpu.dimension_semantics<parallel>, #tpu.dimension_semantics<parallel>, #tpu.dimension_semantics<arbitrary>], iteration_bounds = array<i64: 1, 1, 1>, scalar_prefetch = 0 : i64, scratch_operands = 1 : i64, tpu.core_type = #tpu.core_type<tc>, window_params = [{transform_indices = @transform_0, window_bounds = array<i64: 16, 128>}, {transform_indices = @transform_1, window_bounds = array<i64: 128, 384>}, {transform_indices = @transform_2, window_bounds = array<i64: 1, 384>}, {transform_indices = @transform_3, window_bounds = array<i64: 16, 384>}]} {
    %c0_i32 = arith.constant 0 : i32
    %0 = arith.cmpi eq, %arg2, %c0_i32 : i32
    %1 = arith.extui %0 : i1 to i32
    %c0_i32_0 = arith.constant 0 : i32
    %2 = arith.cmpi ne, %1, %c0_i32_0 : i32
    scf.if %2 {
      %cst_10 = arith.constant 0.000000e+00 : f32
      %12 = vector.broadcast %cst_10 : f32 to vector<16x384xf32>
      %c0_11 = arith.constant 0 : index
      %c0_12 = arith.constant 0 : index
      %13 = vector.load %arg7[%c0_11, %c0_12] : memref<16x384xf32, #tpu.memory_space<vmem>>, vector<16x384xf32>
      tpu.vector_store %arg7[%c0_11, %c0_12], %12 {strides = array<i32>} : memref<16x384xf32, #tpu.memory_space<vmem>>, vector<16x384xf32>,
    } else {
    }
    %c0 = arith.constant 0 : index
    %c0_1 = arith.constant 0 : index
    %3 = vector.load %arg7[%c0, %c0_1] : memref<16x384xf32, #tpu.memory_space<vmem>>, vector<16x384xf32>
    %c0_2 = arith.constant 0 : index
    %c0_3 = arith.constant 0 : index
    %4 = vector.load %arg3[%c0_2, %c0_3] : memref<16x128xbf16, #tpu.memory_space<vmem>>, vector<16x128xbf16>
    %c0_4 = arith.constant 0 : index
    %c0_5 = arith.constant 0 : index
    %5 = vector.load %arg4[%c0_4, %c0_5] : memref<128x384xbf16, #tpu.memory_space<vmem>>, vector<128x384xbf16>
    %cst = arith.constant dense<0.000000e+00> : vector<16x384xf32>
    %6 = tpu.matmul %4, %5, %cst {dimension_numbers = #tpu.dot_dimension_numbers<[1], [0], [0], [1], [0, 0, 1, 1], [], []>} : vector<16x128xbf16>, vector<128x384xbf16>, vector<16x384xf32> -> vector<16x384xf32>
    %7 = arith.addf %3, %6 : vector<16x384xf32>
    %c0_6 = arith.constant 0 : index
    %c0_7 = arith.constant 0 : index
    %8 = vector.load %arg7[%c0_6, %c0_7] : memref<16x384xf32, #tpu.memory_space<vmem>>, vector<16x384xf32>
    tpu.vector_store %arg7[%c0_6, %c0_7], %7 {strides = array<i32>} : memref<16x384xf32, #tpu.memory_space<vmem>>, vector<16x384xf32>,
    %c0_i32_8 = arith.constant 0 : i32
    %9 = arith.cmpi eq, %arg2, %c0_i32_8 : i32
    %10 = arith.extui %9 : i1 to i32
    %c0_i32_9 = arith.constant 0 : i32
    %11 = arith.cmpi ne, %10, %c0_i32_9 : i32
    scf.if %11 {
      %c0_10 = arith.constant 0 : index
      %c0_11 = arith.constant 0 : index
      %12 = vector.load %arg7[%c0_10, %c0_11] : memref<16x384xf32, #tpu.memory_space<vmem>>, vector<16x384xf32>
      %c0_12 = arith.constant 0 : index
      %c0_13 = arith.constant 0 : index
      %13 = vector.load %arg5[%c0_12, %c0_13] : memref<1x384xf32, #tpu.memory_space<vmem>>, vector<1x384xf32>
      %14 = vector.broadcast %13 : vector<1x384xf32> to vector<16x384xf32>
      %15 = arith.addf %12, %14 : vector<16x384xf32>
      %16 = arith.truncf %15 : vector<16x384xf32> to vector<16x384xbf16>
      %c0_14 = arith.constant 0 : index
      %c0_15 = arith.constant 0 : index
      %17 = vector.load %arg6[%c0_14, %c0_15] : memref<16x384xbf16, #tpu.memory_space<vmem>>, vector<16x384xbf16>
      tpu.vector_store %arg6[%c0_14, %c0_15], %16 {strides = array<i32>} : memref<16x384xbf16, #tpu.memory_space<vmem>>, vector<16x384xbf16>,
    } else {
    }
    return
  }
  func.func @transform_0(%arg0: i32, %arg1: i32, %arg2: i32) -> (i32, i32) {
    %c0_i32 = arith.constant 0 : i32
    return %arg0, %arg2 : i32, i32
  }
  func.func @transform_1(%arg0: i32, %arg1: i32, %arg2: i32) -> (i32, i32) {
    %c0_i32 = arith.constant 0 : i32
    return %arg2, %arg1 : i32, i32
  }
  func.func @transform_2(%arg0: i32, %arg1: i32, %arg2: i32) -> (i32, i32) {
    %c0_i32 = arith.constant 0 : i32
    %c0_i32_0 = arith.constant 0 : i32
    return %c0_i32, %arg1 : i32, i32
  }
  func.func @transform_3(%arg0: i32, %arg1: i32, %arg2: i32) -> (i32, i32) {
    %c0_i32 = arith.constant 0 : i32
    return %arg0, %arg1 : i32, i32
  }
}

module attributes {stable_mosaic.version = 11 : i64} {
  func.func @_dense_ln_kernel(%arg0: i32, %arg1: i32, %arg2: memref<16x128xbf16, #tpu.memory_space<vmem>>, %arg3: memref<128x128xbf16, #tpu.memory_space<vmem>>, %arg4: memref<1x128xf32, #tpu.memory_space<vmem>>, %arg5: memref<16x128xbf16, #tpu.memory_space<vmem>>, %arg6: memref<1x128xf32, #tpu.memory_space<vmem>>, %arg7: memref<1x128xf32, #tpu.memory_space<vmem>>, %arg8: memref<16x128xbf16, #tpu.memory_space<vmem>>, %arg9: memref<16x128xf32, #tpu.memory_space<vmem>>) attributes {dimension_semantics = [#tpu.dimension_semantics<parallel>, #tpu.dimension_semantics<arbitrary>], iteration_bounds = array<i64: 1, 1>, scalar_prefetch = 0 : i64, scratch_operands = 1 : i64, tpu.core_type = #tpu.core_type<tc>, window_params = [{transform_indices = @transform_0, window_bounds = array<i64: 16, 128>}, {transform_indices = @transform_1, window_bounds = array<i64: 128, 128>}, {pipeline_mode = #tpu.pipeline_mode<synchronous>, transform_indices = @transform_2, window_bounds = array<i64: 1, 128>}, {transform_indices = @transform_3, window_bounds = array<i64: 16, 128>}, {pipeline_mode = #tpu.pipeline_mode<synchronous>, transform_indices = @transform_4, window_bounds = array<i64: 1, 128>}, {pipeline_mode = #tpu.pipeline_mode<synchronous>, transform_indices = @transform_5, window_bounds = array<i64: 1, 128>}, {transform_indices = @transform_6, window_bounds = array<i64: 16, 128>}]} {
    %c0_i32 = arith.constant 0 : i32
    %0 = arith.cmpi eq, %arg1, %c0_i32 : i32
    %1 = arith.extui %0 : i1 to i32
    %c0_i32_0 = arith.constant 0 : i32
    %2 = arith.cmpi ne, %1, %c0_i32_0 : i32
    scf.if %2 {
      %cst_10 = arith.constant 0.000000e+00 : f32
      %12 = vector.broadcast %cst_10 : f32 to vector<16x128xf32>
      %c0_11 = arith.constant 0 : index
      %c0_12 = arith.constant 0 : index
      %13 = vector.load %arg9[%c0_11, %c0_12] : memref<16x128xf32, #tpu.memory_space<vmem>>, vector<16x128xf32>
      tpu.vector_store %arg9[%c0_11, %c0_12], %12 {strides = array<i32>} : memref<16x128xf32, #tpu.memory_space<vmem>>, vector<16x128xf32>,
    } else {
    }
    %c0 = arith.constant 0 : index
    %c0_1 = arith.constant 0 : index
    %3 = vector.load %arg9[%c0, %c0_1] : memref<16x128xf32, #tpu.memory_space<vmem>>, vector<16x128xf32>
    %c0_2 = arith.constant 0 : index
    %c0_3 = arith.constant 0 : index
    %4 = vector.load %arg2[%c0_2, %c0_3] : memref<16x128xbf16, #tpu.memory_space<vmem>>, vector<16x128xbf16>
    %c0_4 = arith.constant 0 : index
    %c0_5 = arith.constant 0 : index
    %5 = vector.load %arg3[%c0_4, %c0_5] : memref<128x128xbf16, #tpu.memory_space<vmem>>, vector<128x128xbf16>
    %cst = arith.constant dense<0.000000e+00> : vector<16x128xf32>
    %6 = tpu.matmul %4, %5, %cst {dimension_numbers = #tpu.dot_dimension_numbers<[1], [0], [0], [1], [0, 0, 1, 1], [], []>} : vector<16x128xbf16>, vector<128x128xbf16>, vector<16x128xf32> -> vector<16x128xf32>
    %7 = arith.addf %3, %6 : vector<16x128xf32>
    %c0_6 = arith.constant 0 : index
    %c0_7 = arith.constant 0 : index
    %8 = vector.load %arg9[%c0_6, %c0_7] : memref<16x128xf32, #tpu.memory_space<vmem>>, vector<16x128xf32>
    tpu.vector_store %arg9[%c0_6, %c0_7], %7 {strides = array<i32>} : memref<16x128xf32, #tpu.memory_space<vmem>>, vector<16x128xf32>,
    %c0_i32_8 = arith.constant 0 : i32
    %9 = arith.cmpi eq, %arg1, %c0_i32_8 : i32
    %10 = arith.extui %9 : i1 to i32
    %c0_i32_9 = arith.constant 0 : i32
    %11 = arith.cmpi ne, %10, %c0_i32_9 : i32
    scf.if %11 {
      %c0_10 = arith.constant 0 : index
      %c0_11 = arith.constant 0 : index
      %12 = vector.load %arg9[%c0_10, %c0_11] : memref<16x128xf32, #tpu.memory_space<vmem>>, vector<16x128xf32>
      %c0_12 = arith.constant 0 : index
      %c0_13 = arith.constant 0 : index
      %13 = vector.load %arg4[%c0_12, %c0_13] : memref<1x128xf32, #tpu.memory_space<vmem>>, vector<1x128xf32>
      %14 = vector.broadcast %13 : vector<1x128xf32> to vector<16x128xf32>
      %15 = arith.addf %12, %14 : vector<16x128xf32>
      %c0_14 = arith.constant 0 : index
      %c0_15 = arith.constant 0 : index
      %16 = vector.load %arg5[%c0_14, %c0_15] : memref<16x128xbf16, #tpu.memory_space<vmem>>, vector<16x128xbf16>
      %17 = arith.extf %16 : vector<16x128xbf16> to vector<16x128xf32>
      %18 = arith.addf %15, %17 : vector<16x128xf32>
      %cst_16 = arith.constant dense<0.000000e+00> : vector<16xf32>
      %19 = vector.multi_reduction <add>, %18, %cst_16 [1] : vector<16x128xf32> to vector<16xf32>
      %20 = vector.shape_cast %19 : vector<16xf32> to vector<16x1xf32>
      %cst_17 = arith.constant 1.280000e+02 : f32
      %21 = vector.broadcast %cst_17 : f32 to vector<16x1xf32>
      %22 = arith.divf %20, %21 : vector<16x1xf32>
      %23 = vector.broadcast %22 : vector<16x1xf32> to vector<16x128xf32>
      %24 = arith.subf %18, %23 : vector<16x128xf32>
      %25 = arith.mulf %24, %24 : vector<16x128xf32>
      %cst_18 = arith.constant dense<0.000000e+00> : vector<16xf32>
      %26 = vector.multi_reduction <add>, %25, %cst_18 [1] : vector<16x128xf32> to vector<16xf32>
      %27 = vector.shape_cast %26 : vector<16xf32> to vector<16x1xf32>
      %cst_19 = arith.constant 1.280000e+02 : f32
      %28 = vector.broadcast %cst_19 : f32 to vector<16x1xf32>
      %29 = arith.divf %27, %28 : vector<16x1xf32>
      %30 = vector.broadcast %22 : vector<16x1xf32> to vector<16x128xf32>
      %31 = arith.subf %18, %30 : vector<16x128xf32>
      %cst_20 = arith.constant 9.99999996E-13 : f32
      %32 = vector.broadcast %cst_20 : f32 to vector<16x1xf32>
      %33 = arith.addf %29, %32 : vector<16x1xf32>
      %34 = math.rsqrt %33 : vector<16x1xf32>
      %35 = vector.broadcast %34 : vector<16x1xf32> to vector<16x128xf32>
      %36 = arith.mulf %31, %35 : vector<16x128xf32>
      %c0_21 = arith.constant 0 : index
      %c0_22 = arith.constant 0 : index
      %37 = vector.load %arg6[%c0_21, %c0_22] : memref<1x128xf32, #tpu.memory_space<vmem>>, vector<1x128xf32>
      %38 = vector.broadcast %37 : vector<1x128xf32> to vector<16x128xf32>
      %39 = arith.mulf %36, %38 : vector<16x128xf32>
      %c0_23 = arith.constant 0 : index
      %c0_24 = arith.constant 0 : index
      %40 = vector.load %arg7[%c0_23, %c0_24] : memref<1x128xf32, #tpu.memory_space<vmem>>, vector<1x128xf32>
      %41 = vector.broadcast %40 : vector<1x128xf32> to vector<16x128xf32>
      %42 = arith.addf %39, %41 : vector<16x128xf32>
      %43 = arith.truncf %42 : vector<16x128xf32> to vector<16x128xbf16>
      %c0_25 = arith.constant 0 : index
      %c0_26 = arith.constant 0 : index
      %44 = vector.load %arg8[%c0_25, %c0_26] : memref<16x128xbf16, #tpu.memory_space<vmem>>, vector<16x128xbf16>
      tpu.vector_store %arg8[%c0_25, %c0_26], %43 {strides = array<i32>} : memref<16x128xbf16, #tpu.memory_space<vmem>>, vector<16x128xbf16>,
    } else {
    }
    return
  }
  func.func @transform_0(%arg0: i32, %arg1: i32) -> (i32, i32) {
    %c0_i32 = arith.constant 0 : i32
    return %arg0, %arg1 : i32, i32
  }
  func.func @transform_1(%arg0: i32, %arg1: i32) -> (i32, i32) {
    %c0_i32 = arith.constant 0 : i32
    %c0_i32_0 = arith.constant 0 : i32
    return %arg1, %c0_i32 : i32, i32
  }
  func.func @transform_2(%arg0: i32, %arg1: i32) -> (i32, i32) {
    %c0_i32 = arith.constant 0 : i32
    %c0_i32_0 = arith.constant 0 : i32
    %c0_i32_1 = arith.constant 0 : i32
    return %c0_i32, %c0_i32_0 : i32, i32
  }
  func.func @transform_3(%arg0: i32, %arg1: i32) -> (i32, i32) {
    %c0_i32 = arith.constant 0 : i32
    %c0_i32_0 = arith.constant 0 : i32
    return %arg0, %c0_i32 : i32, i32
  }
  func.func @transform_4(%arg0: i32, %arg1: i32) -> (i32, i32) {
    %c0_i32 = arith.constant 0 : i32
    %c0_i32_0 = arith.constant 0 : i32
    %c0_i32_1 = arith.constant 0 : i32
    return %c0_i32, %c0_i32_0 : i32, i32
  }
  func.func @transform_5(%arg0: i32, %arg1: i32) -> (i32, i32) {
    %c0_i32 = arith.constant 0 : i32
    %c0_i32_0 = arith.constant 0 : i32
    %c0_i32_1 = arith.constant 0 : i32
    return %c0_i32, %c0_i32_0 : i32, i32
  }
  func.func @transform_6(%arg0: i32, %arg1: i32) -> (i32, i32) {
    %c0_i32 = arith.constant 0 : i32
    %c0_i32_0 = arith.constant 0 : i32
    return %arg0, %c0_i32 : i32, i32
  }
}

module attributes {stable_mosaic.version = 11 : i64} {
  func.func @_dense_kernel(%arg0: i32, %arg1: i32, %arg2: i32, %arg3: memref<16x128xbf16, #tpu.memory_space<vmem>>, %arg4: memref<128x256xbf16, #tpu.memory_space<vmem>>, %arg5: memref<1x256xf32, #tpu.memory_space<vmem>>, %arg6: memref<16x256xbf16, #tpu.memory_space<vmem>>, %arg7: memref<16x256xf32, #tpu.memory_space<vmem>>) attributes {dimension_semantics = [#tpu.dimension_semantics<parallel>, #tpu.dimension_semantics<parallel>, #tpu.dimension_semantics<arbitrary>], iteration_bounds = array<i64: 1, 1, 1>, scalar_prefetch = 0 : i64, scratch_operands = 1 : i64, tpu.core_type = #tpu.core_type<tc>, window_params = [{transform_indices = @transform_0, window_bounds = array<i64: 16, 128>}, {transform_indices = @transform_1, window_bounds = array<i64: 128, 256>}, {transform_indices = @transform_2, window_bounds = array<i64: 1, 256>}, {transform_indices = @transform_3, window_bounds = array<i64: 16, 256>}]} {
    %c0_i32 = arith.constant 0 : i32
    %0 = arith.cmpi eq, %arg2, %c0_i32 : i32
    %1 = arith.extui %0 : i1 to i32
    %c0_i32_0 = arith.constant 0 : i32
    %2 = arith.cmpi ne, %1, %c0_i32_0 : i32
    scf.if %2 {
      %cst_10 = arith.constant 0.000000e+00 : f32
      %12 = vector.broadcast %cst_10 : f32 to vector<16x256xf32>
      %c0_11 = arith.constant 0 : index
      %c0_12 = arith.constant 0 : index
      %13 = vector.load %arg7[%c0_11, %c0_12] : memref<16x256xf32, #tpu.memory_space<vmem>>, vector<16x256xf32>
      tpu.vector_store %arg7[%c0_11, %c0_12], %12 {strides = array<i32>} : memref<16x256xf32, #tpu.memory_space<vmem>>, vector<16x256xf32>,
    } else {
    }
    %c0 = arith.constant 0 : index
    %c0_1 = arith.constant 0 : index
    %3 = vector.load %arg7[%c0, %c0_1] : memref<16x256xf32, #tpu.memory_space<vmem>>, vector<16x256xf32>
    %c0_2 = arith.constant 0 : index
    %c0_3 = arith.constant 0 : index
    %4 = vector.load %arg3[%c0_2, %c0_3] : memref<16x128xbf16, #tpu.memory_space<vmem>>, vector<16x128xbf16>
    %c0_4 = arith.constant 0 : index
    %c0_5 = arith.constant 0 : index
    %5 = vector.load %arg4[%c0_4, %c0_5] : memref<128x256xbf16, #tpu.memory_space<vmem>>, vector<128x256xbf16>
    %cst = arith.constant dense<0.000000e+00> : vector<16x256xf32>
    %6 = tpu.matmul %4, %5, %cst {dimension_numbers = #tpu.dot_dimension_numbers<[1], [0], [0], [1], [0, 0, 1, 1], [], []>} : vector<16x128xbf16>, vector<128x256xbf16>, vector<16x256xf32> -> vector<16x256xf32>
    %7 = arith.addf %3, %6 : vector<16x256xf32>
    %c0_6 = arith.constant 0 : index
    %c0_7 = arith.constant 0 : index
    %8 = vector.load %arg7[%c0_6, %c0_7] : memref<16x256xf32, #tpu.memory_space<vmem>>, vector<16x256xf32>
    tpu.vector_store %arg7[%c0_6, %c0_7], %7 {strides = array<i32>} : memref<16x256xf32, #tpu.memory_space<vmem>>, vector<16x256xf32>,
    %c0_i32_8 = arith.constant 0 : i32
    %9 = arith.cmpi eq, %arg2, %c0_i32_8 : i32
    %10 = arith.extui %9 : i1 to i32
    %c0_i32_9 = arith.constant 0 : i32
    %11 = arith.cmpi ne, %10, %c0_i32_9 : i32
    scf.if %11 {
      %c0_10 = arith.constant 0 : index
      %c0_11 = arith.constant 0 : index
      %12 = vector.load %arg7[%c0_10, %c0_11] : memref<16x256xf32, #tpu.memory_space<vmem>>, vector<16x256xf32>
      %c0_12 = arith.constant 0 : index
      %c0_13 = arith.constant 0 : index
      %13 = vector.load %arg5[%c0_12, %c0_13] : memref<1x256xf32, #tpu.memory_space<vmem>>, vector<1x256xf32>
      %14 = vector.broadcast %13 : vector<1x256xf32> to vector<16x256xf32>
      %15 = arith.addf %12, %14 : vector<16x256xf32>
      %cst_14 = arith.constant 5.000000e-01 : f32
      %16 = vector.broadcast %cst_14 : f32 to vector<16x256xf32>
      %17 = arith.mulf %16, %15 : vector<16x256xf32>
      %cst_15 = arith.constant 4.471500e-02 : f32
      %18 = vector.broadcast %cst_15 : f32 to vector<16x256xf32>
      %19 = arith.mulf %18, %15 : vector<16x256xf32>
      %20 = arith.mulf %19, %15 : vector<16x256xf32>
      %21 = arith.mulf %20, %15 : vector<16x256xf32>
      %22 = arith.addf %15, %21 : vector<16x256xf32>
      %cst_16 = arith.constant 0.797884583 : f32
      %23 = vector.broadcast %cst_16 : f32 to vector<16x256xf32>
      %24 = arith.mulf %23, %22 : vector<16x256xf32>
      %25 = math.tanh %24 : vector<16x256xf32>
      %cst_17 = arith.constant 1.000000e+00 : f32
      %26 = vector.broadcast %cst_17 : f32 to vector<16x256xf32>
      %27 = arith.addf %26, %25 : vector<16x256xf32>
      %28 = arith.mulf %17, %27 : vector<16x256xf32>
      %29 = arith.truncf %28 : vector<16x256xf32> to vector<16x256xbf16>
      %c0_18 = arith.constant 0 : index
      %c0_19 = arith.constant 0 : index
      %30 = vector.load %arg6[%c0_18, %c0_19] : memref<16x256xbf16, #tpu.memory_space<vmem>>, vector<16x256xbf16>
      tpu.vector_store %arg6[%c0_18, %c0_19], %29 {strides = array<i32>} : memref<16x256xbf16, #tpu.memory_space<vmem>>, vector<16x256xbf16>,
    } else {
    }
    return
  }
  func.func @transform_0(%arg0: i32, %arg1: i32, %arg2: i32) -> (i32, i32) {
    %c0_i32 = arith.constant 0 : i32
    return %arg0, %arg2 : i32, i32
  }
  func.func @transform_1(%arg0: i32, %arg1: i32, %arg2: i32) -> (i32, i32) {
    %c0_i32 = arith.constant 0 : i32
    return %arg2, %arg1 : i32, i32
  }
  func.func @transform_2(%arg0: i32, %arg1: i32, %arg2: i32) -> (i32, i32) {
    %c0_i32 = arith.constant 0 : i32
    %c0_i32_0 = arith.constant 0 : i32
    return %c0_i32, %arg1 : i32, i32
  }
  func.func @transform_3(%arg0: i32, %arg1: i32, %arg2: i32) -> (i32, i32) {
    %c0_i32 = arith.constant 0 : i32
    return %arg0, %arg1 : i32, i32
  }
}

module attributes {stable_mosaic.version = 11 : i64} {
  func.func @_dense_kernel(%arg0: i32, %arg1: i32, %arg2: i32, %arg3: memref<2x128xbf16, #tpu.memory_space<vmem>>, %arg4: memref<128x128xbf16, #tpu.memory_space<vmem>>, %arg5: memref<1x128xf32, #tpu.memory_space<vmem>>, %arg6: memref<2x128xbf16, #tpu.memory_space<vmem>>, %arg7: memref<2x128xf32, #tpu.memory_space<vmem>>) attributes {dimension_semantics = [#tpu.dimension_semantics<parallel>, #tpu.dimension_semantics<parallel>, #tpu.dimension_semantics<arbitrary>], iteration_bounds = array<i64: 1, 1, 1>, scalar_prefetch = 0 : i64, scratch_operands = 1 : i64, tpu.core_type = #tpu.core_type<tc>, window_params = [{transform_indices = @transform_0, window_bounds = array<i64: 2, 128>}, {transform_indices = @transform_1, window_bounds = array<i64: 128, 128>}, {transform_indices = @transform_2, window_bounds = array<i64: 1, 128>}, {transform_indices = @transform_3, window_bounds = array<i64: 2, 128>}]} {
    %c0_i32 = arith.constant 0 : i32
    %0 = arith.cmpi eq, %arg2, %c0_i32 : i32
    %1 = arith.extui %0 : i1 to i32
    %c0_i32_0 = arith.constant 0 : i32
    %2 = arith.cmpi ne, %1, %c0_i32_0 : i32
    scf.if %2 {
      %cst_10 = arith.constant 0.000000e+00 : f32
      %12 = vector.broadcast %cst_10 : f32 to vector<2x128xf32>
      %c0_11 = arith.constant 0 : index
      %c0_12 = arith.constant 0 : index
      %13 = vector.load %arg7[%c0_11, %c0_12] : memref<2x128xf32, #tpu.memory_space<vmem>>, vector<2x128xf32>
      tpu.vector_store %arg7[%c0_11, %c0_12], %12 {strides = array<i32>} : memref<2x128xf32, #tpu.memory_space<vmem>>, vector<2x128xf32>,
    } else {
    }
    %c0 = arith.constant 0 : index
    %c0_1 = arith.constant 0 : index
    %3 = vector.load %arg7[%c0, %c0_1] : memref<2x128xf32, #tpu.memory_space<vmem>>, vector<2x128xf32>
    %c0_2 = arith.constant 0 : index
    %c0_3 = arith.constant 0 : index
    %4 = vector.load %arg3[%c0_2, %c0_3] : memref<2x128xbf16, #tpu.memory_space<vmem>>, vector<2x128xbf16>
    %c0_4 = arith.constant 0 : index
    %c0_5 = arith.constant 0 : index
    %5 = vector.load %arg4[%c0_4, %c0_5] : memref<128x128xbf16, #tpu.memory_space<vmem>>, vector<128x128xbf16>
    %cst = arith.constant dense<0.000000e+00> : vector<2x128xf32>
    %6 = tpu.matmul %4, %5, %cst {dimension_numbers = #tpu.dot_dimension_numbers<[1], [0], [0], [1], [0, 0, 1, 1], [], []>} : vector<2x128xbf16>, vector<128x128xbf16>, vector<2x128xf32> -> vector<2x128xf32>
    %7 = arith.addf %3, %6 : vector<2x128xf32>
    %c0_6 = arith.constant 0 : index
    %c0_7 = arith.constant 0 : index
    %8 = vector.load %arg7[%c0_6, %c0_7] : memref<2x128xf32, #tpu.memory_space<vmem>>, vector<2x128xf32>
    tpu.vector_store %arg7[%c0_6, %c0_7], %7 {strides = array<i32>} : memref<2x128xf32, #tpu.memory_space<vmem>>, vector<2x128xf32>,
    %c0_i32_8 = arith.constant 0 : i32
    %9 = arith.cmpi eq, %arg2, %c0_i32_8 : i32
    %10 = arith.extui %9 : i1 to i32
    %c0_i32_9 = arith.constant 0 : i32
    %11 = arith.cmpi ne, %10, %c0_i32_9 : i32
    scf.if %11 {
      %c0_10 = arith.constant 0 : index
      %c0_11 = arith.constant 0 : index
      %12 = vector.load %arg7[%c0_10, %c0_11] : memref<2x128xf32, #tpu.memory_space<vmem>>, vector<2x128xf32>
      %c0_12 = arith.constant 0 : index
      %c0_13 = arith.constant 0 : index
      %13 = vector.load %arg5[%c0_12, %c0_13] : memref<1x128xf32, #tpu.memory_space<vmem>>, vector<1x128xf32>
      %14 = vector.broadcast %13 : vector<1x128xf32> to vector<2x128xf32>
      %15 = arith.addf %12, %14 : vector<2x128xf32>
      %16 = math.tanh %15 : vector<2x128xf32>
      %17 = arith.truncf %16 : vector<2x128xf32> to vector<2x128xbf16>
      %c0_14 = arith.constant 0 : index
      %c0_15 = arith.constant 0 : index
      %18 = vector.load %arg6[%c0_14, %c0_15] : memref<2x128xbf16, #tpu.memory_space<vmem>>, vector<2x128xbf16>
      tpu.vector_store %arg6[%c0_14, %c0_15], %17 {strides = array<i32>} : memref<2x128xbf16, #tpu.memory_space<vmem>>, vector<2x128xbf16>,
    } else {
    }
    return
  }
  func.func @transform_0(%arg0: i32, %arg1: i32, %arg2: i32) -> (i32, i32) {
    %c0_i32 = arith.constant 0 : i32
    return %arg0, %arg2 : i32, i32
  }
  func.func @transform_1(%arg0: i32, %arg1: i32, %arg2: i32) -> (i32, i32) {
    %c0_i32 = arith.constant 0 : i32
    return %arg2, %arg1 : i32, i32
  }
  func.func @transform_2(%arg0: i32, %arg1: i32, %arg2: i32) -> (i32, i32) {
    %c0_i32 = arith.constant 0 : i32
    %c0_i32_0 = arith.constant 0 : i32
    return %c0_i32, %arg1 : i32, i32
  }
  func.func @transform_3(%arg0: i32, %arg1: i32, %arg2: i32) -> (i32, i32) {
    %c0_i32 = arith.constant 0 : i32
    return %arg0, %arg1 : i32, i32
  }
}

</mosaic_0001>

<bundles_post_ra>
// kernel: san_bert_forward.12
= control target key start
LH: loop header
LB: loop body
LE: loop exit
PB: predicated region body
PF: predicated region fallthrough
CT: control target
= control target key end

     0   :  { %v97_v2 = vmov 128.0   ;;  %s133_s0 = inlined_call_operand.vmem [shape: f32[16,128], index: 0, kind: input, shape index: {}]   ;;  %s134_s1 = inlined_call_operand.vmem [shape: f32[1,128], index: 1, kind: input, shape index: {}]   ;;  %s135_s2 = inlined_call_operand.vmem [shape: f32[1,128], index: 2, kind: input, shape index: {}]   ;;  %s136_s3 = inlined_call_operand.vmem [shape: bf16[16,128], index: 3, kind: output, shape index: {}]  }
   0x1   :  { %v14_v0 = vld [vmem:[%s133_s0] sm:$0xff]  ;;  %v15_v1 = vld [vmem:[%s133_s0 + $0x8] sm:$0xff]  ;;  %91 = vrcp.f32 %v97_v2 }
   0x2   :  { %16 = vadd.xlane.f32.xlu0 %v14_v0  ;;  %v89_v35 = vld [vmem:[%s134_s1] ss:$0 sm:$0xff] }
   0x3   :  { %v90_v39 = vld [vmem:[%s135_s2] ss:$0 sm:$0xff] }
   0x7   :  { %v92_v3 = vpop.eup %91 }
   0x8   :  { %v21_v4 = vmul.f32 128.0, %v92_v3  ;;  %vm25_vm0 = vweird.f32 %v92_v3 }
   0xa   :  { %18 = vadd.xlane.f32.xlu0 %v15_v1  ;;  %v22_v5 = vsub.f32 1.0, %v21_v4 }
   0xc   :  { %v23_v6 = vmul.f32 %v92_v3, %v22_v5 }
   0xe   :  { %v24_v7 = vadd.f32 %v92_v3, %v23_v6 }
  0x10   :  { %v26_v8 = vsel %vm25_vm0, %v92_v3, %v24_v7 }
  0x75   :  { %v17_v9 = vpop.xlane.xlu0 %16 }
  0x76   :  { %v27_v10 = vmul.f32 %v26_v8, %v17_v9 }
  0x78   :  { %v29_v11 = vsub.f32 %v14_v0, %v27_v10 }
  0x7a   :  { %v31_v12 = vmul.f32 %v29_v11, %v29_v11 }
  0x7c   :  { %33 = vadd.xlane.f32.xlu1 %v31_v12 }
  0x7d   :  { %v19_v13 = vpop.xlane.xlu0 %18 }
  0x7e   :  { %v28_v14 = vmul.f32 %v26_v8, %v19_v13 }
  0x80   :  { %v30_v15 = vsub.f32 %v15_v1, %v28_v14 }
  0x82   :  { %v32_v16 = vmul.f32 %v30_v15, %v30_v15 }
  0x84   :  { %35 = vadd.xlane.f32.xlu1 %v32_v16 }
  0xef   :  { %v34_v17 = vpop.xlane.xlu1 %33 }
  0xf0   :  { %v37_v18 = vmul.f32 %v34_v17, %v26_v8 }
  0xf2   :  { %v39_v19 = vadd.f32 1e-12, %v37_v18 }
  0xf4   :  { %93 = vrsqrt.f32 %v39_v19  ;;  %vm47_vm2 = vweird.f32 %v39_v19 }
  0xf7   :  { %v36_v20 = vpop.xlane.xlu1 %35 }
  0xf8   :  { %v38_v21 = vmul.f32 %v36_v20, %v26_v8 }
  0xfa   :  { %v94_v22 = vpop.eup %93  ;;  %v40_v23 = vadd.f32 1e-12, %v38_v21 }
  0xfb   :  { %v42_v24 = vmul.f32 %v94_v22, %v39_v19  ;;  %vm48_vm1 = vweird.f32 %v94_v22 }
  0xfc   :  { %95 = vrsqrt.f32 %v40_v23  ;;  %vm49_vm3 = vmor %vm47_vm2, %vm48_vm1  ;;  %vm57_vm5 = vweird.f32 %v40_v23 }
  0xfd   :  { %v43_v25 = vmul.f32 %v94_v22, %v42_v24 }
  0xff   :  { %v44_v26 = vmul.f32 0.5, %v43_v25 }
 0x101   :  { %v45_v27 = vsub.f32 1.5, %v44_v26 }
 0x102   :  { %v96_v28 = vpop.eup %95 }
 0x103   :  { %v46_v29 = vmul.f32 %v94_v22, %v45_v27  ;;  %v52_v30 = vmul.f32 %v96_v28, %v40_v23  ;;  %vm58_vm4 = vweird.f32 %v96_v28 }
 0x104   :  { %vm59_vm6 = vmor %vm57_vm5, %vm58_vm4 }
 0x105   :  { %v53_v31 = vmul.f32 %v96_v28, %v52_v30  ;;  %v50_v32 = vsel %vm49_vm3, %v94_v22, %v46_v29 }
 0x106   :  { %v61_v36 = vmul.f32 %v50_v32, %v29_v11 }
 0x107   :  { %v54_v33 = vmul.f32 0.5, %v53_v31 }
 0x108   :  { %v67_v40 = vmul.f32 %v89_v35, %v61_v36 }
 0x109   :  { %v55_v34 = vsub.f32 1.5, %v54_v33 }
 0x10a   :  { %v73_v43 = vadd.f32 %v90_v39, %v67_v40 }
 0x10b   :  { %v56_v37 = vmul.f32 %v96_v28, %v55_v34 }
 0x10d   :  { %v60_v38 = vsel %vm59_vm6, %v96_v28, %v56_v37 }
 0x10e   :  { %v62_v41 = vmul.f32 %v60_v38, %v30_v15 }
 0x110   :  { %v68_v42 = vmul.f32 %v89_v35, %v62_v41 }
 0x112   :  { %v74_v44 = vadd.f32 %v90_v39, %v68_v42 }
 0x114   :  { %v86_v45 = vpack.c.bf16 %v74_v44, %v73_v43 }
 0x116   :  { %87 = vst [vmem:[%s136_s3] sm:$0xff] %v86_v45  }

// kernel: san_bert_forward.15
= control target key start
LH: loop header
LB: loop body
LE: loop exit
PB: predicated region body
PF: predicated region fallthrough
CT: control target
= control target key end

     0   :  { %v269_v19 = vmov 128.0   ;;  %s347_s1 = inlined_call_operand.vmem [shape: bf16[128,128], index: 1, kind: input, shape index: {}]   ;;  %s348_s2 = inlined_call_operand.vmem [shape: f32[1,128], index: 2, kind: input, shape index: {}]   ;;  %s349_s0 = inlined_call_operand.vmem [shape: bf16[16,128], index: 0, kind: input, shape index: {}]   ;;  %s350_s3 = inlined_call_operand.vmem [shape: bf16[16,128], index: 3, kind: input, shape index: {}]   ;;  %s351_s4 = inlined_call_operand.vmem [shape: f32[1,128], index: 4, kind: input, shape index: {}]   ;;  %s352_s5 = inlined_call_operand.vmem [shape: f32[1,128], index: 5, kind: input, shape index: {}]   ;;  %s353_s6 = inlined_call_operand.vmem [shape: bf16[16,128], index: 6, kind: output, shape index: {}]  }
   0x1   :  { %v249_v0 = vld [vmem:[%s347_s1 + $0x38] sm:$0xff]  ;;  %v248_v1 = vld [vmem:[%s347_s1 + $0x30] sm:$0xff]  ;;  %v247_v2 = vld [vmem:[%s347_s1 + $0x28] sm:$0xff]  ;;  %263 = vrcp.f32 %v269_v19 }
   0x2   :  { %103 = vmatpush.bf16.msra.mxu0 %v249_v0  ;;  %v246_v3 = vld [vmem:[%s347_s1 + $0x20] sm:$0xff]  ;;  %v245_v4 = vld [vmem:[%s347_s1 + $0x18] sm:$0xff]  ;;  %v244_v5 = vld [vmem:[%s347_s1 + $0x10] sm:$0xff] }
   0x3   :  { %v243_v6 = vld [vmem:[%s347_s1 + $0x8] sm:$0xff]  ;;  %v242_v7 = vld [vmem:[%s347_s1] sm:$0xff] }
   0x4   :  { %v241_v8 = vld [vmem:[%s349_s0] sm:$0xff] }
   0x5   :  { %v251_v9 = vld [vmem:[%s350_s3] sm:$0xff]  }
   0x6   :  { %104 = vmatpush.bf16.msra.mxu0 %v248_v1  ;;  %v260_v10 = vld [vmem:[%s348_s2] ss:$0 sm:$0xff]  ;;  %v252_v11 = vunpack.c.l.bf16 %v251_v9  ;;  %v253_v15 = vunpack.c.h.bf16 %v251_v9 }
   0x7   :  { %v264_v20 = vpop.eup %263  ;;  %v261_v52 = vld [vmem:[%s351_s4] ss:$0 sm:$0xff] }
   0x8   :  { %v143_v21 = vmul.f32 128.0, %v264_v20  ;;  %vm147_vm0 = vweird.f32 %v264_v20  ;;  %v262_v56 = vld [vmem:[%s352_s5] ss:$0 sm:$0xff] }
   0xa   :  { %105 = vmatpush.bf16.msra.mxu0 %v247_v2  ;;  %v144_v22 = vsub.f32 1.0, %v143_v21 }
   0xc   :  { %v145_v23 = vmul.f32 %v264_v20, %v144_v22 }
   0xe   :  { %106 = vmatpush.bf16.msra.mxu0 %v246_v3  ;;  %v146_v24 = vadd.f32 %v264_v20, %v145_v23 }
  0x10   :  { %v148_v25 = vsel %vm147_vm0, %v264_v20, %v146_v24 }
  0x12   :  { %107 = vmatpush.bf16.msra.mxu0 %v245_v4 }
  0x16   :  { %108 = vmatpush.bf16.msra.mxu0 %v244_v5 }
  0x1a   :  { %109 = vmatpush.bf16.msra.mxu0 %v243_v6 }
  0x1e   :  { %110 = vmatpush.bf16.msra.mxu0 %v242_v7 }
  0x21   :  { %111 = vmatmul.bf16.vlgmr.msra.gmra.mxu0 %v241_v8 }
  0x9e   :  { %v112_v12 = vpop.f32.mrf.mxu0 }
  0x9f   :  { %v130_v13 = vadd.f32 %v260_v10, %v112_v12 }
  0xa1   :  { %v136_v14 = vadd.f32 %v252_v11, %v130_v13 }
  0xa3   :  { %138 = vadd.xlane.f32.xlu0 %v136_v14 }
  0xa6   :  { %v114_v16 = vpop.f32.mrf.mxu0 }
  0xa7   :  { %v131_v17 = vadd.f32 %v260_v10, %v114_v16 }
  0xa9   :  { %v137_v18 = vadd.f32 %v253_v15, %v131_v17 }
  0xab   :  { %140 = vadd.xlane.f32.xlu0 %v137_v18 }
 0x116   :  { %v139_v26 = vpop.xlane.xlu0 %138 }
 0x117   :  { %v149_v27 = vmul.f32 %v148_v25, %v139_v26 }
 0x119   :  { %v151_v28 = vsub.f32 %v136_v14, %v149_v27 }
 0x11b   :  { %v153_v29 = vmul.f32 %v151_v28, %v151_v28 }
 0x11d   :  { %155 = vadd.xlane.f32.xlu1 %v153_v29 }
 0x11e   :  { %v141_v30 = vpop.xlane.xlu0 %140 }
 0x11f   :  { %v150_v31 = vmul.f32 %v148_v25, %v141_v30 }
 0x121   :  { %v152_v32 = vsub.f32 %v137_v18, %v150_v31 }
 0x123   :  { %v154_v33 = vmul.f32 %v152_v32, %v152_v32 }
 0x125   :  { %157 = vadd.xlane.f32.xlu1 %v154_v33 }
 0x190   :  { %v156_v34 = vpop.xlane.xlu1 %155 }
 0x191   :  { %v159_v35 = vmul.f32 %v156_v34, %v148_v25 }
 0x193   :  { %v161_v36 = vadd.f32 1e-12, %v159_v35 }
 0x195   :  { %265 = vrsqrt.f32 %v161_v36  ;;  %vm169_vm2 = vweird.f32 %v161_v36 }
 0x198   :  { %v158_v37 = vpop.xlane.xlu1 %157 }
 0x199   :  { %v160_v38 = vmul.f32 %v158_v37, %v148_v25 }
 0x19b   :  { %v266_v39 = vpop.eup %265  ;;  %v162_v40 = vadd.f32 1e-12, %v160_v38 }
 0x19c   :  { %v164_v41 = vmul.f32 %v266_v39, %v161_v36  ;;  %vm170_vm1 = vweird.f32 %v266_v39 }
 0x19d   :  { %267 = vrsqrt.f32 %v162_v40  ;;  %vm171_vm3 = vmor %vm169_vm2, %vm170_vm1  ;;  %vm179_vm5 = vweird.f32 %v162_v40 }
 0x19e   :  { %v165_v42 = vmul.f32 %v266_v39, %v164_v41 }
 0x1a0   :  { %v166_v43 = vmul.f32 0.5, %v165_v42 }
 0x1a2   :  { %v167_v44 = vsub.f32 1.5, %v166_v43 }
 0x1a3   :  { %v268_v45 = vpop.eup %267 }
 0x1a4   :  { %v168_v46 = vmul.f32 %v266_v39, %v167_v44  ;;  %v174_v47 = vmul.f32 %v268_v45, %v162_v40  ;;  %vm180_vm4 = vweird.f32 %v268_v45 }
 0x1a5   :  { %vm181_vm6 = vmor %vm179_vm5, %vm180_vm4 }
 0x1a6   :  { %v175_v48 = vmul.f32 %v268_v45, %v174_v47  ;;  %v172_v49 = vsel %vm171_vm3, %v266_v39, %v168_v46 }
 0x1a7   :  { %v183_v53 = vmul.f32 %v172_v49, %v151_v28 }
 0x1a8   :  { %v176_v50 = vmul.f32 0.5, %v175_v48 }
 0x1a9   :  { %v189_v57 = vmul.f32 %v261_v52, %v183_v53 }
 0x1aa   :  { %v177_v51 = vsub.f32 1.5, %v176_v50 }
 0x1ab   :  { %v195_v60 = vadd.f32 %v262_v56, %v189_v57 }
 0x1ac   :  { %v178_v54 = vmul.f32 %v268_v45, %v177_v51 }
 0x1ae   :  { %v182_v55 = vsel %vm181_vm6, %v268_v45, %v178_v54 }
 0x1af   :  { %v184_v58 = vmul.f32 %v182_v55, %v152_v32 }
 0x1b1   :  { %v190_v59 = vmul.f32 %v261_v52, %v184_v58 }
 0x1b3   :  { %v196_v61 = vadd.f32 %v262_v56, %v190_v59 }
 0x1b5   :  { %v257_v62 = vpack.c.bf16 %v196_v61, %v195_v60 }
 0x1b7   :  { %258 = vst [vmem:[%s353_s6] sm:$0xff] %v257_v62  }

// kernel: san_bert_forward.13
= control target key start
LH: loop header
LB: loop body
LE: loop exit
PB: predicated region body
PF: predicated region fallthrough
CT: control target
= control target key end

     0   :  { %s594_s1 = inlined_call_operand.vmem [shape: bf16[128,384], index: 1, kind: input, shape index: {}]   ;;  %s595_s0 = inlined_call_operand.vmem [shape: bf16[16,128], index: 0, kind: input, shape index: {}]   ;;  %s596_s2 = inlined_call_operand.vmem [shape: f32[1,384], index: 2, kind: input, shape index: {}]   ;;  %s597_s3 = inlined_call_operand.vmem [shape: bf16[16,384], index: 3, kind: output, shape index: {}]  }
   0x1   :  { %v377_v0 = vld [vmem:[%s594_s1 + $0xa8] sm:$0xf]  ;;  %v410_v1 = vld [vmem:[%s594_s1 + $0xb0] sm:$0xf0]  ;;  %v409_v2 = vld [vmem:[%s594_s1 + $0xac] sm:$0xf] }
   0x2   :  { %v378_v3 = vor.u32 %v410_v1, %v377_v0  ;;  %v379_v4 = vld [vmem:[%s594_s1 + $0xb4] sm:$0xf0]  ;;  %v385_v5 = vld [vmem:[%s594_s1 + $0xb0] sm:$0xf]  ;;  %v411_v6 = vld [vmem:[%s594_s1 + $0xb8] sm:$0xf0] }
   0x3   :  { %v382_v7 = vor.u32 %v409_v2, %v379_v4  ;;  %v386_v8 = vor.u32 %v411_v6, %v385_v5  ;;  %v365_v9 = vld [vmem:[%s594_s1 + $0x90] sm:$0xf]  ;;  %v407_v10 = vld [vmem:[%s594_s1 + $0x98] sm:$0xf0]  ;;  %v406_v11 = vld [vmem:[%s594_s1 + $0x94] sm:$0xf] }
   0x4   :  { %198 = vmatpush.bf16.msra.mxu0 %v378_v3  ;;  %v366_v12 = vor.u32 %v407_v10, %v365_v9  ;;  %v367_v13 = vld [vmem:[%s594_s1 + $0x9c] sm:$0xf0]  ;;  %v373_v14 = vld [vmem:[%s594_s1 + $0x98] sm:$0xf]  ;;  %v408_v15 = vld [vmem:[%s594_s1 + $0xa0] sm:$0xf0] }
   0x5   :  { %212 = vmatpush.bf16.msra.mxu1 %v382_v7  ;;  %226 = vmatpush.bf16.msra.mxu2 %v386_v8  ;;  %v370_v16 = vor.u32 %v406_v11, %v367_v13  ;;  %v374_v17 = vor.u32 %v408_v15, %v373_v14  ;;  %v353_v18 = vld [vmem:[%s594_s1 + $0x78] sm:$0xf]  ;;  %v404_v19 = vld [vmem:[%s594_s1 + $0x80] sm:$0xf0]  ;;  %v403_v20 = vld [vmem:[%s594_s1 + $0x7c] sm:$0xf] }
   0x6   :  { %v355_v21 = vld [vmem:[%s594_s1 + $0x84] sm:$0xf0]  ;;  %v361_v22 = vld [vmem:[%s594_s1 + $0x80] sm:$0xf]  ;;  %v405_v23 = vld [vmem:[%s594_s1 + $0x88] sm:$0xf0]  ;;  %v354_v24 = vor.u32 %v404_v19, %v353_v18 }
   0x7   :  { %v358_v25 = vor.u32 %v403_v20, %v355_v21  ;;  %v362_v26 = vor.u32 %v405_v23, %v361_v22  ;;  %v341_v27 = vld [vmem:[%s594_s1 + $0x60] sm:$0xf]  ;;  %v401_v28 = vld [vmem:[%s594_s1 + $0x68] sm:$0xf0]  ;;  %v400_v29 = vld [vmem:[%s594_s1 + $0x64] sm:$0xf] }
   0x8   :  { %199 = vmatpush.bf16.msra.mxu0 %v366_v12  ;;  %v343_v30 = vld [vmem:[%s594_s1 + $0x6c] sm:$0xf0]  ;;  %v349_v31 = vld [vmem:[%s594_s1 + $0x68] sm:$0xf]  ;;  %v402_v32 = vld [vmem:[%s594_s1 + $0x70] sm:$0xf0]  ;;  %v342_v33 = vor.u32 %v401_v28, %v341_v27 }
   0x9   :  { %213 = vmatpush.bf16.msra.mxu1 %v370_v16  ;;  %227 = vmatpush.bf16.msra.mxu2 %v374_v17  ;;  %v346_v34 = vor.u32 %v400_v29, %v343_v30  ;;  %v350_v35 = vor.u32 %v402_v32, %v349_v31  ;;  %v329_v36 = vld [vmem:[%s594_s1 + $0x48] sm:$0xf]  ;;  %v398_v37 = vld [vmem:[%s594_s1 + $0x50] sm:$0xf0]  ;;  %v397_v38 = vld [vmem:[%s594_s1 + $0x4c] sm:$0xf] }
   0xa   :  { %v331_v39 = vld [vmem:[%s594_s1 + $0x54] sm:$0xf0]  ;;  %v337_v40 = vld [vmem:[%s594_s1 + $0x50] sm:$0xf]  ;;  %v399_v41 = vld [vmem:[%s594_s1 + $0x58] sm:$0xf0]  ;;  %v330_v42 = vor.u32 %v398_v37, %v329_v36 }
   0xb   :  { %v334_v43 = vor.u32 %v397_v38, %v331_v39  ;;  %v338_v44 = vor.u32 %v399_v41, %v337_v40  ;;  %v317_v45 = vld [vmem:[%s594_s1 + $0x30] sm:$0xf]  ;;  %v395_v46 = vld [vmem:[%s594_s1 + $0x38] sm:$0xf0]  ;;  %v394_v47 = vld [vmem:[%s594_s1 + $0x34] sm:$0xf] }
   0xc   :  { %200 = vmatpush.bf16.msra.mxu0 %v354_v24  ;;  %v319_v48 = vld [vmem:[%s594_s1 + $0x3c] sm:$0xf0]  ;;  %v325_v49 = vld [vmem:[%s594_s1 + $0x38] sm:$0xf]  ;;  %v396_v50 = vld [vmem:[%s594_s1 + $0x40] sm:$0xf0]  ;;  %v318_v51 = vor.u32 %v395_v46, %v317_v45 }
   0xd   :  { %214 = vmatpush.bf16.msra.mxu1 %v358_v25  ;;  %228 = vmatpush.bf16.msra.mxu2 %v362_v26  ;;  %v322_v52 = vor.u32 %v394_v47, %v319_v48  ;;  %v326_v53 = vor.u32 %v396_v50, %v325_v49  ;;  %v305_v54 = vld [vmem:[%s594_s1 + $0x18] sm:$0xf]  ;;  %v392_v55 = vld [vmem:[%s594_s1 + $0x20] sm:$0xf0]  ;;  %v391_v56 = vld [vmem:[%s594_s1 + $0x1c] sm:$0xf] }
   0xe   :  { %v307_v57 = vld [vmem:[%s594_s1 + $0x24] sm:$0xf0]  ;;  %v313_v58 = vld [vmem:[%s594_s1 + $0x20] sm:$0xf]  ;;  %v393_v59 = vld [vmem:[%s594_s1 + $0x28] sm:$0xf0]  ;;  %v306_v60 = vor.u32 %v392_v55, %v305_v54 }
   0xf   :  { %v310_v61 = vor.u32 %v391_v56, %v307_v57  ;;  %v314_v62 = vor.u32 %v393_v59, %v313_v58  ;;  %v293_v63 = vld [vmem:[%s594_s1] sm:$0xf]  ;;  %v389_v0 = vld [vmem:[%s594_s1 + $0x8] sm:$0xf0]  ;;  %v388_v1 = vld [vmem:[%s594_s1 + $0x4] sm:$0xf] }
  0x10   :  { %201 = vmatpush.bf16.msra.mxu0 %v342_v33  ;;  %v295_v2 = vld [vmem:[%s594_s1 + $0xc] sm:$0xf0]  ;;  %v301_v3 = vld [vmem:[%s594_s1 + $0x8] sm:$0xf]  ;;  %v390_v4 = vld [vmem:[%s594_s1 + $0x10] sm:$0xf0]  ;;  %v294_v5 = vor.u32 %v389_v0, %v293_v63 }
  0x11   :  { %215 = vmatpush.bf16.msra.mxu1 %v346_v34  ;;  %229 = vmatpush.bf16.msra.mxu2 %v350_v35  ;;  %v298_v6 = vor.u32 %v388_v1, %v295_v2  ;;  %v302_v7 = vor.u32 %v390_v4, %v301_v3  ;;  %v387_v8 = vld [vmem:[%s595_s0] sm:$0xff] }
  0x12   :  { %v261_v9 = vld [vmem:[%s596_s2] sm:$0x7] }
  0x13   :  { %v263_v10 = vperm.slane %v261_v9, 0  ;;  %v264_v11 = vperm.slane %v261_v9, 1  ;;  %v265_v17 = vperm.slane %v261_v9, 2 }
  0x14   :  { %202 = vmatpush.bf16.msra.mxu0 %v330_v42 }
  0x15   :  { %216 = vmatpush.bf16.msra.mxu1 %v334_v43  ;;  %230 = vmatpush.bf16.msra.mxu2 %v338_v44 }
  0x18   :  { %203 = vmatpush.bf16.msra.mxu0 %v318_v51 }
  0x19   :  { %217 = vmatpush.bf16.msra.mxu1 %v322_v52  ;;  %231 = vmatpush.bf16.msra.mxu2 %v326_v53 }
  0x1c   :  { %204 = vmatpush.bf16.msra.mxu0 %v306_v60 }
  0x1d   :  { %218 = vmatpush.bf16.msra.mxu1 %v310_v61  ;;  %232 = vmatpush.bf16.msra.mxu2 %v314_v62 }
  0x20   :  { %205 = vmatpush.bf16.msra.mxu0 %v294_v5 }
  0x21   :  { %219 = vmatpush.bf16.msra.mxu1 %v298_v6  ;;  %233 = vmatpush.bf16.msra.mxu2 %v302_v7 }
  0x23   :  { %206 = vmatmul.bf16.vlgmr.msra.gmra.mxu0 %v387_v8 }
  0x24   :  { %220 = vmatmul.bf16.vlgmr.msra.gmra.mxu1 %v387_v8  ;;  %234 = vmatmul.bf16.vlgmr.msra.gmra.mxu2 %v387_v8 }
  0xa0   :  { %v207_v12 = vpop.f32.mrf.mxu0 }
  0xa1   :  { %v269_v13 = vadd.f32 %v263_v10, %v207_v12  ;;  %v221_v14 = vpop.f32.mrf.mxu1 }
  0xa2   :  { %v270_v15 = vadd.f32 %v264_v11, %v221_v14 }
  0xa4   :  { %v275_v16 = vpack.c.bf16 %v270_v15, %v269_v13 }
  0xa6   :  { %279 = vst [vmem:[%s597_s3] sm:$0xff] %v275_v16 }
  0xa7   :  { %v235_v18 = vpop.f32.mrf.mxu2 }
  0xa8   :  { %v271_v19 = vadd.f32 %v265_v17, %v235_v18  ;;  %v209_v20 = vpop.f32.mrf.mxu0 }
  0xa9   :  { %v272_v21 = vadd.f32 %v263_v10, %v209_v20  ;;  %v223_v22 = vpop.f32.mrf.mxu1 }
  0xaa   :  { %v276_v23 = vpack.c.bf16 %v271_v19, %v271_v19  ;;  %v273_v24 = vadd.f32 %v264_v11, %v223_v22 }
  0xac   :  { %280 = vst [vmem:[%s597_s3 + $0x8] sm:$0xf] %v276_v23  ;;  %v277_v25 = vpack.c.bf16 %v273_v24, %v272_v21 }
  0xae   :  { %281 = vst [vmem:[%s597_s3 + $0xc] sm:$0xff] %v277_v25 }
  0xaf   :  { %v237_v26 = vpop.f32.mrf.mxu2 }
  0xb0   :  { %v274_v27 = vadd.f32 %v265_v17, %v237_v26 }
  0xb2   :  { %v278_v28 = vpack.c.bf16 %v274_v27, %v274_v27 }
  0xb4   :  { %282 = vst [vmem:[%s597_s3 + $0x14] sm:$0xf] %v278_v28 }

// kernel: san_bert_forward.14
= control target key start
LH: loop header
LB: loop body
LE: loop exit
PB: predicated region body
PF: predicated region fallthrough
CT: control target
= control target key end

     0   :  { %s993_s15 = smov 0   ;;  %s995_s16 = smov 0   ;;  %s1084_s0 = inlined_call_operand.vmem [shape: bf16[16,384], index: 0, kind: input, shape index: {}, may-alias: {0,1,2}]   ;;  %s1085_s1 = inlined_call_operand.vmem [shape: bf16[16,384], index: 1, kind: input, shape index: {}, may-alias: {0,1,2}]   ;;  %s1086_s2 = inlined_call_operand.vmem [shape: bf16[16,384], index: 2, kind: input, shape index: {}, may-alias: {0,1,2}]   ;;  %s1087_s3 = inlined_call_operand.vmem [shape: f32[2,1,8], index: 3, kind: input, shape index: {}]   ;;  %s1088_s4 = inlined_call_operand.vmem [shape: bf16[16,128], index: 4, kind: output, shape index: {}]  }
   0x1   :  { %s997_s17 = smov 0  }
   0x2 LB: > { %s26_s18 = sadd.s32 1, %s959_s16  ;;  %p838_p0 = scmp.ge.s32.totalorder %s963_s17, 1  ;;  %s963_s17 = sphi %s997_s17, %s14_s17   ;;  %s959_s16 = sphi %s995_s16, %s1090_s16   ;;  %s955_s15 = sphi %s993_s15, %s1089_s15  }
   0x3   : > { %p28_p1 = scmp.ge.s32.totalorder %s26_s18, 2  ;;  %p227_p2 = scmp.lt.s32.totalorder %s963_s17, 3 }
   0x5   : > { %s1092_s18 = smov (%p28_p1, %s26_s18), 0  ;;  %p228_p3 = pnand %p838_p0, %p227_p2 }
   0x6   : > { %p279_p4 = scmp.lt.s32.totalorder (!%p228_p3), %s955_s15, 1  ;;  %s965_s24 = smov (!%p228_p3), 64  }
   0x7   : > { %231 = sbr.rel (%p228_p3) target bundleno = 1246 (0x4de), region = 36 }
   0xc   : > { %s1094_s15 = smov (!%p279_p4, %s955_s15), 1  ;;  %vm365_vm0 = vcmask 523264   ;;  %vm405_vm1 = vcmask 64512   ;;  %vm615_vm2 = vcmask 1047556  }
   0xd   : > { %s1014_s19 = smul.u32 12, %s1094_s15  ;;  %s309_s30 = scalar_lea.vmem %s1087_s3, %s1094_s15 }
   0xe   : > { %v932_v12 = vld [vmem:[%s309_s30] ss:$0 sm:$0xff]  ;;  %s842_s9 = sshll.u32 %s1094_s15, 2 }
   0xf   : > { %s856_s20 = sadd.s32 4, %s1014_s19  ;;  %s286_s27 = scalar_lea.vmem %s1084_s0, %s1014_s19 }
  0x10   : > { %s295_s23 = scalar_lea.vmem %s1085_s1, %s856_s20  ;;  %v318_v1 = vld [vmem:[%s286_s27] sm:$0xf]  ;;  %s858_s5 = sadd.s32 8, %s1014_s19 }
  0x11   : > { %v322_v0 = vld [vmem:[%s295_s23] sm:$0xf]  ;;  %320 = vrot.lane.b32.xlu1 %v318_v1, %s965_s24  ;;  %s305_s8 = scalar_lea.vmem %s1086_s2, %s858_s5  ;;  %s316_s12 = scalar_lea.vmem %s1088_s4, %s842_s9 }
  0x12   : > { %324 = vrot.lane.b32.xlu0 %v322_v0, %s965_s24  ;;  %v327_v23 = vld [vmem:[%s305_s8] sm:$0xf] }
  0x83   : > { %v321_v11 = vpop.permute.xlu1 %320 }
  0x84   : > { %v325_v2 = vpop.permute.xlu0 %324 }
  0x85   : > { %893 = vxpose.binary.xlu0.c.b16.start.end [1/2] (short) (narrow) %v325_v2, %v322_v0, 64 }
 0x131   : > { %v894_v3 = vpop.trf.xlu0 }
 0x139   : > { %v895_v4 = vpop.trf.xlu0 }
 0x141   : > { %v896_v5 = vpop.trf.xlu0 }
 0x149   : > { %v897_v6 = vpop.trf.xlu0 }
 0x151   : > { %v898_v7 = vpop.trf.xlu0 }
 0x159   : > { %v899_v8 = vpop.trf.xlu0 }
 0x161   : > { %v900_v9 = vpop.trf.xlu0 }
 0x162   : > { %373 = vmatpush.bf16.msra.mxu0 %v900_v9 }
 0x166   : > { %374 = vmatpush.bf16.msra.mxu0 %v898_v7 }
 0x169   : > { %v901_v10 = vpop.trf.xlu0 }
 0x16a   : > { %375 = vmatpush.bf16.msra.mxu0 %v896_v5  ;;  %389 = vmatpush.bf16.msra.mxu1 %v901_v10 }
 0x16e   : > { %376 = vmatpush.bf16.msra.mxu0 %v894_v3  ;;  %390 = vmatpush.bf16.msra.mxu1 %v899_v8 }
 0x171   : > { %843 = vmatmul.msk.bf16.vlgmr.msra.gmra.mxu0 %vm365_vm0, %v318_v1 }
 0x172   : > { %391 = vmatpush.bf16.msra.mxu1 %v897_v6 }
 0x176   : > { %392 = vmatpush.bf16.msra.mxu1 %v895_v4 }
 0x179   : > { %844 = vmatmul.msk.bf16.vlgmr.msra.gmra.mxu1 %vm365_vm0, %v321_v11 }
 0x1ee   : > { %v378_v13 = vpop.f32.mrf.mxu0 }
 0x1ef   : > { %v398_v14 = vmul.f32 0.125, %v378_v13  ;;  %v966_v13 = vmov 1983009808  }
 0x1f1   : > { %v403_v15 = vadd.f32 %v932_v12, %v398_v14  ;;  %v618_v14 = vunpack.c.l.s4 %v966_v13 }
 0x1f3   : > { %v406_v16 = vsel %vm405_vm1, %v403_v15, -inf }
 0x1f4   : > { %407 = vmax.xlane.f32.xlu1 %v406_v16  ;;  %v967_v16 = vmov 1934713408  }
 0x1f6   : > { %v394_v17 = vpop.f32.mrf.mxu1  ;;  %v380_v18 = vpop.f32.mrf.mxu0 }
 0x1f7   : > { %v399_v19 = vmul.f32 0.125, %v394_v17  ;;  %v640_v17 = vunpack.c.l.s4 %v967_v16 }
 0x1f9   : > { %v404_v20 = vadd.f32 %v932_v12, %v399_v19 }
 0x1fb   : > { %v409_v21 = vsel %vm405_vm1, %v404_v20, -inf }
 0x1fc   : > { %410 = vmax.xlane.f32.xlu2 %v409_v21 }
 0x1fe   : > { %v396_v22 = vpop.f32.mrf.mxu1 }
 0x214   : > { %329 = vrot.lane.b32.xlu2 %v327_v23, %s965_s24 }
 0x267   : > { %v408_v24 = vpop.xlane.xlu1 %407 }
 0x268   : > { %v412_v25 = vsub.f32 %v403_v15, %v408_v24  ;;  %v619_v15 = vunpack.c.0.s8 %v618_v14 }
 0x26a   : > { %v414_v26 = vmul.f32 1.442695, %v412_v25  ;;  %v641_v25 = vunpack.c.0.s8 %v640_v17 }
 0x26c   : > { %933 = vpow2.f32 %v414_v26 }
 0x26f   : > { %v411_v27 = vpop.xlane.xlu2 %410 }
 0x270   : > { %v413_v28 = vsub.f32 %v404_v20, %v411_v27 }
 0x272   : > { %v934_v29 = vpop.eup %933  ;;  %v416_v30 = vmul.f32 1.442695, %v413_v28 }
 0x273   : > { %v418_v31 = vsel %vm405_vm1, %v934_v29, 0.0 }
 0x274   : > { %935 = vpow2.f32 %v416_v30  ;;  %419 = vadd.xlane.f32.xlu2 %v418_v31 }
 0x277   : > { %v330_v32 = vpop.permute.xlu2 %329 }
 0x278   : > { %902 = vxpose.binary.xlu1.c.b16.start.end [1/2] (short) (narrow) %v330_v32, %v327_v23, 64 }
 0x27a   : > { %v936_v33 = vpop.eup %935 }
 0x27b   : > { %v421_v34 = vsel %vm405_vm1, %v936_v33, 0.0 }
 0x27c   : > { %422 = vadd.xlane.f32.xlu0 %v421_v34 }
 0x2e7   : > { %v420_v35 = vpop.xlane.xlu2 %419 }
 0x2e8   : > { %937 = vrcp.f32 %v420_v35 }
 0x2ee   : > { %v938_v36 = vpop.eup %937 }
 0x2ef   : > { %v423_v37 = vpop.xlane.xlu0 %422  ;;  %v426_v38 = vmul.f32 %v938_v36, %v934_v29 }
 0x2f0   : > { %939 = vrcp.f32 %v423_v37 }
 0x2f1   : > { %v428_v39 = vpack.c.bf16 %v426_v38, %v426_v38 }
 0x2f3   : > { %v475_v40 = vsel %vm405_vm1, %v428_v39, 0 }
 0x2f4   : > { %484 = vmatpush.bf16.xpose.msrb.mxu0 %v475_v40  ;;  %859 = vmatpush.bf16.xpose.msra.mxu2 %v475_v40 }
 0x2f6   : > { %v940_v41 = vpop.eup %939 }
 0x2f7   : > { %v427_v42 = vmul.f32 %v940_v41, %v936_v33 }
 0x2f9   : > { %v429_v43 = vpack.c.bf16 %v427_v42, %v427_v42 }
 0x2fb   : > { %v519_v44 = vsel %vm405_vm1, %v429_v43, 0 }
 0x2fc   : > { %528 = vmatpush.bf16.xpose.msrb.mxu1 %v519_v44  ;;  %860 = vmatpush.bf16.xpose.msra.mxu3 %v519_v44 }
 0x324   : > { %v903_v45 = vpop.trf.xlu1 }
 0x325   : > { %845 = vmatmul.msk.bf16.vlgmr.msrb.gmra.mxu0 %vm405_vm1, %v903_v45 }
 0x32c   : > { %v904_v46 = vpop.trf.xlu1 }
 0x32d   : > { %849 = vmatmul.msk.bf16.vlgmr.msrb.gmra.mxu1 %vm405_vm1, %v904_v46 }
 0x334   : > { %v905_v47 = vpop.trf.xlu1 }
 0x335   : > { %846 = vmatmul.msk.bf16.vlgmr.msra.gmra.mxu2 %vm405_vm1, %v905_v47 }
 0x33c   : > { %v906_v48 = vpop.trf.xlu1 }
 0x33d   : > { %850 = vmatmul.msk.bf16.vlgmr.msra.gmra.mxu3 %vm405_vm1, %v906_v48 }
 0x344   : > { %v907_v49 = vpop.trf.xlu1 }
 0x345   : > { %847 = vmatmul.msk.bf16.gmra.mxu2 %vm405_vm1, %v907_v49 }
 0x34c   : > { %v908_v50 = vpop.trf.xlu1 }
 0x34d   : > { %851 = vmatmul.msk.bf16.gmra.mxu3 %vm405_vm1, %v908_v50 }
 0x354   : > { %v909_v51 = vpop.trf.xlu1 }
 0x355   : > { %848 = vmatmul.msk.bf16.gmra.mxu2 %vm405_vm1, %v909_v51 }
 0x35c   : > { %v910_v52 = vpop.trf.xlu1 }
 0x35d   : > { %852 = vmatmul.msk.bf16.gmra.mxu3 %vm405_vm1, %v910_v52 }
 0x3a2   : > { %v486_v53 = vpop.f32.mrf.mxu0 }
 0x3aa   : > { %v530_v54 = vpop.f32.mrf.mxu1  ;;  %v488_v56 = vpop.f32.mrf.mxu0 }
 0x3ab   : > { %v911_v55 = vpack.i.bf16 %v530_v54, %v486_v53 }
 0x3ad   : > { %912 = vxpose.xlu2.b32.start [1/8] (short) (narrow) %v911_v55, 8 }
 0x3b2   : > { %v532_v57 = vpop.f32.mrf.mxu1 }
 0x3b3   : > { %v913_v58 = vpack.i.bf16 %v532_v57, %v488_v56 }
 0x3b5   : > { %914 = vxpose.xlu2.b32.cont [2/8] (short) (narrow) %v913_v58, 8 }
 0x3b8   : > { %v491_v59 = vpop.f32.mrf.mxu2 }
 0x3c0   : > { %v493_v60 = vpop.f32.mrf.mxu2  ;;  %v535_v61 = vpop.f32.mrf.mxu3 }
 0x3c1   : > { %v915_v62 = vpack.i.bf16 %v535_v61, %v491_v59 }
 0x3c3   : > { %916 = vxpose.xlu2.b32.cont [3/8] (short) (narrow) %v915_v62, 8 }
 0x3c8   : > { %v537_v63 = vpop.f32.mrf.mxu3  ;;  %v496_v1 = vpop.f32.mrf.mxu2 }
 0x3c9   : > { %v917_v0 = vpack.i.bf16 %v537_v63, %v493_v60 }
 0x3cb   : > { %918 = vxpose.xlu2.b32.cont [4/8] (short) (narrow) %v917_v0, 8 }
 0x3d0   : > { %v540_v2 = vpop.f32.mrf.mxu3  ;;  %v498_v4 = vpop.f32.mrf.mxu2 }
 0x3d1   : > { %v919_v3 = vpack.i.bf16 %v540_v2, %v496_v1 }
 0x3d3   : > { %920 = vxpose.xlu2.b32.cont [5/8] (short) (narrow) %v919_v3, 8 }
 0x3d8   : > { %v542_v5 = vpop.f32.mrf.mxu3  ;;  %v501_v7 = vpop.f32.mrf.mxu2 }
 0x3d9   : > { %v921_v6 = vpack.i.bf16 %v542_v5, %v498_v4 }
 0x3db   : > { %922 = vxpose.xlu2.b32.cont [6/8] (short) (narrow) %v921_v6, 8 }
 0x3e0   : > { %v545_v8 = vpop.f32.mrf.mxu3  ;;  %v503_v10 = vpop.f32.mrf.mxu2 }
 0x3e1   : > { %v923_v9 = vpack.i.bf16 %v545_v8, %v501_v7 }
 0x3e3   : > { %924 = vxpose.xlu2.b32.cont [7/8] (short) (narrow) %v923_v9, 8 }
 0x3e8   : > { %v547_v11 = vpop.f32.mrf.mxu3 }
 0x3e9   : > { %v925_v12 = vpack.i.bf16 %v547_v11, %v503_v10 }
 0x3eb   : > { %926 = vxpose.xlu2.b32.end [8/8] (short) (narrow) %v925_v12, 8 }
 0x44c   : > { %v927_v18 = vpop.trf.xlu2 }
 0x44d   : > { %v931_v19 = vunpack.i.h.bf16 %v927_v18  ;;  %v928_v20 = vunpack.i.l.bf16 %v927_v18 }
 0x44f   : > { %v625_v21 = vrot.slane %v931_v19, 4  ;;  %v630_v22 = vperm.slane %v931_v19, %v619_v15  ;;  %v614_v23 = vrot.slane %v928_v20, 4  ;;  %v620_v24 = vperm.slane %v928_v20, %v619_v15 }
 0x451   : > { %v626_v26 = vsel %vm615_vm2, 0.0, %v625_v21  ;;  %v635_v27 = vrot.slane %v630_v22, 4  ;;  %v616_v28 = vsel %vm615_vm2, 0.0, %v614_v23  ;;  %v637_v29 = vrot.slane %v620_v24, 4 }
 0x452   : > { %v634_v30 = vperm.slane %v626_v26, %v619_v15  ;;  %v624_v31 = vperm.slane %v616_v28, %v619_v15 }
 0x453   : > { %v636_v32 = vsel %vm615_vm2, %v635_v27, %v620_v24  ;;  %v638_v33 = vsel %vm615_vm2, %v630_v22, %v637_v29 }
 0x454   : > { %v647_v34 = vrot.slane %v634_v30, 4  ;;  %v642_v35 = vperm.slane %v636_v32, %v641_v25  ;;  %v646_v36 = vperm.slane %v638_v33, %v641_v25  ;;  %v649_v37 = vrot.slane %v624_v31, 4 }
 0x456   : > { %v648_v38 = vsel %vm615_vm2, %v647_v34, %v624_v31  ;;  %v650_v39 = vsel %vm615_vm2, %v634_v30, %v649_v37  ;;  %v659_v40 = vrot.slane %v642_v35, 4  ;;  %v661_v41 = vrot.slane %v646_v36, 4 }
 0x457   : > { %v654_v42 = vperm.slane %v648_v38, %v641_v25  ;;  %v658_v43 = vperm.slane %v650_v39, %v641_v25 }
 0x458   : > { %v662_v44 = vsel %vm615_vm2, 0.0, %v661_v41  ;;  %v660_v48 = vsel %vm615_vm2, 0.0, %v659_v40  ;;  %v667_v50 = vsel %vm615_vm2, %v661_v41, %v642_v35 }
 0x459   : > { %v663_v45 = vrot.slane %v654_v42, 4  ;;  %v665_v46 = vrot.slane %v658_v43, 4  ;;  %v672_v47 = vrot.slane %v662_v44, 4  ;;  %v671_v55 = vperm.slane %v667_v50, %v619_v15 }
 0x45b   : > { %v666_v49 = vsel %vm615_vm2, 0.0, %v665_v46  ;;  %v673_v51 = vsel %vm615_vm2, %v672_v47, %v660_v48  ;;  %v664_v54 = vsel %vm615_vm2, 0.0, %v663_v45  ;;  %v678_v56 = vsel %vm615_vm2, %v665_v46, %v654_v42 }
 0x45c   : > { %v683_v52 = vrot.slane %v666_v49, 4  ;;  %v677_v53 = vperm.slane %v673_v51, %v619_v15  ;;  %v682_v61 = vperm.slane %v678_v56, %v619_v15 }
 0x45e   : > { %v684_v57 = vsel %vm615_vm2, %v683_v52, %v664_v54  ;;  %v689_v58 = vrot.slane %v677_v53, 4 }
 0x45f   : > { %v688_v59 = vperm.slane %v684_v57, %v619_v15 }
 0x460   : > { %v690_v60 = vsel %vm615_vm2, %v689_v58, %v671_v55 }
 0x461   : > { %v694_v62 = vperm.slane %v690_v60, %v641_v25  ;;  %v695_v63 = vrot.slane %v688_v59, 4 }
 0x463   : > { %v696_v0 = vsel %vm615_vm2, %v695_v63, %v682_v61  ;;  %v703_v1 = vrot.slane %v694_v62, 4 }
 0x464   : > { %v700_v2 = vperm.slane %v696_v0, %v641_v25 }
 0x466   : > { %v704_v3 = vsel %vm615_vm2, %v700_v2, %v703_v1  ;;  %v701_v4 = vrot.slane %v700_v2, 4 }
 0x467   : > { %706 = vrot.lane.b32.xlu1 %v704_v3, %s965_s24 }
 0x468   : > { %v702_v5 = vsel %vm615_vm2, %v701_v4, %v694_v62 }
 0x4d9   : > { %v707_v6 = vpop.permute.xlu1 %706 }
 0x4da   : > { %v709_v7 = vsel %vm365_vm0, %v702_v5, %v707_v6 }
 0x4db   : > { %v710_v8 = vpack.c.bf16 %v709_v7, %v709_v7 }
 0x4dd   : > { %711 = vst [vmem:[%s316_s12] sm:$0xf] %v710_v8 }
 0x4de PF: > { %s14_s17 = sadd.s32 1, %s963_s17   ;;  %s1089_s15 = smov %s959_s16 }
 0x4df   : > { %p11_p5 = scmp.ge.s32.totalorder %s14_s17, 4   ;;  %s1090_s16 = smov %s1092_s18 }
 0x4e1   :  { %13 = sbr.rel (!%p11_p5) target bundleno = 2 (0x2), region = 75 }

// kernel: san_bert_forward.16
= control target key start
LH: loop header
LB: loop body
LE: loop exit
PB: predicated region body
PF: predicated region fallthrough
CT: control target
= control target key end

     0   :  { %s448_s1 = inlined_call_operand.vmem [shape: bf16[128,256], index: 1, kind: input, shape index: {}]   ;;  %s449_s0 = inlined_call_operand.vmem [shape: bf16[16,128], index: 0, kind: input, shape index: {}]   ;;  %s450_s2 = inlined_call_operand.vmem [shape: f32[1,256], index: 2, kind: input, shape index: {}]   ;;  %s451_s3 = inlined_call_operand.vmem [shape: bf16[16,256], index: 3, kind: output, shape index: {}]  }
   0x1   :  { %v289_v0 = vld [vmem:[%s448_s1 + $0x70] sm:$0xf]  ;;  %v311_v1 = vld [vmem:[%s448_s1 + $0x74] sm:$0xf0]  ;;  %v310_v2 = vld [vmem:[%s448_s1 + $0x74] sm:$0xf] }
   0x2   :  { %v290_v3 = vor.u32 %v311_v1, %v289_v0  ;;  %v291_v4 = vld [vmem:[%s448_s1 + $0x78] sm:$0xf0]  ;;  %v281_v5 = vld [vmem:[%s448_s1 + $0x60] sm:$0xf]  ;;  %v309_v6 = vld [vmem:[%s448_s1 + $0x64] sm:$0xf0] }
   0x3   :  { %v294_v7 = vor.u32 %v310_v2, %v291_v4  ;;  %v308_v8 = vld [vmem:[%s448_s1 + $0x64] sm:$0xf]  ;;  %v283_v9 = vld [vmem:[%s448_s1 + $0x68] sm:$0xf0]  ;;  %v282_v10 = vor.u32 %v309_v6, %v281_v5  ;;  %v273_v12 = vld [vmem:[%s448_s1 + $0x50] sm:$0xf] }
   0x4   :  { %130 = vmatpush.bf16.msra.mxu0 %v290_v3  ;;  %v286_v11 = vor.u32 %v308_v8, %v283_v9  ;;  %v307_v13 = vld [vmem:[%s448_s1 + $0x54] sm:$0xf0]  ;;  %v306_v14 = vld [vmem:[%s448_s1 + $0x54] sm:$0xf]  ;;  %v275_v15 = vld [vmem:[%s448_s1 + $0x58] sm:$0xf0] }
   0x5   :  { %144 = vmatpush.bf16.msra.mxu1 %v294_v7  ;;  %v274_v16 = vor.u32 %v307_v13, %v273_v12  ;;  %v278_v17 = vor.u32 %v306_v14, %v275_v15  ;;  %v265_v18 = vld [vmem:[%s448_s1 + $0x40] sm:$0xf]  ;;  %v305_v19 = vld [vmem:[%s448_s1 + $0x44] sm:$0xf0]  ;;  %v304_v20 = vld [vmem:[%s448_s1 + $0x44] sm:$0xf] }
   0x6   :  { %v267_v21 = vld [vmem:[%s448_s1 + $0x48] sm:$0xf0]  ;;  %v266_v22 = vor.u32 %v305_v19, %v265_v18  ;;  %v257_v24 = vld [vmem:[%s448_s1 + $0x30] sm:$0xf]  ;;  %v303_v25 = vld [vmem:[%s448_s1 + $0x34] sm:$0xf0] }
   0x7   :  { %v270_v23 = vor.u32 %v304_v20, %v267_v21  ;;  %v302_v26 = vld [vmem:[%s448_s1 + $0x34] sm:$0xf]  ;;  %v259_v27 = vld [vmem:[%s448_s1 + $0x38] sm:$0xf0]  ;;  %v258_v28 = vor.u32 %v303_v25, %v257_v24  ;;  %v249_v30 = vld [vmem:[%s448_s1 + $0x20] sm:$0xf] }
   0x8   :  { %131 = vmatpush.bf16.msra.mxu0 %v282_v10  ;;  %v262_v29 = vor.u32 %v302_v26, %v259_v27  ;;  %v301_v31 = vld [vmem:[%s448_s1 + $0x24] sm:$0xf0]  ;;  %v300_v32 = vld [vmem:[%s448_s1 + $0x24] sm:$0xf]  ;;  %v251_v33 = vld [vmem:[%s448_s1 + $0x28] sm:$0xf0] }
   0x9   :  { %145 = vmatpush.bf16.msra.mxu1 %v286_v11  ;;  %v250_v34 = vor.u32 %v301_v31, %v249_v30  ;;  %v254_v35 = vor.u32 %v300_v32, %v251_v33  ;;  %v241_v36 = vld [vmem:[%s448_s1 + $0x10] sm:$0xf]  ;;  %v299_v37 = vld [vmem:[%s448_s1 + $0x14] sm:$0xf0]  ;;  %v298_v38 = vld [vmem:[%s448_s1 + $0x14] sm:$0xf] }
   0xa   :  { %v243_v39 = vld [vmem:[%s448_s1 + $0x18] sm:$0xf0]  ;;  %v242_v40 = vor.u32 %v299_v37, %v241_v36  ;;  %v233_v42 = vld [vmem:[%s448_s1] sm:$0xf]  ;;  %v297_v43 = vld [vmem:[%s448_s1 + $0x4] sm:$0xf0] }
   0xb   :  { %v246_v41 = vor.u32 %v298_v38, %v243_v39  ;;  %v296_v44 = vld [vmem:[%s448_s1 + $0x4] sm:$0xf]  ;;  %v235_v45 = vld [vmem:[%s448_s1 + $0x8] sm:$0xf0]  ;;  %v234_v46 = vor.u32 %v297_v43, %v233_v42  ;;  %v173_v49 = vld [vmem:[%s450_s2] sm:$0x3] }
   0xc   :  { %132 = vmatpush.bf16.msra.mxu0 %v274_v16  ;;  %v238_v47 = vor.u32 %v296_v44, %v235_v45  ;;  %v295_v48 = vld [vmem:[%s449_s0] sm:$0xff]  ;;  %v175_v50 = vperm.slane %v173_v49, 0  ;;  %v176_v51 = vperm.slane %v173_v49, 1 }
   0xd   :  { %146 = vmatpush.bf16.msra.mxu1 %v278_v17 }
  0x10   :  { %133 = vmatpush.bf16.msra.mxu0 %v266_v22 }
  0x11   :  { %147 = vmatpush.bf16.msra.mxu1 %v270_v23 }
  0x14   :  { %134 = vmatpush.bf16.msra.mxu0 %v258_v28 }
  0x15   :  { %148 = vmatpush.bf16.msra.mxu1 %v262_v29 }
  0x18   :  { %135 = vmatpush.bf16.msra.mxu0 %v250_v34 }
  0x19   :  { %149 = vmatpush.bf16.msra.mxu1 %v254_v35 }
  0x1c   :  { %136 = vmatpush.bf16.msra.mxu0 %v242_v40 }
  0x1d   :  { %150 = vmatpush.bf16.msra.mxu1 %v246_v41 }
  0x20   :  { %137 = vmatpush.bf16.msra.mxu0 %v234_v46 }
  0x21   :  { %151 = vmatpush.bf16.msra.mxu1 %v238_v47 }
  0x23   :  { %138 = vmatmul.bf16.vlgmr.msra.gmra.mxu0 %v295_v48 }
  0x24   :  { %152 = vmatmul.bf16.vlgmr.msra.gmra.mxu1 %v295_v48 }
  0xa0   :  { %v139_v52 = vpop.f32.mrf.mxu0 }
  0xa1   :  { %v179_v53 = vadd.f32 %v175_v50, %v139_v52  ;;  %v153_v54 = vpop.f32.mrf.mxu1 }
  0xa2   :  { %v180_v55 = vadd.f32 %v176_v51, %v153_v54 }
  0xa3   :  { %v187_v56 = vmul.f32 0.044715, %v179_v53  ;;  %v183_v17 = vmul.f32 0.5, %v179_v53 }
  0xa4   :  { %v188_v57 = vmul.f32 0.044715, %v180_v55  ;;  %v184_v20 = vmul.f32 0.5, %v180_v55 }
  0xa5   :  { %v191_v58 = vmul.f32 %v187_v56, %v179_v53 }
  0xa6   :  { %v192_v59 = vmul.f32 %v188_v57, %v180_v55 }
  0xa7   :  { %v195_v60 = vmul.f32 %v191_v58, %v179_v53 }
  0xa8   :  { %v196_v61 = vmul.f32 %v192_v59, %v180_v55  ;;  %v141_v62 = vpop.f32.mrf.mxu0 }
  0xa9   :  { %v199_v63 = vadd.f32 %v195_v60, %v179_v53  ;;  %v181_v0 = vadd.f32 %v175_v50, %v141_v62  ;;  %v155_v1 = vpop.f32.mrf.mxu1 }
  0xaa   :  { %v200_v2 = vadd.f32 %v196_v61, %v180_v55  ;;  %v182_v3 = vadd.f32 %v176_v51, %v155_v1 }
  0xab   :  { %v203_v4 = vmul.f32 0.7978846, %v199_v63  ;;  %v189_v5 = vmul.f32 0.044715, %v181_v0  ;;  %v185_v27 = vmul.f32 0.5, %v181_v0 }
  0xac   :  { %v204_v6 = vmul.f32 0.7978846, %v200_v2  ;;  %v190_v7 = vmul.f32 0.044715, %v182_v3  ;;  %v186_v29 = vmul.f32 0.5, %v182_v3 }
  0xad   :  { %312 = vtanh.f32 %v203_v4  ;;  %v193_v8 = vmul.f32 %v189_v5, %v181_v0 }
  0xae   :  { %314 = vtanh.f32 %v204_v6  ;;  %v194_v9 = vmul.f32 %v190_v7, %v182_v3 }
  0xaf   :  { %v197_v10 = vmul.f32 %v193_v8, %v181_v0 }
  0xb0   :  { %v198_v11 = vmul.f32 %v194_v9, %v182_v3 }
  0xb1   :  { %v201_v12 = vadd.f32 %v197_v10, %v181_v0 }
  0xb2   :  { %v202_v13 = vadd.f32 %v198_v11, %v182_v3 }
  0xb3   :  { %v313_v14 = vpop.eup %312  ;;  %v205_v15 = vmul.f32 0.7978846, %v201_v12 }
  0xb4   :  { %v315_v16 = vpop.eup %314  ;;  %v211_v18 = vadd.f32 1.0, %v313_v14  ;;  %v206_v19 = vmul.f32 0.7978846, %v202_v13 }
  0xb5   :  { %v212_v21 = vadd.f32 1.0, %v315_v16  ;;  %316 = vtanh.f32 %v205_v15 }
  0xb6   :  { %v215_v22 = vmul.f32 %v211_v18, %v183_v17  ;;  %318 = vtanh.f32 %v206_v19 }
  0xb7   :  { %v216_v23 = vmul.f32 %v212_v21, %v184_v20 }
  0xb9   :  { %v219_v24 = vpack.c.bf16 %v216_v23, %v215_v22 }
  0xbb   :  { %v317_v25 = vpop.eup %316  ;;  %221 = vst [vmem:[%s451_s3] sm:$0xff] %v219_v24 }
  0xbc   :  { %v319_v26 = vpop.eup %318  ;;  %v213_v28 = vadd.f32 1.0, %v317_v25 }
  0xbd   :  { %v214_v30 = vadd.f32 1.0, %v319_v26 }
  0xbe   :  { %v217_v31 = vmul.f32 %v213_v28, %v185_v27 }
  0xbf   :  { %v218_v32 = vmul.f32 %v214_v30, %v186_v29 }
  0xc1   :  { %v220_v33 = vpack.c.bf16 %v218_v32, %v217_v31 }
  0xc3   :  { %222 = vst [vmem:[%s451_s3 + $0x8] sm:$0xff] %v220_v33 }

// kernel: san_bert_forward.18
= control target key start
LH: loop header
LB: loop body
LE: loop exit
PB: predicated region body
PF: predicated region fallthrough
CT: control target
= control target key end

     0   :  { %8 = vsyncpa [#allocation4], 0  ;;  %s458_s15 = smov [#allocation3]   ;;  %s459_s17 = smov 192   ;;  %s502_s0 = inlined_call_operand.vmem [shape: bf16[16,128], index: 0, kind: input, shape index: {}]   ;;  %s503_s1 = inlined_call_operand.hbm [shape: bf16[128,384], index: 1, kind: input, shape index: {}]   ;;  %s504_s2 = inlined_call_operand.vmem [shape: f32[1,384], index: 2, kind: input, shape index: {}]   ;;  %s505_s3 = inlined_call_operand.vmem [shape: bf16[16,384], index: 3, kind: output, shape index: {}]  }
   0x1   :  { %s15_s14 = sshll.u32 %s503_s1, 4  ;;  %s17_s16 = sshll.u32 %s458_s15, 4  ;;  %s16_s14 = int_to_ptr.hbm [resolvable:$true] %s15_s14  ;;  %s18_s16 = int_to_ptr.vmem [resolvable:$true] %s17_s16 }
   0x2   :  { %s460_s18 = smov 12  }
   0x3   :  { %23 = dma.hbm_to_vmem [thread:$0]  %s16_s14, 3072, %s18_s16, [#allocation4], %s459_s17, %s459_s17, %s460_s18  }
   0x4   :  { %456 = dma.done.wait [#allocation4], 3072  }
   0x5   :  { %457 = vsyncadd [#allocation4], 4294964224  ;;  %v394_v0 = vld [vmem:[#allocation3 + $0xa8] sm:$0xf]  ;;  %v427_v1 = vld [vmem:[#allocation3 + $0xb0] sm:$0xf0] }
   0x6   :  { %v426_v2 = vld [vmem:[#allocation3 + $0xac] sm:$0xf]  ;;  %v395_v3 = vor.u32 %v427_v1, %v394_v0  ;;  %v396_v4 = vld [vmem:[#allocation3 + $0xb4] sm:$0xf0]  ;;  %v402_v5 = vld [vmem:[#allocation3 + $0xb0] sm:$0xf] }
   0x7   :  { %v428_v6 = vld [vmem:[#allocation3 + $0xb8] sm:$0xf0]  ;;  %v399_v7 = vor.u32 %v426_v2, %v396_v4  ;;  %v382_v9 = vld [vmem:[#allocation3 + $0x90] sm:$0xf]  ;;  %v423_v11 = vld [vmem:[#allocation3 + $0x94] sm:$0xf] }
   0x8   :  { %v403_v8 = vor.u32 %v428_v6, %v402_v5  ;;  %v424_v10 = vld [vmem:[#allocation3 + $0x98] sm:$0xf0]  ;;  %214 = vmatpush.bf16.msra.mxu0 %v395_v3  ;;  %v384_v13 = vld [vmem:[#allocation3 + $0x9c] sm:$0xf0]  ;;  %v390_v14 = vld [vmem:[#allocation3 + $0x98] sm:$0xf] }
   0x9   :  { %v383_v12 = vor.u32 %v424_v10, %v382_v9  ;;  %v425_v15 = vld [vmem:[#allocation3 + $0xa0] sm:$0xf0]  ;;  %228 = vmatpush.bf16.msra.mxu1 %v399_v7  ;;  %v387_v16 = vor.u32 %v423_v11, %v384_v13  ;;  %v370_v18 = vld [vmem:[#allocation3 + $0x78] sm:$0xf]  ;;  %v420_v20 = vld [vmem:[#allocation3 + $0x7c] sm:$0xf] }
   0xa   :  { %242 = vmatpush.bf16.msra.mxu2 %v403_v8  ;;  %v391_v17 = vor.u32 %v425_v15, %v390_v14  ;;  %v421_v19 = vld [vmem:[#allocation3 + $0x80] sm:$0xf0]  ;;  %v372_v21 = vld [vmem:[#allocation3 + $0x84] sm:$0xf0]  ;;  %v378_v22 = vld [vmem:[#allocation3 + $0x80] sm:$0xf] }
   0xb   :  { %v422_v23 = vld [vmem:[#allocation3 + $0x88] sm:$0xf0]  ;;  %v371_v24 = vor.u32 %v421_v19, %v370_v18  ;;  %v375_v25 = vor.u32 %v420_v20, %v372_v21  ;;  %v358_v27 = vld [vmem:[#allocation3 + $0x60] sm:$0xf]  ;;  %v417_v29 = vld [vmem:[#allocation3 + $0x64] sm:$0xf] }
   0xc   :  { %215 = vmatpush.bf16.msra.mxu0 %v383_v12  ;;  %v379_v26 = vor.u32 %v422_v23, %v378_v22  ;;  %v418_v28 = vld [vmem:[#allocation3 + $0x68] sm:$0xf0]  ;;  %v360_v30 = vld [vmem:[#allocation3 + $0x6c] sm:$0xf0]  ;;  %v366_v31 = vld [vmem:[#allocation3 + $0x68] sm:$0xf] }
   0xd   :  { %229 = vmatpush.bf16.msra.mxu1 %v387_v16  ;;  %v419_v32 = vld [vmem:[#allocation3 + $0x70] sm:$0xf0]  ;;  %v359_v33 = vor.u32 %v418_v28, %v358_v27  ;;  %v363_v34 = vor.u32 %v417_v29, %v360_v30  ;;  %v346_v36 = vld [vmem:[#allocation3 + $0x48] sm:$0xf]  ;;  %v414_v38 = vld [vmem:[#allocation3 + $0x4c] sm:$0xf] }
   0xe   :  { %243 = vmatpush.bf16.msra.mxu2 %v391_v17  ;;  %v367_v35 = vor.u32 %v419_v32, %v366_v31  ;;  %v415_v37 = vld [vmem:[#allocation3 + $0x50] sm:$0xf0]  ;;  %v348_v39 = vld [vmem:[#allocation3 + $0x54] sm:$0xf0]  ;;  %v354_v40 = vld [vmem:[#allocation3 + $0x50] sm:$0xf] }
   0xf   :  { %v416_v41 = vld [vmem:[#allocation3 + $0x58] sm:$0xf0]  ;;  %v347_v42 = vor.u32 %v415_v37, %v346_v36  ;;  %v351_v43 = vor.u32 %v414_v38, %v348_v39  ;;  %v334_v45 = vld [vmem:[#allocation3 + $0x30] sm:$0xf]  ;;  %v411_v47 = vld [vmem:[#allocation3 + $0x34] sm:$0xf] }
  0x10   :  { %216 = vmatpush.bf16.msra.mxu0 %v371_v24  ;;  %v355_v44 = vor.u32 %v416_v41, %v354_v40  ;;  %v412_v46 = vld [vmem:[#allocation3 + $0x38] sm:$0xf0]  ;;  %v336_v48 = vld [vmem:[#allocation3 + $0x3c] sm:$0xf0]  ;;  %v342_v49 = vld [vmem:[#allocation3 + $0x38] sm:$0xf] }
  0x11   :  { %230 = vmatpush.bf16.msra.mxu1 %v375_v25  ;;  %v413_v50 = vld [vmem:[#allocation3 + $0x40] sm:$0xf0]  ;;  %v335_v51 = vor.u32 %v412_v46, %v334_v45  ;;  %v339_v52 = vor.u32 %v411_v47, %v336_v48  ;;  %v322_v54 = vld [vmem:[#allocation3 + $0x18] sm:$0xf]  ;;  %v408_v56 = vld [vmem:[#allocation3 + $0x1c] sm:$0xf] }
  0x12   :  { %244 = vmatpush.bf16.msra.mxu2 %v379_v26  ;;  %v343_v53 = vor.u32 %v413_v50, %v342_v49  ;;  %v409_v55 = vld [vmem:[#allocation3 + $0x20] sm:$0xf0]  ;;  %v324_v57 = vld [vmem:[#allocation3 + $0x24] sm:$0xf0]  ;;  %v330_v58 = vld [vmem:[#allocation3 + $0x20] sm:$0xf] }
  0x13   :  { %v410_v59 = vld [vmem:[#allocation3 + $0x28] sm:$0xf0]  ;;  %v323_v60 = vor.u32 %v409_v55, %v322_v54  ;;  %v327_v61 = vor.u32 %v408_v56, %v324_v57  ;;  %v310_v63 = vld [vmem:[#allocation3] sm:$0xf]  ;;  %v405_v1 = vld [vmem:[#allocation3 + $0x4] sm:$0xf] }
  0x14   :  { %217 = vmatpush.bf16.msra.mxu0 %v359_v33  ;;  %v331_v62 = vor.u32 %v410_v59, %v330_v58  ;;  %v406_v0 = vld [vmem:[#allocation3 + $0x8] sm:$0xf0]  ;;  %v312_v2 = vld [vmem:[#allocation3 + $0xc] sm:$0xf0]  ;;  %v318_v3 = vld [vmem:[#allocation3 + $0x8] sm:$0xf] }
  0x15   :  { %231 = vmatpush.bf16.msra.mxu1 %v363_v34  ;;  %v407_v4 = vld [vmem:[#allocation3 + $0x10] sm:$0xf0]  ;;  %v311_v5 = vor.u32 %v406_v0, %v310_v63  ;;  %v315_v6 = vor.u32 %v405_v1, %v312_v2  ;;  %v404_v8 = vld [vmem:[%s502_s0] sm:$0xff] }
  0x16   :  { %245 = vmatpush.bf16.msra.mxu2 %v367_v35  ;;  %v319_v7 = vor.u32 %v407_v4, %v318_v3  ;;  %v277_v9 = vld [vmem:[%s504_s2] sm:$0x7] }
  0x17   :  { %v279_v10 = vperm.slane %v277_v9, 0  ;;  %v280_v11 = vperm.slane %v277_v9, 1  ;;  %v281_v17 = vperm.slane %v277_v9, 2 }
  0x18   :  { %218 = vmatpush.bf16.msra.mxu0 %v347_v42 }
  0x19   :  { %232 = vmatpush.bf16.msra.mxu1 %v351_v43 }
  0x1a   :  { %246 = vmatpush.bf16.msra.mxu2 %v355_v44 }
  0x1c   :  { %219 = vmatpush.bf16.msra.mxu0 %v335_v51 }
  0x1d   :  { %233 = vmatpush.bf16.msra.mxu1 %v339_v52 }
  0x1e   :  { %247 = vmatpush.bf16.msra.mxu2 %v343_v53 }
  0x20   :  { %220 = vmatpush.bf16.msra.mxu0 %v323_v60 }
  0x21   :  { %234 = vmatpush.bf16.msra.mxu1 %v327_v61 }
  0x22   :  { %248 = vmatpush.bf16.msra.mxu2 %v331_v62 }
  0x24   :  { %221 = vmatpush.bf16.msra.mxu0 %v311_v5 }
  0x25   :  { %235 = vmatpush.bf16.msra.mxu1 %v315_v6 }
  0x26   :  { %249 = vmatpush.bf16.msra.mxu2 %v319_v7 }
  0x27   :  { %222 = vmatmul.bf16.vlgmr.msra.gmra.mxu0 %v404_v8 }
  0x28   :  { %236 = vmatmul.bf16.vlgmr.msra.gmra.mxu1 %v404_v8 }
  0x29   :  { %250 = vmatmul.bf16.vlgmr.msra.gmra.mxu2 %v404_v8 }
  0xa4   :  { %v223_v12 = vpop.f32.mrf.mxu0 }
  0xa5   :  { %v285_v13 = vadd.f32 %v279_v10, %v223_v12  ;;  %v237_v14 = vpop.f32.mrf.mxu1 }
  0xa6   :  { %v286_v15 = vadd.f32 %v280_v11, %v237_v14 }
  0xa8   :  { %v291_v16 = vpack.c.bf16 %v286_v15, %v285_v13 }
  0xaa   :  { %295 = vst [vmem:[%s505_s3] sm:$0xff] %v291_v16 }
  0xac   :  { %v251_v18 = vpop.f32.mrf.mxu2  ;;  %v225_v20 = vpop.f32.mrf.mxu0 }
  0xad   :  { %v287_v19 = vadd.f32 %v281_v17, %v251_v18  ;;  %v288_v21 = vadd.f32 %v279_v10, %v225_v20  ;;  %v239_v22 = vpop.f32.mrf.mxu1 }
  0xae   :  { %v289_v24 = vadd.f32 %v280_v11, %v239_v22 }
  0xaf   :  { %v292_v23 = vpack.c.bf16 %v287_v19, %v287_v19 }
  0xb0   :  { %v293_v25 = vpack.c.bf16 %v289_v24, %v288_v21 }
  0xb1   :  { %296 = vst [vmem:[%s505_s3 + $0x8] sm:$0xf] %v292_v23 }
  0xb2   :  { %297 = vst [vmem:[%s505_s3 + $0xc] sm:$0xff] %v293_v25 }
  0xb4   :  { %v253_v26 = vpop.f32.mrf.mxu2 }
  0xb5   :  { %v290_v27 = vadd.f32 %v281_v17, %v253_v26 }
  0xb7   :  { %v294_v28 = vpack.c.bf16 %v290_v27, %v290_v27 }
  0xb9   :  { %298 = vst [vmem:[%s505_s3 + $0x14] sm:$0xf] %v294_v28 }
  0xba   :  { %303 = vsyncpa [#allocation4], 1 }

// kernel: san_bert_forward.17
= control target key start
LH: loop header
LB: loop body
LE: loop exit
PB: predicated region body
PF: predicated region fallthrough
CT: control target
= control target key end

     0   :  { %11 = vsyncpa [#allocation4], 0  ;;  %s442_s24 = smov [#allocation3]   ;;  %s443_s26 = smov 64   ;;  %s511_s0 = inlined_call_operand.vmem [shape: bf16[16,256], index: 0, kind: input, shape index: {}]   ;;  %s512_s1 = inlined_call_operand.hbm [shape: bf16[256,128], index: 1, kind: input, shape index: {}]   ;;  %s513_s2 = inlined_call_operand.vmem [shape: f32[1,128], index: 2, kind: input, shape index: {}]   ;;  %s514_s3 = inlined_call_operand.vmem [shape: bf16[16,128], index: 3, kind: input, shape index: {}]   ;;  %s515_s4 = inlined_call_operand.vmem [shape: f32[1,128], index: 4, kind: input, shape index: {}]   ;;  %s516_s5 = inlined_call_operand.vmem [shape: f32[1,128], index: 5, kind: input, shape index: {}]   ;;  %s517_s6 = inlined_call_operand.vmem [shape: bf16[16,128], index: 6, kind: output, shape index: {}]  }
   0x1   :  { %s18_s23 = sshll.u32 %s512_s1, 4  ;;  %s20_s25 = sshll.u32 %s442_s24, 4  ;;  %s19_s23 = int_to_ptr.hbm [resolvable:$true] %s18_s23  ;;  %s21_s25 = int_to_ptr.vmem [resolvable:$true] %s20_s25 }
   0x2   :  { %s444_s27 = smov 4  }
   0x3   :  { %26 = dma.hbm_to_vmem [thread:$0]  %s19_s23, 2048, %s21_s25, [#allocation4], %s443_s26, %s443_s26, %s444_s27  }
   0x4   :  { %440 = dma.done.wait [#allocation4], 2048  }
   0x5   :  { %441 = vsyncadd [#allocation4], 4294965248  ;;  %v385_v0 = vld [vmem:[#allocation3 + $0x38] sm:$0xff]  ;;  %v384_v2 = vld [vmem:[#allocation3 + $0x30] sm:$0xff]  ;;  %v445_v36 = vmov 128.0  }
   0x6   :  { %v393_v1 = vld [vmem:[#allocation3 + $0x78] sm:$0xff]  ;;  %187 = vmatpush.bf16.msra.mxu0 %v385_v0  ;;  %v392_v3 = vld [vmem:[#allocation3 + $0x70] sm:$0xff]  ;;  %v383_v4 = vld [vmem:[#allocation3 + $0x28] sm:$0xff]  ;;  %410 = vrcp.f32 %v445_v36 }
   0x7   :  { %201 = vmatpush.bf16.msra.mxu1 %v393_v1  ;;  %v391_v5 = vld [vmem:[#allocation3 + $0x68] sm:$0xff]  ;;  %v382_v6 = vld [vmem:[#allocation3 + $0x20] sm:$0xff]  ;;  %v381_v8 = vld [vmem:[#allocation3 + $0x18] sm:$0xff] }
   0x8   :  { %v390_v7 = vld [vmem:[#allocation3 + $0x60] sm:$0xff]  ;;  %v389_v9 = vld [vmem:[#allocation3 + $0x58] sm:$0xff]  ;;  %v380_v10 = vld [vmem:[#allocation3 + $0x10] sm:$0xff] }
   0x9   :  { %v388_v11 = vld [vmem:[#allocation3 + $0x50] sm:$0xff]  ;;  %v379_v12 = vld [vmem:[#allocation3 + $0x8] sm:$0xff]  ;;  %v378_v14 = vld [vmem:[#allocation3] sm:$0xff] }
   0xa   :  { %188 = vmatpush.bf16.msra.mxu0 %v384_v2  ;;  %v387_v13 = vld [vmem:[#allocation3 + $0x48] sm:$0xff]  ;;  %v386_v15 = vld [vmem:[#allocation3 + $0x40] sm:$0xff] }
   0xb   :  { %202 = vmatpush.bf16.msra.mxu1 %v392_v3  ;;  %v306_v16 = vld [vmem:[%s511_s0] sm:$0xf]  ;;  %v377_v17 = vld [vmem:[%s511_s0 + $0x4] sm:$0xf0]  ;;  %v376_v18 = vld [vmem:[%s511_s0 + $0x4] sm:$0xf] }
   0xc   :  { %v308_v19 = vld [vmem:[%s511_s0 + $0x8] sm:$0xf0]  ;;  %v307_v20 = vor.u32 %v377_v17, %v306_v16  ;;  %v395_v22 = vld [vmem:[%s514_s3] sm:$0xff]   ;;  %v411_v37 = vpop.eup %410 }
   0xd   :  { %v311_v21 = vor.u32 %v376_v18, %v308_v19  ;;  %v407_v23 = vld [vmem:[%s513_s2] ss:$0 sm:$0xff]  ;;  %v396_v27 = vunpack.c.l.bf16 %v395_v22  ;;  %v397_v33 = vunpack.c.h.bf16 %v395_v22  ;;  %v241_v38 = vmul.f32 128.0, %v411_v37 }
   0xe   :  { %189 = vmatpush.bf16.msra.mxu0 %v383_v4  ;;  %vm245_vm0 = vweird.f32 %v411_v37 }
   0xf   :  { %203 = vmatpush.bf16.msra.mxu1 %v391_v5  ;;  %v242_v39 = vsub.f32 1.0, %v241_v38  ;;  %v408_v5 = vld [vmem:[%s515_s4] ss:$0 sm:$0xff] }
  0x11   :  { %v243_v40 = vmul.f32 %v411_v37, %v242_v39 }
  0x12   :  { %190 = vmatpush.bf16.msra.mxu0 %v382_v6 }
  0x13   :  { %204 = vmatpush.bf16.msra.mxu1 %v390_v7  ;;  %v244_v41 = vadd.f32 %v411_v37, %v243_v40 }
  0x15   :  { %v246_v42 = vsel %vm245_vm0, %v411_v37, %v244_v41 }
  0x16   :  { %191 = vmatpush.bf16.msra.mxu0 %v381_v8 }
  0x17   :  { %205 = vmatpush.bf16.msra.mxu1 %v389_v9  ;;  %v409_v9 = vld [vmem:[%s516_s5] ss:$0 sm:$0xff] }
  0x1a   :  { %192 = vmatpush.bf16.msra.mxu0 %v380_v10 }
  0x1b   :  { %206 = vmatpush.bf16.msra.mxu1 %v388_v11 }
  0x1e   :  { %193 = vmatpush.bf16.msra.mxu0 %v379_v12 }
  0x1f   :  { %207 = vmatpush.bf16.msra.mxu1 %v387_v13 }
  0x22   :  { %194 = vmatpush.bf16.msra.mxu0 %v378_v14 }
  0x23   :  { %208 = vmatpush.bf16.msra.mxu1 %v386_v15 }
  0x25   :  { %195 = vmatmul.bf16.vlgmr.msra.gmra.mxu0 %v307_v20 }
  0x26   :  { %209 = vmatmul.bf16.vlgmr.msra.gmra.mxu1 %v311_v21 }
  0xa2   :  { %v196_v24 = vpop.f32.mrf.mxu0 }
  0xa3   :  { %v210_v25 = vpop.f32.mrf.mxu1 }
  0xa4   :  { %v211_v26 = vadd.f32 %v210_v25, %v196_v24 }
  0xa6   :  { %v228_v28 = vadd.f32 %v407_v23, %v211_v26 }
  0xa8   :  { %v234_v29 = vadd.f32 %v396_v27, %v228_v28 }
  0xaa   :  { %236 = vadd.xlane.f32.xlu0 %v234_v29  ;;  %v198_v30 = vpop.f32.mrf.mxu0 }
  0xab   :  { %v212_v31 = vpop.f32.mrf.mxu1 }
  0xac   :  { %v213_v32 = vadd.f32 %v212_v31, %v198_v30 }
  0xae   :  { %v229_v34 = vadd.f32 %v407_v23, %v213_v32 }
  0xb0   :  { %v235_v35 = vadd.f32 %v397_v33, %v229_v34 }
  0xb2   :  { %238 = vadd.xlane.f32.xlu0 %v235_v35 }
 0x11d   :  { %v237_v43 = vpop.xlane.xlu0 %236 }
 0x11e   :  { %v247_v44 = vmul.f32 %v246_v42, %v237_v43 }
 0x120   :  { %v249_v45 = vsub.f32 %v234_v29, %v247_v44 }
 0x122   :  { %v251_v46 = vmul.f32 %v249_v45, %v249_v45 }
 0x124   :  { %253 = vadd.xlane.f32.xlu1 %v251_v46 }
 0x125   :  { %v239_v47 = vpop.xlane.xlu0 %238 }
 0x126   :  { %v248_v48 = vmul.f32 %v246_v42, %v239_v47 }
 0x128   :  { %v250_v49 = vsub.f32 %v235_v35, %v248_v48 }
 0x12a   :  { %v252_v50 = vmul.f32 %v250_v49, %v250_v49 }
 0x12c   :  { %255 = vadd.xlane.f32.xlu1 %v252_v50 }
 0x197   :  { %v254_v51 = vpop.xlane.xlu1 %253 }
 0x198   :  { %v257_v52 = vmul.f32 %v254_v51, %v246_v42 }
 0x19a   :  { %v259_v53 = vadd.f32 1e-12, %v257_v52 }
 0x19c   :  { %412 = vrsqrt.f32 %v259_v53  ;;  %vm267_vm2 = vweird.f32 %v259_v53 }
 0x19f   :  { %v256_v54 = vpop.xlane.xlu1 %255 }
 0x1a0   :  { %v258_v55 = vmul.f32 %v256_v54, %v246_v42 }
 0x1a2   :  { %v413_v56 = vpop.eup %412  ;;  %v260_v57 = vadd.f32 1e-12, %v258_v55 }
 0x1a3   :  { %v262_v58 = vmul.f32 %v413_v56, %v259_v53  ;;  %vm268_vm1 = vweird.f32 %v413_v56 }
 0x1a4   :  { %414 = vrsqrt.f32 %v260_v57  ;;  %vm269_vm3 = vmor %vm267_vm2, %vm268_vm1  ;;  %vm277_vm5 = vweird.f32 %v260_v57 }
 0x1a5   :  { %v263_v59 = vmul.f32 %v413_v56, %v262_v58 }
 0x1a7   :  { %v264_v60 = vmul.f32 0.5, %v263_v59 }
 0x1a9   :  { %v265_v61 = vsub.f32 1.5, %v264_v60 }
 0x1aa   :  { %v415_v62 = vpop.eup %414 }
 0x1ab   :  { %v266_v63 = vmul.f32 %v413_v56, %v265_v61  ;;  %v272_v0 = vmul.f32 %v415_v62, %v260_v57  ;;  %vm278_vm4 = vweird.f32 %v415_v62 }
 0x1ac   :  { %vm279_vm6 = vmor %vm277_vm5, %vm278_vm4 }
 0x1ad   :  { %v273_v1 = vmul.f32 %v415_v62, %v272_v0  ;;  %v270_v2 = vsel %vm269_vm3, %v413_v56, %v266_v63 }
 0x1ae   :  { %v281_v6 = vmul.f32 %v270_v2, %v249_v45 }
 0x1af   :  { %v274_v3 = vmul.f32 0.5, %v273_v1 }
 0x1b0   :  { %v287_v10 = vmul.f32 %v408_v5, %v281_v6 }
 0x1b1   :  { %v275_v4 = vsub.f32 1.5, %v274_v3 }
 0x1b2   :  { %v293_v13 = vadd.f32 %v409_v9, %v287_v10 }
 0x1b3   :  { %v276_v7 = vmul.f32 %v415_v62, %v275_v4 }
 0x1b5   :  { %v280_v8 = vsel %vm279_vm6, %v415_v62, %v276_v7 }
 0x1b6   :  { %v282_v11 = vmul.f32 %v280_v8, %v250_v49 }
 0x1b8   :  { %v288_v12 = vmul.f32 %v408_v5, %v282_v11 }
 0x1ba   :  { %v294_v14 = vadd.f32 %v409_v9, %v288_v12 }
 0x1bc   :  { %v401_v15 = vpack.c.bf16 %v294_v14, %v293_v13 }
 0x1be   :  { %402 = vst [vmem:[%s517_s6] sm:$0xff] %v401_v15  }
 0x1bf   :  { %303 = vsyncpa [#allocation4], 1 }

// kernel: san_bert_forward.20
= control target key start
LH: loop header
LB: loop body
LE: loop exit
PB: predicated region body
PF: predicated region fallthrough
CT: control target
= control target key end

     0   :  { %11 = vsyncpa [#allocation4], 0  ;;  %s315_s24 = smov [#allocation3]   ;;  %s316_s26 = smov 64   ;;  %s375_s0 = inlined_call_operand.vmem [shape: bf16[16,128], index: 0, kind: input, shape index: {}]   ;;  %s376_s1 = inlined_call_operand.hbm [shape: bf16[128,128], index: 1, kind: input, shape index: {}]   ;;  %s377_s2 = inlined_call_operand.vmem [shape: f32[1,128], index: 2, kind: input, shape index: {}]   ;;  %s378_s3 = inlined_call_operand.vmem [shape: bf16[16,128], index: 3, kind: input, shape index: {}]   ;;  %s379_s4 = inlined_call_operand.vmem [shape: f32[1,128], index: 4, kind: input, shape index: {}]   ;;  %s380_s5 = inlined_call_operand.vmem [shape: f32[1,128], index: 5, kind: input, shape index: {}]   ;;  %s381_s6 = inlined_call_operand.vmem [shape: bf16[16,128], index: 6, kind: output, shape index: {}]  }
   0x1   :  { %s18_s23 = sshll.u32 %s376_s1, 4  ;;  %s20_s25 = sshll.u32 %s315_s24, 4  ;;  %s19_s23 = int_to_ptr.hbm [resolvable:$true] %s18_s23  ;;  %s21_s25 = int_to_ptr.vmem [resolvable:$true] %s20_s25 }
   0x2   :  { %s317_s27 = smov 4  }
   0x3   :  { %26 = dma.hbm_to_vmem [thread:$0]  %s19_s23, 1024, %s21_s25, [#allocation4], %s316_s26, %s316_s26, %s317_s27  }
   0x4   :  { %313 = dma.done.wait [#allocation4], 1024  }
   0x5   :  { %314 = vsyncadd [#allocation4], 4294966272  ;;  %v266_v0 = vld [vmem:[#allocation3 + $0x38] sm:$0xff]  ;;  %v265_v1 = vld [vmem:[#allocation3 + $0x30] sm:$0xff]  ;;  %v318_v19 = vmov 128.0  }
   0x6   :  { %119 = vmatpush.bf16.msra.mxu0 %v266_v0  ;;  %v264_v2 = vld [vmem:[#allocation3 + $0x28] sm:$0xff]  ;;  %v263_v3 = vld [vmem:[#allocation3 + $0x20] sm:$0xff]  ;;  %v262_v4 = vld [vmem:[#allocation3 + $0x18] sm:$0xff]  ;;  %283 = vrcp.f32 %v318_v19 }
   0x7   :  { %v261_v5 = vld [vmem:[#allocation3 + $0x10] sm:$0xff]  ;;  %v260_v6 = vld [vmem:[#allocation3 + $0x8] sm:$0xff]  ;;  %v259_v7 = vld [vmem:[#allocation3] sm:$0xff] }
   0x8   :  { %v258_v8 = vld [vmem:[%s375_s0] sm:$0xff] }
   0x9   :  { %v268_v9 = vld [vmem:[%s378_s3] sm:$0xff]  }
   0xa   :  { %120 = vmatpush.bf16.msra.mxu0 %v265_v1  ;;  %v280_v10 = vld [vmem:[%s377_s2] ss:$0 sm:$0xff]  ;;  %v269_v11 = vunpack.c.l.bf16 %v268_v9  ;;  %v270_v15 = vunpack.c.h.bf16 %v268_v9 }
   0xb   :  { %v281_v52 = vld [vmem:[%s379_s4] ss:$0 sm:$0xff] }
   0xc   :  { %v284_v20 = vpop.eup %283  ;;  %v282_v56 = vld [vmem:[%s380_s5] ss:$0 sm:$0xff] }
   0xd   :  { %v159_v21 = vmul.f32 128.0, %v284_v20  ;;  %vm163_vm0 = vweird.f32 %v284_v20 }
   0xe   :  { %121 = vmatpush.bf16.msra.mxu0 %v264_v2 }
   0xf   :  { %v160_v22 = vsub.f32 1.0, %v159_v21 }
  0x11   :  { %v161_v23 = vmul.f32 %v284_v20, %v160_v22 }
  0x12   :  { %122 = vmatpush.bf16.msra.mxu0 %v263_v3 }
  0x13   :  { %v162_v24 = vadd.f32 %v284_v20, %v161_v23 }
  0x15   :  { %v164_v25 = vsel %vm163_vm0, %v284_v20, %v162_v24 }
  0x16   :  { %123 = vmatpush.bf16.msra.mxu0 %v262_v4 }
  0x1a   :  { %124 = vmatpush.bf16.msra.mxu0 %v261_v5 }
  0x1e   :  { %125 = vmatpush.bf16.msra.mxu0 %v260_v6 }
  0x22   :  { %126 = vmatpush.bf16.msra.mxu0 %v259_v7 }
  0x25   :  { %127 = vmatmul.bf16.vlgmr.msra.gmra.mxu0 %v258_v8 }
  0xa2   :  { %v128_v12 = vpop.f32.mrf.mxu0 }
  0xa3   :  { %v146_v13 = vadd.f32 %v280_v10, %v128_v12 }
  0xa5   :  { %v152_v14 = vadd.f32 %v269_v11, %v146_v13 }
  0xa7   :  { %154 = vadd.xlane.f32.xlu0 %v152_v14 }
  0xaa   :  { %v130_v16 = vpop.f32.mrf.mxu0 }
  0xab   :  { %v147_v17 = vadd.f32 %v280_v10, %v130_v16 }
  0xad   :  { %v153_v18 = vadd.f32 %v270_v15, %v147_v17 }
  0xaf   :  { %156 = vadd.xlane.f32.xlu0 %v153_v18 }
 0x11a   :  { %v155_v26 = vpop.xlane.xlu0 %154 }
 0x11b   :  { %v165_v27 = vmul.f32 %v164_v25, %v155_v26 }
 0x11d   :  { %v167_v28 = vsub.f32 %v152_v14, %v165_v27 }
 0x11f   :  { %v169_v29 = vmul.f32 %v167_v28, %v167_v28 }
 0x121   :  { %171 = vadd.xlane.f32.xlu1 %v169_v29 }
 0x122   :  { %v157_v30 = vpop.xlane.xlu0 %156 }
 0x123   :  { %v166_v31 = vmul.f32 %v164_v25, %v157_v30 }
 0x125   :  { %v168_v32 = vsub.f32 %v153_v18, %v166_v31 }
 0x127   :  { %v170_v33 = vmul.f32 %v168_v32, %v168_v32 }
 0x129   :  { %173 = vadd.xlane.f32.xlu1 %v170_v33 }
 0x194   :  { %v172_v34 = vpop.xlane.xlu1 %171 }
 0x195   :  { %v175_v35 = vmul.f32 %v172_v34, %v164_v25 }
 0x197   :  { %v177_v36 = vadd.f32 1e-12, %v175_v35 }
 0x199   :  { %285 = vrsqrt.f32 %v177_v36  ;;  %vm185_vm2 = vweird.f32 %v177_v36 }
 0x19c   :  { %v174_v37 = vpop.xlane.xlu1 %173 }
 0x19d   :  { %v176_v38 = vmul.f32 %v174_v37, %v164_v25 }
 0x19f   :  { %v286_v39 = vpop.eup %285  ;;  %v178_v40 = vadd.f32 1e-12, %v176_v38 }
 0x1a0   :  { %v180_v41 = vmul.f32 %v286_v39, %v177_v36  ;;  %vm186_vm1 = vweird.f32 %v286_v39 }
 0x1a1   :  { %287 = vrsqrt.f32 %v178_v40  ;;  %vm187_vm3 = vmor %vm185_vm2, %vm186_vm1  ;;  %vm195_vm5 = vweird.f32 %v178_v40 }
 0x1a2   :  { %v181_v42 = vmul.f32 %v286_v39, %v180_v41 }
 0x1a4   :  { %v182_v43 = vmul.f32 0.5, %v181_v42 }
 0x1a6   :  { %v183_v44 = vsub.f32 1.5, %v182_v43 }
 0x1a7   :  { %v288_v45 = vpop.eup %287 }
 0x1a8   :  { %v184_v46 = vmul.f32 %v286_v39, %v183_v44  ;;  %v190_v47 = vmul.f32 %v288_v45, %v178_v40  ;;  %vm196_vm4 = vweird.f32 %v288_v45 }
 0x1a9   :  { %vm197_vm6 = vmor %vm195_vm5, %vm196_vm4 }
 0x1aa   :  { %v191_v48 = vmul.f32 %v288_v45, %v190_v47  ;;  %v188_v49 = vsel %vm187_vm3, %v286_v39, %v184_v46 }
 0x1ab   :  { %v199_v53 = vmul.f32 %v188_v49, %v167_v28 }
 0x1ac   :  { %v192_v50 = vmul.f32 0.5, %v191_v48 }
 0x1ad   :  { %v205_v57 = vmul.f32 %v281_v52, %v199_v53 }
 0x1ae   :  { %v193_v51 = vsub.f32 1.5, %v192_v50 }
 0x1af   :  { %v211_v60 = vadd.f32 %v282_v56, %v205_v57 }
 0x1b0   :  { %v194_v54 = vmul.f32 %v288_v45, %v193_v51 }
 0x1b2   :  { %v198_v55 = vsel %vm197_vm6, %v288_v45, %v194_v54 }
 0x1b3   :  { %v200_v58 = vmul.f32 %v198_v55, %v168_v32 }
 0x1b5   :  { %v206_v59 = vmul.f32 %v281_v52, %v200_v58 }
 0x1b7   :  { %v212_v61 = vadd.f32 %v282_v56, %v206_v59 }
 0x1b9   :  { %v274_v62 = vpack.c.bf16 %v212_v61, %v211_v60 }
 0x1bb   :  { %275 = vst [vmem:[%s381_s6] sm:$0xff] %v274_v62  }
 0x1bc   :  { %221 = vsyncpa [#allocation4], 1 }

// kernel: san_bert_forward.21
= control target key start
LH: loop header
LB: loop body
LE: loop exit
PB: predicated region body
PF: predicated region fallthrough
CT: control target
= control target key end

     0   :  { %8 = vsyncpa [#allocation4], 0  ;;  %s366_s15 = smov [#allocation3]   ;;  %s367_s17 = smov 128   ;;  %s404_s0 = inlined_call_operand.vmem [shape: bf16[16,128], index: 0, kind: input, shape index: {}]   ;;  %s405_s1 = inlined_call_operand.hbm [shape: bf16[128,256], index: 1, kind: input, shape index: {}]   ;;  %s406_s2 = inlined_call_operand.vmem [shape: f32[1,256], index: 2, kind: input, shape index: {}]   ;;  %s407_s3 = inlined_call_operand.vmem [shape: bf16[16,256], index: 3, kind: output, shape index: {}]  }
   0x1   :  { %s15_s14 = sshll.u32 %s405_s1, 4  ;;  %s17_s16 = sshll.u32 %s366_s15, 4  ;;  %s16_s14 = int_to_ptr.hbm [resolvable:$true] %s15_s14  ;;  %s18_s16 = int_to_ptr.vmem [resolvable:$true] %s17_s16 }
   0x2   :  { %s368_s18 = smov 8  }
   0x3   :  { %23 = dma.hbm_to_vmem [thread:$0]  %s16_s14, 2048, %s18_s16, [#allocation4], %s367_s17, %s367_s17, %s368_s18  }
   0x4   :  { %364 = dma.done.wait [#allocation4], 2048  }
   0x5   :  { %365 = vsyncadd [#allocation4], 4294965248  ;;  %v306_v0 = vld [vmem:[#allocation3 + $0x70] sm:$0xf]  ;;  %v328_v1 = vld [vmem:[#allocation3 + $0x74] sm:$0xf0] }
   0x6   :  { %v327_v2 = vld [vmem:[#allocation3 + $0x74] sm:$0xf]  ;;  %v307_v3 = vor.u32 %v328_v1, %v306_v0  ;;  %v308_v4 = vld [vmem:[#allocation3 + $0x78] sm:$0xf0]  ;;  %v298_v5 = vld [vmem:[#allocation3 + $0x60] sm:$0xf] }
   0x7   :  { %v326_v6 = vld [vmem:[#allocation3 + $0x64] sm:$0xf0]  ;;  %v311_v7 = vor.u32 %v327_v2, %v308_v4  ;;  %v325_v8 = vld [vmem:[#allocation3 + $0x64] sm:$0xf]  ;;  %v300_v9 = vld [vmem:[#allocation3 + $0x68] sm:$0xf0] }
   0x8   :  { %146 = vmatpush.bf16.msra.mxu0 %v307_v3  ;;  %v299_v10 = vor.u32 %v326_v6, %v298_v5  ;;  %v303_v11 = vor.u32 %v325_v8, %v300_v9  ;;  %v290_v12 = vld [vmem:[#allocation3 + $0x50] sm:$0xf]  ;;  %v324_v13 = vld [vmem:[#allocation3 + $0x54] sm:$0xf0]  ;;  %v323_v14 = vld [vmem:[#allocation3 + $0x54] sm:$0xf] }
   0x9   :  { %160 = vmatpush.bf16.msra.mxu1 %v311_v7  ;;  %v292_v15 = vld [vmem:[#allocation3 + $0x58] sm:$0xf0]  ;;  %v291_v16 = vor.u32 %v324_v13, %v290_v12  ;;  %v282_v18 = vld [vmem:[#allocation3 + $0x40] sm:$0xf]  ;;  %v322_v19 = vld [vmem:[#allocation3 + $0x44] sm:$0xf0] }
   0xa   :  { %v295_v17 = vor.u32 %v323_v14, %v292_v15  ;;  %v321_v20 = vld [vmem:[#allocation3 + $0x44] sm:$0xf]  ;;  %v284_v21 = vld [vmem:[#allocation3 + $0x48] sm:$0xf0]  ;;  %v283_v22 = vor.u32 %v322_v19, %v282_v18  ;;  %v274_v24 = vld [vmem:[#allocation3 + $0x30] sm:$0xf] }
   0xb   :  { %v287_v23 = vor.u32 %v321_v20, %v284_v21  ;;  %v320_v25 = vld [vmem:[#allocation3 + $0x34] sm:$0xf0]  ;;  %v319_v26 = vld [vmem:[#allocation3 + $0x34] sm:$0xf]  ;;  %v276_v27 = vld [vmem:[#allocation3 + $0x38] sm:$0xf0] }
   0xc   :  { %147 = vmatpush.bf16.msra.mxu0 %v299_v10  ;;  %v275_v28 = vor.u32 %v320_v25, %v274_v24  ;;  %v279_v29 = vor.u32 %v319_v26, %v276_v27  ;;  %v266_v30 = vld [vmem:[#allocation3 + $0x20] sm:$0xf]  ;;  %v318_v31 = vld [vmem:[#allocation3 + $0x24] sm:$0xf0]  ;;  %v317_v32 = vld [vmem:[#allocation3 + $0x24] sm:$0xf] }
   0xd   :  { %161 = vmatpush.bf16.msra.mxu1 %v303_v11  ;;  %v268_v33 = vld [vmem:[#allocation3 + $0x28] sm:$0xf0]  ;;  %v267_v34 = vor.u32 %v318_v31, %v266_v30  ;;  %v258_v36 = vld [vmem:[#allocation3 + $0x10] sm:$0xf]  ;;  %v316_v37 = vld [vmem:[#allocation3 + $0x14] sm:$0xf0] }
   0xe   :  { %v271_v35 = vor.u32 %v317_v32, %v268_v33  ;;  %v315_v38 = vld [vmem:[#allocation3 + $0x14] sm:$0xf]  ;;  %v260_v39 = vld [vmem:[#allocation3 + $0x18] sm:$0xf0]  ;;  %v259_v40 = vor.u32 %v316_v37, %v258_v36  ;;  %v250_v42 = vld [vmem:[#allocation3] sm:$0xf] }
   0xf   :  { %v263_v41 = vor.u32 %v315_v38, %v260_v39  ;;  %v314_v43 = vld [vmem:[#allocation3 + $0x4] sm:$0xf0]  ;;  %v313_v44 = vld [vmem:[#allocation3 + $0x4] sm:$0xf]  ;;  %v252_v45 = vld [vmem:[#allocation3 + $0x8] sm:$0xf0] }
  0x10   :  { %148 = vmatpush.bf16.msra.mxu0 %v291_v16  ;;  %v251_v46 = vor.u32 %v314_v43, %v250_v42  ;;  %v255_v47 = vor.u32 %v313_v44, %v252_v45  ;;  %v312_v48 = vld [vmem:[%s404_s0] sm:$0xff] }
  0x11   :  { %162 = vmatpush.bf16.msra.mxu1 %v295_v17  ;;  %v189_v49 = vld [vmem:[%s406_s2] sm:$0x3] }
  0x12   :  { %v191_v50 = vperm.slane %v189_v49, 0  ;;  %v192_v51 = vperm.slane %v189_v49, 1 }
  0x14   :  { %149 = vmatpush.bf16.msra.mxu0 %v283_v22 }
  0x15   :  { %163 = vmatpush.bf16.msra.mxu1 %v287_v23 }
  0x18   :  { %150 = vmatpush.bf16.msra.mxu0 %v275_v28 }
  0x19   :  { %164 = vmatpush.bf16.msra.mxu1 %v279_v29 }
  0x1c   :  { %151 = vmatpush.bf16.msra.mxu0 %v267_v34 }
  0x1d   :  { %165 = vmatpush.bf16.msra.mxu1 %v271_v35 }
  0x20   :  { %152 = vmatpush.bf16.msra.mxu0 %v259_v40 }
  0x21   :  { %166 = vmatpush.bf16.msra.mxu1 %v263_v41 }
  0x24   :  { %153 = vmatpush.bf16.msra.mxu0 %v251_v46 }
  0x25   :  { %167 = vmatpush.bf16.msra.mxu1 %v255_v47 }
  0x27   :  { %154 = vmatmul.bf16.vlgmr.msra.gmra.mxu0 %v312_v48 }
  0x28   :  { %168 = vmatmul.bf16.vlgmr.msra.gmra.mxu1 %v312_v48 }
  0xa4   :  { %v155_v52 = vpop.f32.mrf.mxu0 }
  0xa5   :  { %v195_v53 = vadd.f32 %v191_v50, %v155_v52  ;;  %v169_v54 = vpop.f32.mrf.mxu1 }
  0xa6   :  { %v196_v55 = vadd.f32 %v192_v51, %v169_v54 }
  0xa7   :  { %v203_v56 = vmul.f32 0.044715, %v195_v53  ;;  %v199_v17 = vmul.f32 0.5, %v195_v53 }
  0xa8   :  { %v204_v57 = vmul.f32 0.044715, %v196_v55  ;;  %v200_v20 = vmul.f32 0.5, %v196_v55 }
  0xa9   :  { %v207_v58 = vmul.f32 %v203_v56, %v195_v53 }
  0xaa   :  { %v208_v59 = vmul.f32 %v204_v57, %v196_v55 }
  0xab   :  { %v211_v60 = vmul.f32 %v207_v58, %v195_v53 }
  0xac   :  { %v212_v61 = vmul.f32 %v208_v59, %v196_v55  ;;  %v157_v62 = vpop.f32.mrf.mxu0 }
  0xad   :  { %v215_v63 = vadd.f32 %v211_v60, %v195_v53  ;;  %v197_v0 = vadd.f32 %v191_v50, %v157_v62  ;;  %v171_v1 = vpop.f32.mrf.mxu1 }
  0xae   :  { %v216_v2 = vadd.f32 %v212_v61, %v196_v55  ;;  %v198_v3 = vadd.f32 %v192_v51, %v171_v1 }
  0xaf   :  { %v219_v4 = vmul.f32 0.7978846, %v215_v63  ;;  %v205_v5 = vmul.f32 0.044715, %v197_v0  ;;  %v201_v27 = vmul.f32 0.5, %v197_v0 }
  0xb0   :  { %v220_v6 = vmul.f32 0.7978846, %v216_v2  ;;  %v206_v7 = vmul.f32 0.044715, %v198_v3  ;;  %v202_v29 = vmul.f32 0.5, %v198_v3 }
  0xb1   :  { %332 = vtanh.f32 %v219_v4  ;;  %v209_v8 = vmul.f32 %v205_v5, %v197_v0 }
  0xb2   :  { %334 = vtanh.f32 %v220_v6  ;;  %v210_v9 = vmul.f32 %v206_v7, %v198_v3 }
  0xb3   :  { %v213_v10 = vmul.f32 %v209_v8, %v197_v0 }
  0xb4   :  { %v214_v11 = vmul.f32 %v210_v9, %v198_v3 }
  0xb5   :  { %v217_v12 = vadd.f32 %v213_v10, %v197_v0 }
  0xb6   :  { %v218_v13 = vadd.f32 %v214_v11, %v198_v3 }
  0xb7   :  { %v333_v14 = vpop.eup %332  ;;  %v221_v15 = vmul.f32 0.7978846, %v217_v12 }
  0xb8   :  { %v335_v16 = vpop.eup %334  ;;  %v227_v18 = vadd.f32 1.0, %v333_v14  ;;  %v222_v19 = vmul.f32 0.7978846, %v218_v13 }
  0xb9   :  { %v228_v21 = vadd.f32 1.0, %v335_v16  ;;  %336 = vtanh.f32 %v221_v15 }
  0xba   :  { %v231_v22 = vmul.f32 %v227_v18, %v199_v17  ;;  %338 = vtanh.f32 %v222_v19 }
  0xbb   :  { %v232_v23 = vmul.f32 %v228_v21, %v200_v20 }
  0xbd   :  { %v235_v24 = vpack.c.bf16 %v232_v23, %v231_v22 }
  0xbf   :  { %v337_v25 = vpop.eup %336  ;;  %237 = vst [vmem:[%s407_s3] sm:$0xff] %v235_v24 }
  0xc0   :  { %v339_v26 = vpop.eup %338  ;;  %v229_v28 = vadd.f32 1.0, %v337_v25 }
  0xc1   :  { %v230_v30 = vadd.f32 1.0, %v339_v26 }
  0xc2   :  { %v233_v31 = vmul.f32 %v229_v28, %v201_v27 }
  0xc3   :  { %v234_v32 = vmul.f32 %v230_v30, %v202_v29 }
  0xc5   :  { %v236_v33 = vpack.c.bf16 %v234_v32, %v233_v31 }
  0xc7   :  { %238 = vst [vmem:[%s407_s3 + $0x8] sm:$0xff] %v236_v33 }
  0xc8   :  { %243 = vsyncpa [#allocation4], 1 }

// kernel: san_bert_forward.23
= control target key start
LH: loop header
LB: loop body
LE: loop exit
PB: predicated region body
PF: predicated region fallthrough
CT: control target
= control target key end

     0   :  { %8 = vsyncpa [#allocation4], 0  ;;  %s206_s15 = smov [#allocation3]   ;;  %s207_s17 = smov 64   ;;  %s242_s0 = inlined_call_operand.vmem [shape: bf16[2,128], index: 0, kind: input, shape index: {}]   ;;  %s243_s1 = inlined_call_operand.hbm [shape: bf16[128,128], index: 1, kind: input, shape index: {}]   ;;  %s244_s2 = inlined_call_operand.vmem [shape: f32[1,128], index: 2, kind: input, shape index: {}]   ;;  %s245_s3 = inlined_call_operand.vmem [shape: bf16[2,128], index: 3, kind: output, shape index: {}]  }
   0x1   :  { %s15_s14 = sshll.u32 %s243_s1, 4  ;;  %s17_s16 = sshll.u32 %s206_s15, 4  ;;  %s16_s14 = int_to_ptr.hbm [resolvable:$true] %s15_s14  ;;  %s18_s16 = int_to_ptr.vmem [resolvable:$true] %s17_s16 }
   0x2   :  { %s208_s18 = smov 4  }
   0x3   :  { %23 = dma.hbm_to_vmem [thread:$0]  %s16_s14, 1024, %s18_s16, [#allocation4], %s207_s17, %s207_s17, %s208_s18  }
   0x4   :  { %204 = dma.done.wait [#allocation4], 1024  }
   0x5   :  { %205 = vsyncadd [#allocation4], 4294966272  ;;  %v172_v0 = vld [vmem:[#allocation3 + $0x38] sm:$0xff]  ;;  %v171_v1 = vld [vmem:[#allocation3 + $0x30] sm:$0xff]  ;;  %v209_v2 = vmov 0.0  }
   0x6   :  { %101 = vmatpush.bf16.msra.mxu0 %v172_v0  ;;  %34 = vst [vmem:[#allocation2] sm:$0x3] %v209_v2  ;;  %v170_v3 = vld [vmem:[#allocation3 + $0x28] sm:$0xff]  ;;  %v169_v4 = vld [vmem:[#allocation3 + $0x20] sm:$0xff]  ;;  %v168_v5 = vld [vmem:[#allocation3 + $0x18] sm:$0xff] }
   0x7   :  { %v167_v6 = vld [vmem:[#allocation3 + $0x10] sm:$0xff]  ;;  %v166_v7 = vld [vmem:[#allocation3 + $0x8] sm:$0xff]  ;;  %v165_v8 = vld [vmem:[#allocation3] sm:$0xff] }
   0x8   :  { %v36_v9 = vld [vmem:[%s242_s0] sm:$0x1] }
   0x9   :  { %v177_v13 = vld [vmem:[%s244_s2] ss:$0 sm:$0xff] }
   0xa   :  { %102 = vmatpush.bf16.msra.mxu0 %v171_v1 }
   0xd   :  { %v35_v10 = vld [vmem:[#allocation2] sm:$0x3] }
   0xe   :  { %103 = vmatpush.bf16.msra.mxu0 %v170_v3 }
  0x12   :  { %104 = vmatpush.bf16.msra.mxu0 %v169_v4 }
  0x16   :  { %105 = vmatpush.bf16.msra.mxu0 %v168_v5 }
  0x1a   :  { %106 = vmatpush.bf16.msra.mxu0 %v167_v6 }
  0x1e   :  { %107 = vmatpush.bf16.msra.mxu0 %v166_v7 }
  0x22   :  { %108 = vmatpush.bf16.msra.mxu0 %v165_v8 }
  0x25   :  { %109 = vmatmul.bf16.vlgmr.msra.gmra.mxu0 %v36_v9 }
  0xa2   :  { %v110_v11 = vpop.f32.mrf.mxu0 }
  0xa3   :  { %v114_v12 = vadd.f32 %v110_v11, %v35_v10 }
  0xa5   :  { %115 = vst [vmem:[#allocation2] sm:$0x3] %v114_v12 }
  0xaa   :  { %v112_v14 = vpop.f32.mrf.mxu0 }
  0xac   :  { %v119_v15 = vld [vmem:[#allocation2] sm:$0x3] }
  0xad   :  { %v124_v16 = vadd.f32 %v177_v13, %v119_v15 }
  0xaf   :  { %178 = vtanh.f32 %v124_v16 }
  0xb5   :  { %v179_v17 = vpop.eup %178 }
  0xb6   :  { %v126_v18 = vpack.c.bf16 %v179_v17, %v179_v17 }
  0xb8   :  { %127 = vst [vmem:[%s245_s3] sm:$0x1] %v126_v18 }
  0xb9   :  { %132 = vsyncpa [#allocation4], 1 }

</bundles_post_ra>
